<compile_context>
chip_gen: v5e
topology: v5e:2x2
jax: 0.10.0
libtpu: 0.0.40
codegen_flags: <defaults>
</compile_context>

<pallas_src>
import functools

import jax
import jax.numpy as jnp
from jax.experimental import pallas as pl
from jax.experimental.pallas import tpu as pltpu


def _round_up(x, m):
    return (x + m - 1) // m * m


def _device_defaults():
    """(tile_rows, vmem_limit_bytes) per TPU generation."""
    vmem_cap = 64 * 1024 * 1024
    try:
        vmem_cap = int(getattr(pltpu.get_tpu_info(), "vmem_capacity_bytes", vmem_cap))
    except Exception:
        pass
    if vmem_cap >= 96 * 1024 * 1024:          # v5e / v6e: 128 MiB VMEM
        return 1536, 96 * 1024 * 1024
    return 512, 48 * 1024 * 1024              # v7x (64 MiB VMEM) and unknown: conservative


def _char_embed_kernel(frame_ref, thi_ref, tlo_ref, cbias_ref, valid_ref, pw_ref, pb_ref,
                       out_ref, *, v, kmax, lp, pack):
    tnt, cp = frame_ref.shape
    kv, tb = thi_ref.shape
    assert kv == kmax * v and tnt % pack == 0
    tq = tnt // pack

    # Window one-hot over kmax*v lanes: lane t*v+u of row (token, p) is 1 iff the
    # char at frame slot p+t equals u.  Sentinel -1 (PAD chars, Conv1d zero
    # padding, frame tail) matches nothing -> exactly-zero table rows, which gives
    # the reference PAD mask and padding=2 for free.  Slices/concat stay on 32-bit
    # data; the bf16 cast happens once on the final 2-D matmul operand.
    cf3 = frame_ref[...][:, :, None]                                   # [tnt, cp, 1] int32
    iota_v = jax.lax.broadcasted_iota(jnp.int32, (1, 1, v), 2)         # small, broadcast
    onehot = jnp.concatenate(
        [(cf3[:, t:t + lp, :] == iota_v).astype(jnp.float32) for t in range(kmax)],
        axis=-1)                                                       # [tnt, lp, kmax*v]
    oh2 = onehot.reshape(tnt * lp, kv).astype(jnp.bfloat16)            # 0/1 exact in bf16

    # Embedding lookup + PAD mask + all conv taps of all filters in ONE fused
    # contraction, run as two bf16 MXU matmuls (hi/lo table split keeps f32 accuracy).
    acc = jnp.dot(oh2, thi_ref[...], preferred_element_type=jnp.float32)
    acc = acc + jnp.dot(oh2, tlo_ref[...], preferred_element_type=jnp.float32)
    acc = jnp.maximum(acc + cbias_ref[...], 0.0)                       # bias + ReLU

    # Zero out conv positions that do not exist for a given filter size (post-ReLU
    # values are >= 0, so this never changes the max), then max-pool per token.
    # `pack` tokens are grouped per row so the final store is 128-lane dense.
    acc = acc.reshape(tq, pack * lp, tb) * valid_ref[...]
    pooled = jnp.concatenate(
        [jnp.max(acc[:, j * lp:(j + 1) * lp, :], axis=1) for j in range(pack)],
        axis=-1)                                                       # [tq, pack*tb]

    # Block-diagonal projection + bias -> packed [tq, pack*out_dim] output rows.
    out = jnp.dot(pooled, pw_ref[...], preferred_element_type=jnp.float32) + pb_ref[...]
    out_ref[...] = out.astype(out_ref.dtype)


def char_embedding_forward(characters, params, *, filter_sizes=(2, 3, 4, 5), pad=2,
                           tn_tile=None, vmem_limit_bytes=None):
    """Pallas forward of CharEmbedding. characters: [batch, tokens, chars] int."""
    B, T, C = characters.shape
    N = B * T
    emb = params["embedding"].astype(jnp.float32)
    V, _E = emb.shape
    conv_w = [w.astype(jnp.float32) for w in params["conv_w"]]
    conv_b = [b.astype(jnp.float32) for b in params["conv_b"]]
    F = conv_w[0].shape[-1]
    nF = len(filter_sizes)
    TB = nF * F
    Kmax, Kmin = max(filter_sizes), min(filter_sizes)
    LPp = _round_up(C + 2 * pad - Kmin + 1, 8)        # padded conv-output length
    CP = _round_up(LPp + Kmax - 1, 8)                 # char-frame length
    KV = Kmax * V

    if params.get("proj_w", None) is not None:
        proj_w = params["proj_w"].astype(jnp.float32)
        proj_b = params["proj_b"].reshape(-1).astype(jnp.float32)
    else:                                             # module configured without projection
        proj_w = jnp.eye(TB, dtype=jnp.float32)
        proj_b = jnp.zeros((TB,), jnp.float32)
    out_dim = proj_w.shape[-1]

    # Output packing: `pack` tokens per 128-lane output row when out_dim | 128
    # (lane-dense stores, no 4x zero-padded writeback); otherwise pad to 128*n.
    if out_dim % 128 == 0:
        pack, out_lanes = 1, out_dim
    elif 128 % out_dim == 0:
        pack, out_lanes = 128 // out_dim, 128
    else:
        pack, out_lanes = 1, _round_up(out_dim, 128)

    # Fused lookup table [KV, TB]: row t*V+v holds emb[v] @ conv_w[k][t] for every
    # filter whose kernel covers tap t (zeros otherwise).  hi/lo bf16 split.
    table = jnp.zeros((KV, TB), jnp.float32)
    for t in range(Kmax):
        for ki, k in enumerate(filter_sizes):
            if t < k:
                table = table.at[t * V:(t + 1) * V, ki * F:(ki + 1) * F].set(
                    emb @ conv_w[ki][t])
    t_hi = table.astype(jnp.bfloat16)
    t_lo = (table - t_hi.astype(jnp.float32)).astype(jnp.bfloat16)

    cbias = jnp.concatenate([b.reshape(-1) for b in conv_b]).reshape(1, TB)

    # Position-validity mask (position p valid for filter k iff p < C+2*pad-k+1),
    # tiled `pack` times for the grouped [tile//pack, pack*LPp, TB] layout.
    pos = jnp.arange(LPp, dtype=jnp.int32)[:, None]
    lim = jnp.concatenate(
        [jnp.full((F,), C + 2 * pad - k + 1, jnp.int32) for k in filter_sizes])
    valid = (pos < lim[None, :]).astype(jnp.float32)                   # [LPp, TB]
    valid_g = jnp.tile(valid, (pack, 1)).reshape(1, pack * LPp, TB)

    # Block-diagonal projection: token j of a packed row reads pooled lanes
    # [j*TB,(j+1)*TB) and writes output lanes [j*out_dim,(j+1)*out_dim).
    pw = jnp.zeros((pack * TB, out_lanes), jnp.float32)
    pb = jnp.zeros((1, out_lanes), jnp.float32)
    for j in range(pack):
        pw = pw.at[j * TB:(j + 1) * TB, j * out_dim:(j + 1) * out_dim].set(proj_w)
        pb = pb.at[0, j * out_dim:(j + 1) * out_dim].set(proj_b)

    # Char frame with sentinel -1 for PAD chars, conv zero padding and the tail.
    # NOTE: ids >= V also map to -1 (zero embedding row); nn.Embedding would error.
    ch = characters.reshape(N, C).astype(jnp.int32)
    ch = jnp.where((ch <= 0) | (ch >= V), -1, ch)

    if tn_tile is None or vmem_limit_bytes is None:
        d_tile, d_vmem = _device_defaults()
        tn_tile = d_tile if tn_tile is None else tn_tile
        vmem_limit_bytes = d_vmem if vmem_limit_bytes is None else vmem_limit_bytes

    # Tile batch*tokens; cap the tile at ~N/2 so the "parallel" grid has >= 2 steps
    # whenever possible (v7x megacore: both TensorCores get work).
    row_align = 8 * pack
    n_req = _round_up(max(N, 1), row_align)
    half = _round_up((max(N, 1) + 1) // 2, row_align)
    tile = _round_up(min(tn_tile, n_req, max(half, row_align)), row_align)
    n_pad = _round_up(max(N, 1), tile)

    frame = jnp.full((n_pad, CP), -1, jnp.int32)
    frame = frame.at[:N, pad:pad + C].set(ch)

    kernel = functools.partial(_char_embed_kernel, v=V, kmax=Kmax, lp=LPp, pack=pack)

    out = pl.pallas_call(
        kernel,
        out_shape=jax.ShapeDtypeStruct((n_pad // pack, out_lanes), jnp.float32),
        grid=(n_pad // tile,),
        in_specs=[
            pl.BlockSpec((tile, CP), lambda i: (i, 0)),                # char frame tile
            pl.BlockSpec((KV, TB), lambda i: (0, 0)),                  # fused table (hi)
            pl.BlockSpec((KV, TB), lambda i: (0, 0)),                  # fused table (lo)
            pl.BlockSpec((1, TB), lambda i: (0, 0)),                   # conv bias
            pl.BlockSpec((1, pack * LPp, TB), lambda i: (0, 0, 0)),    # validity mask
            pl.BlockSpec((pack * TB, out_lanes), lambda i: (0, 0)),    # block-diag proj W
            pl.BlockSpec((1, out_lanes), lambda i: (0, 0)),            # packed proj bias
        ],
        out_specs=pl.BlockSpec((tile // pack, out_lanes), lambda i: (i, 0)),
        compiler_params=pltpu.CompilerParams(
            dimension_semantics=("parallel",),
            vmem_limit_bytes=vmem_limit_bytes),
    )(frame, t_hi, t_lo, cbias, valid_g, pw, pb)

    out = out.reshape(n_pad, out_lanes // pack)        # free metadata reshape
    if out_lanes // pack != out_dim:
        out = out[:, :out_dim]
    return out[:N].reshape(B, T, out_dim)


def reference_forward(characters, params, *, filter_sizes=(2, 3, 4, 5), pad=2):
    """Pure-JAX reference mirroring the PyTorch forward."""
    B, T, C = characters.shape
    N = B * T
    chars = characters.reshape(N, C)
    x = params["embedding"][chars]                                    # [N, C, E]
    mask = (chars != 0).astype(jnp.float32)[:, :, None]
    x = x * mask
    x_pad = jnp.pad(x, ((0, 0), (pad, pad), (0, 0)))
    outs = []
    for k, w, b in zip(filter_sizes, params["conv_w"], params["conv_b"]):
        Lk = C + 2 * pad - k + 1
        acc = jnp.zeros((N, Lk, w.shape[-1]), jnp.float32)
        for t in range(k):
            acc = acc + jnp.einsum('nle,ef->nlf', x_pad[:, t:t + Lk, :], w[t])
        acc = jax.nn.relu(acc + b.reshape(1, 1, -1))
        outs.append(jnp.max(acc, axis=1))
    feat = jnp.concatenate(outs, axis=-1)
    out = feat @ params["proj_w"] + params["proj_b"]
    return out.reshape(B, T, -1)


if __name__ == "__main__":
    # Small synthetic config: num_embeddings=32, embedding_dim=16, num_filters=8,
    # filter_sizes=(2,3,4,5), output_dim=32; characters: [batch=2, tokens=4, chars=8].
    V, E, F = 32, 16, 8
    filter_sizes = (2, 3, 4, 5)
    out_dim = 32

    key = jax.random.PRNGKey(0)
    keys = jax.random.split(key, 12)
    params = {
        "embedding": jax.random.normal(keys[0], (V, E), jnp.float32) * 0.1,
        "conv_w": [jax.random.normal(keys[1 + i], (k, E, F), jnp.float32) * 0.1
                   for i, k in enumerate(filter_sizes)],
        "conv_b": [jax.random.normal(keys[5 + i], (1, F), jnp.float32) * 0.1
                   for i in range(len(filter_sizes))],
        "proj_w": jax.random.normal(keys[9], (F * len(filter_sizes), out_dim), jnp.float32) * 0.1,
        "proj_b": jax.random.normal(keys[10], (1, out_dim), jnp.float32) * 0.1,
    }

    characters = jax.random.randint(keys[11], (2, 4, 8), 0, V, dtype=jnp.int32)
    characters = characters.at[:, :, -2:].set(0)   # guarantee some PAD chars

    out = char_embedding_forward(characters, params, filter_sizes=filter_sizes)
    out = jax.block_until_ready(out)

    ref = reference_forward(characters, params, filter_sizes=filter_sizes)
    assert out.shape == (2, 4, out_dim), out.shape
    assert jnp.allclose(out, ref, atol=1e-4, rtol=1e-4), float(jnp.max(jnp.abs(out - ref)))
    print("KERNEL_OK")
</pallas_src>

<mosaic_0001>
module attributes {stable_mosaic.version = 11 : i64} {
  func.func @_char_embed_kernel(%arg0: i32, %arg1: memref<32x24xi32, #tpu.memory_space<vmem>>, %arg2: memref<160x32xbf16, #tpu.memory_space<vmem>>, %arg3: memref<160x32xbf16, #tpu.memory_space<vmem>>, %arg4: memref<1x32xf32, #tpu.memory_space<vmem>>, %arg5: memref<1x64x32xf32, #tpu.memory_space<vmem>>, %arg6: memref<128x128xf32, #tpu.memory_space<vmem>>, %arg7: memref<1x128xf32, #tpu.memory_space<vmem>>, %arg8: memref<8x128xf32, #tpu.memory_space<vmem>>) attributes {dimension_semantics = [#tpu.dimension_semantics<parallel>], iteration_bounds = array<i64: 1>, scalar_prefetch = 0 : i64, scratch_operands = 0 : i64, tpu.core_type = #tpu.core_type<tc>, window_params = [{transform_indices = @transform_0, window_bounds = array<i64: 32, 24>}, {pipeline_mode = #tpu.pipeline_mode<synchronous>, transform_indices = @transform_1, window_bounds = array<i64: 160, 32>}, {pipeline_mode = #tpu.pipeline_mode<synchronous>, transform_indices = @transform_2, window_bounds = array<i64: 160, 32>}, {pipeline_mode = #tpu.pipeline_mode<synchronous>, transform_indices = @transform_3, window_bounds = array<i64: 1, 32>}, {pipeline_mode = #tpu.pipeline_mode<synchronous>, transform_indices = @transform_4, window_bounds = array<i64: 1, 64, 32>}, {pipeline_mode = #tpu.pipeline_mode<synchronous>, transform_indices = @transform_5, window_bounds = array<i64: 128, 128>}, {pipeline_mode = #tpu.pipeline_mode<synchronous>, transform_indices = @transform_6, window_bounds = array<i64: 1, 128>}, {transform_indices = @transform_7, window_bounds = array<i64: 8, 128>}]} {
    %c0 = arith.constant 0 : index
    %c0_0 = arith.constant 0 : index
    %0 = vector.load %arg1[%c0, %c0_0] : memref<32x24xi32, #tpu.memory_space<vmem>>, vector<32x24xi32>
    %1 = vector.shape_cast %0 : vector<32x24xi32> to vector<32x24x1xi32>
    %2 = tpu.iota {dimensions = array<i32: 2>} : vector<1x1x32xi32>
    %3 = vector.extract_strided_slice %1 {offsets = [0, 0, 0], sizes = [32, 16, 1], strides = [1, 1, 1]} : vector<32x24x1xi32> to vector<32x16x1xi32>
    %4 = vector.broadcast %3 : vector<32x16x1xi32> to vector<32x16x32xi32>
    %5 = vector.broadcast %2 : vector<1x1x32xi32> to vector<32x16x32xi32>
    %6 = arith.cmpi eq, %4, %5 : vector<32x16x32xi32>
    %7 = arith.extui %6 : vector<32x16x32xi1> to vector<32x16x32xi32>
    %8 = arith.sitofp %7 : vector<32x16x32xi32> to vector<32x16x32xf32>
    %9 = vector.extract_strided_slice %1 {offsets = [0, 1, 0], sizes = [32, 16, 1], strides = [1, 1, 1]} : vector<32x24x1xi32> to vector<32x16x1xi32>
    %10 = vector.broadcast %9 : vector<32x16x1xi32> to vector<32x16x32xi32>
    %11 = vector.broadcast %2 : vector<1x1x32xi32> to vector<32x16x32xi32>
    %12 = arith.cmpi eq, %10, %11 : vector<32x16x32xi32>
    %13 = arith.extui %12 : vector<32x16x32xi1> to vector<32x16x32xi32>
    %14 = arith.sitofp %13 : vector<32x16x32xi32> to vector<32x16x32xf32>
    %15 = vector.extract_strided_slice %1 {offsets = [0, 2, 0], sizes = [32, 16, 1], strides = [1, 1, 1]} : vector<32x24x1xi32> to vector<32x16x1xi32>
    %16 = vector.broadcast %15 : vector<32x16x1xi32> to vector<32x16x32xi32>
    %17 = vector.broadcast %2 : vector<1x1x32xi32> to vector<32x16x32xi32>
    %18 = arith.cmpi eq, %16, %17 : vector<32x16x32xi32>
    %19 = arith.extui %18 : vector<32x16x32xi1> to vector<32x16x32xi32>
    %20 = arith.sitofp %19 : vector<32x16x32xi32> to vector<32x16x32xf32>
    %21 = vector.extract_strided_slice %1 {offsets = [0, 3, 0], sizes = [32, 16, 1], strides = [1, 1, 1]} : vector<32x24x1xi32> to vector<32x16x1xi32>
    %22 = vector.broadcast %21 : vector<32x16x1xi32> to vector<32x16x32xi32>
    %23 = vector.broadcast %2 : vector<1x1x32xi32> to vector<32x16x32xi32>
    %24 = arith.cmpi eq, %22, %23 : vector<32x16x32xi32>
    %25 = arith.extui %24 : vector<32x16x32xi1> to vector<32x16x32xi32>
    %26 = arith.sitofp %25 : vector<32x16x32xi32> to vector<32x16x32xf32>
    %27 = vector.extract_strided_slice %1 {offsets = [0, 4, 0], sizes = [32, 16, 1], strides = [1, 1, 1]} : vector<32x24x1xi32> to vector<32x16x1xi32>
    %28 = vector.broadcast %27 : vector<32x16x1xi32> to vector<32x16x32xi32>
    %29 = vector.broadcast %2 : vector<1x1x32xi32> to vector<32x16x32xi32>
    %30 = arith.cmpi eq, %28, %29 : vector<32x16x32xi32>
    %31 = arith.extui %30 : vector<32x16x32xi1> to vector<32x16x32xi32>
    %32 = arith.sitofp %31 : vector<32x16x32xi32> to vector<32x16x32xf32>
    %33 = tpu.concatenate %8, %14, %20, %26, %32 in 2 : vector<32x16x32xf32>, vector<32x16x32xf32>, vector<32x16x32xf32>, vector<32x16x32xf32>, vector<32x16x32xf32> -> vector<32x16x160xf32>
    %34 = vector.shape_cast %33 : vector<32x16x160xf32> to vector<512x160xf32>
    %35 = arith.truncf %34 : vector<512x160xf32> to vector<512x160xbf16>
    %c0_1 = arith.constant 0 : index
    %c0_2 = arith.constant 0 : index
    %36 = vector.load %arg2[%c0_1, %c0_2] : memref<160x32xbf16, #tpu.memory_space<vmem>>, vector<160x32xbf16>
    %cst = arith.constant dense<0.000000e+00> : vector<512x32xf32>
    %37 = tpu.matmul %35, %36, %cst {dimension_numbers = #tpu.dot_dimension_numbers<[1], [0], [0], [1], [0, 0, 1, 1], [], []>} : vector<512x160xbf16>, vector<160x32xbf16>, vector<512x32xf32> -> vector<512x32xf32>
    %c0_3 = arith.constant 0 : index
    %c0_4 = arith.constant 0 : index
    %38 = vector.load %arg3[%c0_3, %c0_4] : memref<160x32xbf16, #tpu.memory_space<vmem>>, vector<160x32xbf16>
    %cst_5 = arith.constant dense<0.000000e+00> : vector<512x32xf32>
    %39 = tpu.matmul %35, %38, %cst_5 {dimension_numbers = #tpu.dot_dimension_numbers<[1], [0], [0], [1], [0, 0, 1, 1], [], []>} : vector<512x160xbf16>, vector<160x32xbf16>, vector<512x32xf32> -> vector<512x32xf32>
    %40 = arith.addf %37, %39 : vector<512x32xf32>
    %c0_6 = arith.constant 0 : index
    %c0_7 = arith.constant 0 : index
    %41 = vector.load %arg4[%c0_6, %c0_7] : memref<1x32xf32, #tpu.memory_space<vmem>>, vector<1x32xf32>
    %42 = vector.broadcast %41 : vector<1x32xf32> to vector<512x32xf32>
    %43 = arith.addf %40, %42 : vector<512x32xf32>
    %cst_8 = arith.constant 0.000000e+00 : f32
    %44 = vector.broadcast %cst_8 : f32 to vector<512x32xf32>
    %45 = arith.maximumf %43, %44 : vector<512x32xf32>
    %46 = vector.shape_cast %45 : vector<512x32xf32> to vector<8x64x32xf32>
    %c0_9 = arith.constant 0 : index
    %c0_10 = arith.constant 0 : index
    %c0_11 = arith.constant 0 : index
    %47 = vector.load %arg5[%c0_9, %c0_10, %c0_11] : memref<1x64x32xf32, #tpu.memory_space<vmem>>, vector<1x64x32xf32>
    %48 = vector.broadcast %47 : vector<1x64x32xf32> to vector<8x64x32xf32>
    %49 = arith.mulf %46, %48 : vector<8x64x32xf32>
    %50 = vector.extract_strided_slice %49 {offsets = [0, 0, 0], sizes = [8, 16, 32], strides = [1, 1, 1]} : vector<8x64x32xf32> to vector<8x16x32xf32>
    %cst_12 = arith.constant dense<0xFF800000> : vector<8x32xf32>
    %51 = vector.multi_reduction <maximumf>, %50, %cst_12 [1] : vector<8x16x32xf32> to vector<8x32xf32>
    %52 = vector.extract_strided_slice %49 {offsets = [0, 16, 0], sizes = [8, 16, 32], strides = [1, 1, 1]} : vector<8x64x32xf32> to vector<8x16x32xf32>
    %cst_13 = arith.constant dense<0xFF800000> : vector<8x32xf32>
    %53 = vector.multi_reduction <maximumf>, %52, %cst_13 [1] : vector<8x16x32xf32> to vector<8x32xf32>
    %54 = vector.extract_strided_slice %49 {offsets = [0, 32, 0], sizes = [8, 16, 32], strides = [1, 1, 1]} : vector<8x64x32xf32> to vector<8x16x32xf32>
    %cst_14 = arith.constant dense<0xFF800000> : vector<8x32xf32>
    %55 = vector.multi_reduction <maximumf>, %54, %cst_14 [1] : vector<8x16x32xf32> to vector<8x32xf32>
    %56 = vector.extract_strided_slice %49 {offsets = [0, 48, 0], sizes = [8, 16, 32], strides = [1, 1, 1]} : vector<8x64x32xf32> to vector<8x16x32xf32>
    %cst_15 = arith.constant dense<0xFF800000> : vector<8x32xf32>
    %57 = vector.multi_reduction <maximumf>, %56, %cst_15 [1] : vector<8x16x32xf32> to vector<8x32xf32>
    %58 = tpu.concatenate %51, %53, %55, %57 in 1 : vector<8x32xf32>, vector<8x32xf32>, vector<8x32xf32>, vector<8x32xf32> -> vector<8x128xf32>
    %c0_16 = arith.constant 0 : index
    %c0_17 = arith.constant 0 : index
    %59 = vector.load %arg6[%c0_16, %c0_17] : memref<128x128xf32, #tpu.memory_space<vmem>>, vector<128x128xf32>
    %cst_18 = arith.constant dense<0.000000e+00> : vector<8x128xf32>
    %60 = tpu.matmul %58, %59, %cst_18 {dimension_numbers = #tpu.dot_dimension_numbers<[1], [0], [0], [1], [0, 0, 1, 1], [], []>} : vector<8x128xf32>, vector<128x128xf32>, vector<8x128xf32> -> vector<8x128xf32>
    %c0_19 = arith.constant 0 : index
    %c0_20 = arith.constant 0 : index
    %61 = vector.load %arg7[%c0_19, %c0_20] : memref<1x128xf32, #tpu.memory_space<vmem>>, vector<1x128xf32>
    %62 = vector.broadcast %61 : vector<1x128xf32> to vector<8x128xf32>
    %63 = arith.addf %60, %62 : vector<8x128xf32>
    %c0_21 = arith.constant 0 : index
    %c0_22 = arith.constant 0 : index
    %64 = vector.load %arg8[%c0_21, %c0_22] : memref<8x128xf32, #tpu.memory_space<vmem>>, vector<8x128xf32>
    tpu.vector_store %arg8[%c0_21, %c0_22], %63 {strides = array<i32>} : memref<8x128xf32, #tpu.memory_space<vmem>>, vector<8x128xf32>,
    return
  }
  func.func @transform_0(%arg0: i32) -> (i32, i32) {
    %c0_i32 = arith.constant 0 : i32
    %c0_i32_0 = arith.constant 0 : i32
    return %arg0, %c0_i32 : i32, i32
  }
  func.func @transform_1(%arg0: i32) -> (i32, i32) {
    %c0_i32 = arith.constant 0 : i32
    %c0_i32_0 = arith.constant 0 : i32
    %c0_i32_1 = arith.constant 0 : i32
    return %c0_i32, %c0_i32_0 : i32, i32
  }
  func.func @transform_2(%arg0: i32) -> (i32, i32) {
    %c0_i32 = arith.constant 0 : i32
    %c0_i32_0 = arith.constant 0 : i32
    %c0_i32_1 = arith.constant 0 : i32
    return %c0_i32, %c0_i32_0 : i32, i32
  }
  func.func @transform_3(%arg0: i32) -> (i32, i32) {
    %c0_i32 = arith.constant 0 : i32
    %c0_i32_0 = arith.constant 0 : i32
    %c0_i32_1 = arith.constant 0 : i32
    return %c0_i32, %c0_i32_0 : i32, i32
  }
  func.func @transform_4(%arg0: i32) -> (i32, i32, i32) {
    %c0_i32 = arith.constant 0 : i32
    %c0_i32_0 = arith.constant 0 : i32
    %c0_i32_1 = arith.constant 0 : i32
    %c0_i32_2 = arith.constant 0 : i32
    return %c0_i32, %c0_i32_0, %c0_i32_1 : i32, i32, i32
  }
  func.func @transform_5(%arg0: i32) -> (i32, i32) {
    %c0_i32 = arith.constant 0 : i32
    %c0_i32_0 = arith.constant 0 : i32
    %c0_i32_1 = arith.constant 0 : i32
    return %c0_i32, %c0_i32_0 : i32, i32
  }
  func.func @transform_6(%arg0: i32) -> (i32, i32) {
    %c0_i32 = arith.constant 0 : i32
    %c0_i32_0 = arith.constant 0 : i32
    %c0_i32_1 = arith.constant 0 : i32
    return %c0_i32, %c0_i32_0 : i32, i32
  }
  func.func @transform_7(%arg0: i32) -> (i32, i32) {
    %c0_i32 = arith.constant 0 : i32
    %c0_i32_0 = arith.constant 0 : i32
    return %arg0, %c0_i32 : i32, i32
  }
}

</mosaic_0001>

<bundles_post_ra>
// kernel: tpu_custom_call.1
= control target key start
LH: loop header
LB: loop body
LE: loop exit
PB: predicated region body
PF: predicated region fallthrough
CT: control target
= control target key end

     0   :  { %v33_v0 = vlaneseq  ;;  %s7599_s0 = inlined_call_operand.vmem [shape: s32[32,24], index: 0, kind: input, shape index: {}]   ;;  %s7600_s1 = inlined_call_operand.vmem [shape: bf16[160,32], index: 1, kind: input, shape index: {}]   ;;  %s7601_s2 = inlined_call_operand.vmem [shape: bf16[160,32], index: 2, kind: input, shape index: {}]   ;;  %s7602_s3 = inlined_call_operand.vmem [shape: f32[1,32], index: 3, kind: input, shape index: {}]   ;;  %s7603_s4 = inlined_call_operand.vmem [shape: f32[1,64,32], index: 4, kind: input, shape index: {}]   ;;  %s7604_s5 = inlined_call_operand.vmem [shape: f32[128,128], index: 5, kind: input, shape index: {}]   ;;  %s7605_s6 = inlined_call_operand.vmem [shape: f32[1,128], index: 6, kind: input, shape index: {}]   ;;  %s7606_s7 = inlined_call_operand.hbm [shape: f32[8,128], index: 7, kind: output, shape index: {}]  }
   0x1   :  { %12 = vsyncpa [#allocation3], 0  ;;  %v28_v3 = vld [vmem:[%s7599_s0] sm:$0xff]  ;;  %v5067_v9 = vld [vmem:[%s7599_s0 + $0x8] sm:$0xff]  ;;  %v7607_v35 = vmov 0.0   ;;  %vm2085_vm6 = vcmask 1043456  }
   0x2   :  { %v5046_v1 = vshrl.u32 %v33_v0, 7  ;;  %v51_v4 = vperm.slane %v28_v3, 1  ;;  %v32_v5 = vperm.slane %v28_v3, 0  ;;  %v70_v7 = vperm.slane %v28_v3, 2  ;;  %v4389_v20 = vld [vmem:[%s7601_s2 + $0x48] sm:$0xff]  ;;  %v4388_v23 = vld [vmem:[%s7601_s2 + $0x40] sm:$0xff] }
   0x3   :  { %v165_v8 = vperm.slane %v28_v3, 7  ;;  %v5071_v10 = vperm.slane %v5067_v9, 4  ;;  %v89_v11 = vperm.slane %v28_v3, 3  ;;  %v108_v12 = vperm.slane %v28_v3, 4  ;;  %v4379_v21 = vld [vmem:[%s7600_s1 + $0x48] sm:$0xff]  ;;  %2940 = vmatpush.bf16.msra.mxu1 %v4389_v20  ;;  %v4378_v24 = vld [vmem:[%s7600_s1 + $0x40] sm:$0xff] }
   0x4   :  { %4396 = vset.pattern.permute.xlu1 %v5046_v1  ;;  %4395 = vset.pattern.permute.xlu0 %v5046_v1  ;;  %v5051_v2 = vadd.s32 8, %v5046_v1  ;;  %v5058_v6 = vadd.s32 16, %v5046_v1  ;;  %v203_v13 = vperm.slane %v5067_v9, 1  ;;  %v127_v14 = vperm.slane %v28_v3, 5  ;;  %s5001_s13 = smov 32   ;;  %s5002_s14 = smov 64  }
   0x5   :  { %v5079_v15 = vperm.slane %v5067_v9, 6  ;;  %v146_v16 = vperm.slane %v28_v3, 6  ;;  %v184_v17 = vperm.slane %v5067_v9, 0  ;;  %v241_v19 = vperm.slane %v5067_v9, 3  ;;  %3338 = vmatpush.bf16.msra.mxu3 %v4379_v21  ;;  %s5003_s15 = smov 96   ;;  %s5004_s12 = smov [#allocation2]  }
   0x6   :  { %4399 = vset.pattern.permute.xlu2 %v5051_v2  ;;  %7619 = vst [vmem:[#allocation5_spill] sm:$0xff] %v5058_v6  ;;  %v222_v25 = vperm.slane %v5067_v9, 2  ;;  %v5113_v32 = vand.u32 127, %v33_v0  ;;  %vm1026_vm7 = vcmask 1046528   ;;  %vm2310_vm8 = vcmask 261120   ;;  %s4119_s16 = sshll.u32 %s5004_s12, 4  ;;  %s4120_s16 = int_to_ptr.vmem [resolvable:$true] %s4119_s16 }
   0x7   :  { %2941 = vmatpush.bf16.msra.mxu1 %v4388_v23 }
   0x9   :  { %3339 = vmatpush.bf16.msra.mxu3 %v4378_v24 }
   0xc   :  { %56 = vperm.xlu1 %4396, %v51_v4   ;;  %37 = vperm.xlu0 %4395, %v32_v5  }
   0xe   :  { %62 = vperm.xlu2 %4399, %v51_v4  }
  0x14   :  { %4397 = vset.pattern.permute.xlu1 %v5058_v6  ;;  %4402 = vset.pattern.permute.xlu0 %v5058_v6 }
  0x16   :  { %4400 = vset.pattern.permute.xlu2 %v5058_v6 }
  0x1c   :  { %49 = vperm.xlu1 %4397, %v32_v5   ;;  %87 = vperm.xlu0 %4402, %v70_v7  }
  0x1e   :  { %68 = vperm.xlu2 %4400, %v51_v4  }
  0x24   :  { %4398 = vset.pattern.permute.xlu1 %v5046_v1  ;;  %182 = vperm.xlu0 %4402, %v165_v8  }
  0x26   :  { %4401 = vset.pattern.permute.xlu2 %v5051_v2 }
  0x2c   :  { %75 = vperm.xlu1 %4398, %v70_v7   ;;  %277 = vperm.xlu0 %4402, %v5071_v10  }
  0x2e   :  { %81 = vperm.xlu2 %4401, %v70_v7  }
  0x34   :  { %94 = vperm.xlu1 %4398, %v89_v11   ;;  %4415 = vset.pattern.permute.xlu0 %v5051_v2 }
  0x36   :  { %100 = vperm.xlu2 %4401, %v89_v11  }
  0x3c   :  { %4403 = vset.pattern.permute.xlu1 %v5058_v6  ;;  %43 = vperm.xlu0 %4415, %v32_v5  }
  0x3e   :  { %4404 = vset.pattern.permute.xlu2 %v5046_v1 }
  0x44   :  { %106 = vperm.xlu1 %4403, %v89_v11   ;;  %119 = vperm.xlu0 %4415, %v108_v12  }
  0x46   :  { %113 = vperm.xlu2 %4404, %v108_v12  }
  0x4c   :  { %125 = vperm.xlu1 %4403, %v108_v12   ;;  %214 = vperm.xlu0 %4415, %v203_v13  }
  0x4e   :  { %132 = vperm.xlu2 %4404, %v127_v14  }
  0x54   :  { %4405 = vset.pattern.permute.xlu1 %v5051_v2  ;;  %309 = vperm.xlu0 %4415, %v5079_v15  }
  0x56   :  { %4406 = vset.pattern.permute.xlu2 %v5058_v6 }
  0x5c   :  { %138 = vperm.xlu1 %4405, %v127_v14   ;;  %4418 = vset.pattern.permute.xlu0 %v5046_v1 }
  0x5e   :  { %144 = vperm.xlu2 %4406, %v127_v14  }
  0x64   :  { %157 = vperm.xlu1 %4405, %v146_v16   ;;  %151 = vperm.xlu0 %4418, %v146_v16  }
  0x66   :  { %163 = vperm.xlu2 %4406, %v146_v16  }
  0x68   :  { %v63_v26 = vpop.permute.xlu2 %62 }
  0x69   :  { %vm645_vm2 = vcmp.eq.s32.totalorder %v63_v26, %v5113_v32 }
  0x6a   :  { %v5139_v47 = vsel %vm645_vm2, 1.0, %v7607_v35 }
  0x6b   :  { %v1033_v57 = vrot.slane %v5139_v47, 1  ;;  %v2092_v7 = vrot.slane %v5139_v47, 4 }
  0x6c   :  { %4407 = vset.pattern.permute.xlu1 %v5046_v1  ;;  %246 = vperm.xlu0 %4418, %v241_v19  }
  0x6e   :  { %4408 = vset.pattern.permute.xlu2 %v5051_v2 }
  0x74   :  { %170 = vperm.xlu1 %4407, %v165_v8  }
  0x76   :  { %176 = vperm.xlu2 %4408, %v165_v8  }
  0x78   :  { %v69_v29 = vpop.permute.xlu2 %68 }
  0x79   :  { %vm835_vm3 = vcmp.eq.s32.totalorder %v69_v29, %v5113_v32 }
  0x7a   :  { %v5144_v48 = vsel %vm835_vm3, 1.0, %v7607_v35 }
  0x7b   :  { %v1035_v58 = vrot.slane %v5144_v48, 1  ;;  %v2094_v8 = vrot.slane %v5144_v48, 4 }
  0x7c   :  { %189 = vperm.xlu1 %4407, %v184_v17  }
  0x7d   :  { %v1036_v63 = vsel %vm1026_vm7, %v1033_v57, %v1035_v58 }
  0x7e   :  { %195 = vperm.xlu2 %4408, %v184_v17   ;;  %v38_v18 = vpop.permute.xlu0 %37  ;;  %v57_v27 = vpop.permute.xlu1 %56 }
  0x7f   :  { %vm642_vm0 = vcmp.eq.s32.totalorder %v38_v18, %v5113_v32  ;;  %vm644_vm4 = vcmp.eq.s32.totalorder %v57_v27, %v5113_v32 }
  0x80   :  { %v5118_v36 = vsel %vm642_vm0, 1.0, %v7607_v35  ;;  %v5147_v49 = vsel %vm644_vm4, 1.0, %v7607_v35 }
  0x81   :  { %v1027_v39 = vrot.slane %v5118_v36, 1  ;;  %v2086_v40 = vrot.slane %v5118_v36, 4  ;;  %v1032_v59 = vrot.slane %v5147_v49, 1  ;;  %v2091_v11 = vrot.slane %v5147_v49, 4 }
  0x83   :  { %v1034_v62 = vsel %vm1026_vm7, %v1032_v59, %v1033_v57  ;;  %v2093_v18 = vsel %vm2085_vm6, %v2091_v11, %v2092_v7 }
  0x84   :  { %4409 = vset.pattern.permute.xlu1 %v5058_v6  ;;  %v4436_v12 = vpack.i.bf16 %v1036_v63, %v1034_v62 }
  0x86   :  { %4410 = vset.pattern.permute.xlu2 %v5046_v1 }
  0x88   :  { %v82_v33 = vpop.permute.xlu2 %81 }
  0x89   :  { %vm647_vm9 = vcmp.eq.s32.totalorder %v82_v33, %v5113_v32 }
  0x8a   :  { %v5168_v0 = vsel %vm647_vm9, 1.0, %v7607_v35 }
  0x8c   :  { %201 = vperm.xlu1 %4409, %v184_v17   ;;  %v279_v17 = vperm.slane %v5067_v9, 5 }
  0x8e   :  { %208 = vperm.xlu2 %4410, %v203_v13   ;;  %v5097_v22 = vpop.permute.xlu0 %87  ;;  %v50_v30 = vpop.permute.xlu1 %49 }
  0x8f   :  { %vm834_vm1 = vcmp.eq.s32.totalorder %v50_v30, %v5113_v32  ;;  %vm836_vm10 = vcmp.eq.s32.totalorder %v5097_v22, %v5113_v32 }
  0x90   :  { %v5123_v37 = vsel %vm834_vm1, 1.0, %v7607_v35  ;;  %v101_v44 = vpop.permute.xlu2 %100  ;;  %v5171_v3 = vsel %vm836_vm10, 1.0, %v7607_v35 }
  0x91   :  { %v1030_v42 = vrot.slane %v5123_v37, 1  ;;  %v2089_v43 = vrot.slane %v5123_v37, 4  ;;  %v1040_v14 = vrot.slane %v5171_v3, 1  ;;  %vm649_vm13 = vcmp.eq.s32.totalorder %v101_v44, %v5113_v32 }
  0x94   :  { %220 = vperm.xlu1 %4409, %v203_v13   ;;  %v1038_v13 = vrot.slane %v5168_v0, 1 }
  0x96   :  { %227 = vperm.xlu2 %4410, %v222_v25   ;;  %v5106_v28 = vpop.permute.xlu0 %182  ;;  %v1041_v21 = vsel %vm1026_vm7, %v1038_v13, %v1040_v14 }
  0x9c   :  { %4411 = vset.pattern.permute.xlu1 %v5051_v2 }
  0x9e   :  { %4412 = vset.pattern.permute.xlu2 %v5058_v6  ;;  %v5110_v31 = vpop.permute.xlu0 %277  ;;  %v76_v34 = vpop.permute.xlu1 %75 }
  0x9f   :  { %vm646_vm11 = vcmp.eq.s32.totalorder %v76_v34, %v5113_v32 }
  0xa0   :  { %v114_v60 = vpop.permute.xlu2 %113  ;;  %v5174_v4 = vsel %vm646_vm11, 1.0, %v7607_v35 }
  0xa1   :  { %v1037_v16 = vrot.slane %v5174_v4, 1  ;;  %vm650_vm0 = vcmp.eq.s32.totalorder %v114_v60, %v5113_v32 }
  0xa3   :  { %v1039_v20 = vsel %vm1026_vm7, %v1037_v16, %v1038_v13 }
  0xa4   :  { %233 = vperm.xlu1 %4411, %v222_v25   ;;  %v4451_v29 = vpack.i.bf16 %v1041_v21, %v1039_v20 }
  0xa6   :  { %239 = vperm.xlu2 %4412, %v222_v25   ;;  %v95_v50 = vpop.permute.xlu1 %94  ;;  %v5199_v25 = vsel %vm649_vm13, 1.0, %v7607_v35 }
  0xa7   :  { %vm648_vm14 = vcmp.eq.s32.totalorder %v95_v50, %v5113_v32  ;;  %v1043_v33 = vrot.slane %v5199_v25, 1  ;;  %v5225_v50 = vsel %vm650_vm0, 1.0, %v7607_v35 }
  0xa8   :  { %v5202_v26 = vsel %vm648_vm14, 1.0, %v7607_v35  ;;  %vm1379_vm14 = vcmask 1045504  }
  0xa9   :  { %v1042_v34 = vrot.slane %v5202_v26, 1 }
  0xab   :  { %v1044_v44 = vsel %vm1026_vm7, %v1042_v34, %v1043_v33 }
  0xac   :  { %252 = vperm.xlu1 %4411, %v241_v19  }
  0xae   :  { %258 = vperm.xlu2 %4412, %v241_v19   ;;  %v44_v38 = vpop.permute.xlu0 %43  ;;  %v2095_v19 = vsel %vm2085_vm6, %v2092_v7, %v2094_v8 }
  0xaf   :  { %vm643_vm5 = vcmp.eq.s32.totalorder %v44_v38, %v5113_v32  ;;  %v2508_v24 = vpack.c.bf16 %v2095_v19, %v2093_v18 }
  0xb0   :  { %v5130_v41 = vsel %vm643_vm5, 1.0, %v7607_v35 }
  0xb1   :  { %v1028_v45 = vrot.slane %v5130_v41, 1  ;;  %v2087_v46 = vrot.slane %v5130_v41, 4 }
  0xb3   :  { %v2088_v51 = vsel %vm2085_vm6, %v2086_v40, %v2087_v46  ;;  %v2090_v52 = vsel %vm2085_vm6, %v2087_v46, %v2089_v43  ;;  %v1029_v53 = vsel %vm1026_vm7, %v1027_v39, %v1028_v45  ;;  %v1031_v54 = vsel %vm1026_vm7, %v1028_v45, %v1030_v42 }
  0xb4   :  { %4413 = vset.pattern.permute.xlu1 %v5046_v1  ;;  %v2506_v55 = vpack.c.bf16 %v2090_v52, %v2088_v51  ;;  %v4421_v56 = vpack.i.bf16 %v1031_v54, %v1029_v53  ;;  %v2097_v42 = vrot.slane %v5168_v0, 4  ;;  %v2099_v43 = vrot.slane %v5171_v3, 4 }
  0xb5   :  { %v2096_v46 = vrot.slane %v5174_v4, 4 }
  0xb6   :  { %4414 = vset.pattern.permute.xlu2 %v5051_v2  ;;  %4266 = vmatmul.msk.bf16.vlgmr.msra.gmra.mxu1 %vm2310_vm8, %v2506_v55  ;;  %v120_v61 = vpop.permute.xlu0 %119  ;;  %v107_v5 = vpop.permute.xlu1 %106  ;;  %v2100_v58 = vsel %vm2085_vm6, %v2097_v42, %v2099_v43 }
  0xb7   :  { %4338 = vmatmul.msk.bf16.vlgmr.msra.gmra.mxu3 %vm2310_vm8, %v2506_v55  ;;  %4422 = vrot.lane.b32.xlu0 %v4421_v56, %s5001_s13  ;;  %vm837_vm12 = vcmp.eq.s32.totalorder %v107_v5, %v5113_v32  ;;  %vm651_vm1 = vcmp.eq.s32.totalorder %v120_v61, %v5113_v32  ;;  %v1047_v55 = vrot.slane %v5225_v50, 1  ;;  %v2098_v57 = vsel %vm2085_vm6, %v2096_v46, %v2097_v42 }
  0xb8   :  { %v5196_v23 = vsel %vm837_vm12, 1.0, %v7607_v35  ;;  %v5228_v51 = vsel %vm651_vm1, 1.0, %v7607_v35  ;;  %v2510_v62 = vpack.c.bf16 %v2100_v58, %v2098_v57  ;;  %vm841_vm12 = vcmp.eq.s32.totalorder %v5106_v28, %v5113_v32 }
  0xb9   :  { %v1045_v30 = vrot.slane %v5196_v23, 1  ;;  %v1048_v56 = vrot.slane %v5228_v51, 1  ;;  %v1380_v58 = vrot.slane %v5118_v36, 2 }
  0xbb   :  { %v1046_v38 = vsel %vm1026_vm7, %v1043_v33, %v1045_v30  ;;  %v1049_v63 = vsel %vm1026_vm7, %v1047_v55, %v1048_v56  ;;  %v2102_v30 = vrot.slane %v5199_v25, 4  ;;  %v2101_v33 = vrot.slane %v5202_v26, 4 }
  0xbc   :  { %265 = vperm.xlu1 %4413, %v5071_v10   ;;  %v4466_v52 = vpack.i.bf16 %v1046_v38, %v1044_v44 }
  0xbd   :  { %v2103_v43 = vsel %vm2085_vm6, %v2101_v33, %v2102_v30  ;;  %v1385_v33 = vrot.slane %v5147_v49, 2 }
  0xbe   :  { %271 = vperm.xlu2 %4414, %v5071_v10   ;;  %v5193_v22 = vpop.permute.xlu0 %214  ;;  %v133_v10 = vpop.permute.xlu2 %132 }
  0xbf   :  { %4437 = vrot.lane.b32.xlu0 %v4436_v12, %s5001_s13  ;;  %v126_v27 = vpop.permute.xlu1 %125  ;;  %vm652_vm4 = vcmp.eq.s32.totalorder %v133_v10, %v5113_v32  ;;  %v2104_v10 = vrot.slane %v5196_v23, 4 }
  0xc0   :  { %vm838_vm15 = vcmp.eq.s32.totalorder %v126_v27, %v5113_v32  ;;  %v5249_v5 = vsel %vm652_vm4, 1.0, %v7607_v35 }
  0xc1   :  { %v5215_v39 = vsel %vm838_vm15, 1.0, %v7607_v35  ;;  %v1052_v16 = vrot.slane %v5249_v5, 1  ;;  %v2105_v38 = vsel %vm2085_vm6, %v2102_v30, %v2104_v10  ;;  %vm1732_vm15 = vcmask 1044480  }
  0xc2   :  { %v1050_v53 = vrot.slane %v5215_v39, 1  ;;  %v2512_v44 = vpack.c.bf16 %v2105_v38, %v2103_v43  ;;  %v1388_v30 = vrot.slane %v5144_v48, 2  ;;  %v1741_v43 = vrot.slane %v5144_v48, 3 }
  0xc4   :  { %284 = vperm.xlu1 %4413, %v279_v17   ;;  %v1051_v59 = vsel %vm1026_vm7, %v1048_v56, %v1050_v53 }
  0xc5   :  { %v4481_v8 = vpack.i.bf16 %v1051_v59, %v1049_v63  ;;  %v1381_v59 = vrot.slane %v5130_v41, 2  ;;  %v1733_v63 = vrot.slane %v5118_v36, 3 }
  0xc6   :  { %290 = vperm.xlu2 %4414, %v279_v17   ;;  %4267 = vmatmul.msk.bf16.gmra.mxu1 %vm2310_vm8, %v2508_v24  ;;  %v145_v40 = vpop.permute.xlu2 %144  ;;  %v5221_v45 = vpop.permute.xlu0 %309 }
  0xc7   :  { %4339 = vmatmul.msk.bf16.gmra.mxu3 %vm2310_vm8, %v2508_v24  ;;  %4452 = vrot.lane.b32.xlu0 %v4451_v29, %s5001_s13  ;;  %vm839_vm2 = vcmp.eq.s32.totalorder %v145_v40, %v5113_v32 }
  0xc8   :  { %v5242_v60 = vsel %vm839_vm2, 1.0, %v7607_v35 }
  0xc9   :  { %v1055_v11 = vrot.slane %v5242_v60, 1 }
  0xcc   :  { %4416 = vset.pattern.permute.xlu1 %v5058_v6 }
  0xce   :  { %4417 = vset.pattern.permute.xlu2 %v5046_v1  ;;  %v139_v54 = vpop.permute.xlu1 %138  ;;  %v164_v7 = vpop.permute.xlu2 %163 }
  0xcf   :  { %4467 = vrot.lane.b32.xlu0 %v4466_v52, %s5001_s13  ;;  %vm653_vm3 = vcmp.eq.s32.totalorder %v139_v54, %v5113_v32  ;;  %vm840_vm10 = vcmp.eq.s32.totalorder %v164_v7, %v5113_v32  ;;  %v5295_v54 = vsel %vm841_vm12, 1.0, %v7607_v35 }
  0xd0   :  { %v5245_v61 = vsel %vm653_vm3, 1.0, %v7607_v35  ;;  %v5273_v24 = vsel %vm840_vm10, 1.0, %v7607_v35  ;;  %v1065_v57 = vrot.slane %v5295_v54, 1  ;;  %vm661_vm3 = vcmp.eq.s32.totalorder %v5193_v22, %v5113_v32 }
  0xd1   :  { %v1053_v12 = vrot.slane %v5245_v61, 1 }
  0xd3   :  { %v1054_v18 = vsel %vm1026_vm7, %v1052_v16, %v1053_v12  ;;  %v1056_v19 = vsel %vm1026_vm7, %v1053_v12, %v1055_v11  ;;  %v1734_v11 = vrot.slane %v5130_v41, 3  ;;  %v2109_v12 = vrot.slane %v5215_v39, 4 }
  0xd4   :  { %296 = vperm.xlu1 %4416, %v279_v17   ;;  %v317_v17 = vperm.slane %v5067_v9, 7  ;;  %v4496_v27 = vpack.i.bf16 %v1056_v19, %v1054_v18  ;;  %v2106_v16 = vrot.slane %v5225_v50, 4  ;;  %v2107_v18 = vrot.slane %v5228_v51, 4 }
  0xd5   :  { %v1382_v19 = vsel %vm1379_vm14, %v1380_v58, %v1381_v59  ;;  %v1393_v58 = vrot.slane %v5171_v3, 2 }
  0xd6   :  { %303 = vperm.xlu2 %4417, %v5079_v15   ;;  %v158_v13 = vpop.permute.xlu1 %157  ;;  %4268 = vmatmul.msk.bf16.gmra.mxu1 %vm2310_vm8, %v2510_v62  ;;  %v152_v14 = vpop.permute.xlu0 %151 }
  0xd7   :  { %4340 = vmatmul.msk.bf16.gmra.mxu3 %vm2310_vm8, %v2510_v62  ;;  %4482 = vrot.lane.b32.xlu0 %v4481_v8, %s5001_s13  ;;  %vm655_vm5 = vcmp.eq.s32.totalorder %v158_v13, %v5113_v32  ;;  %vm654_vm9 = vcmp.eq.s32.totalorder %v152_v14, %v5113_v32  ;;  %v177_v34 = vpop.permute.xlu2 %176  ;;  %v1383_v8 = vrot.slane %v5123_v37, 2  ;;  %v1736_v14 = vrot.slane %v5123_v37, 3 }
  0xd8   :  { %v5265_v20 = vsel %vm655_vm5, 1.0, %v7607_v35  ;;  %v5268_v21 = vsel %vm654_vm9, 1.0, %v7607_v35  ;;  %vm657_vm11 = vcmp.eq.s32.totalorder %v177_v34, %v5113_v32  ;;  %v2108_v34 = vsel %vm2085_vm6, %v2106_v16, %v2107_v18 }
  0xd9   :  { %7620 = vst [vmem:[#allocation6_spill] sm:$0xff] %v5265_v20  ;;  %v1058_v9 = vrot.slane %v5265_v20, 1  ;;  %v1057_v29 = vrot.slane %v5268_v21, 1  ;;  %v5290_v46 = vsel %vm657_vm11, 1.0, %v7607_v35  ;;  %v1384_v10 = vsel %vm1379_vm14, %v1381_v59, %v1383_v8 }
  0xda   :  { %7621 = vst [vmem:[#allocation7_spill] sm:$0xff] %v5268_v21  ;;  %v1063_v28 = vrot.slane %v5290_v46, 1  ;;  %v4426_v37 = vpack.i.bf16 %v1384_v10, %v1382_v19  ;;  %v1743_v8 = vrot.slane %v5174_v4, 3  ;;  %v2111_v16 = vrot.slane %v5249_v5, 4 }
  0xdb   :  { %v1059_v40 = vsel %vm1026_vm7, %v1057_v29, %v1058_v9  ;;  %7622 = vst [vmem:[#allocation8_spill] sm:$0xff] %v5290_v46  ;;  %v2110_v29 = vsel %vm2085_vm6, %v2107_v18, %v2109_v12 }
  0xdc   :  { %315 = vperm.xlu1 %4416, %v5079_v15   ;;  %v1060_v15 = vrot.slane %v5273_v24, 1  ;;  %v1066_v7 = vsel %vm1026_vm7, %v1063_v28, %v1065_v57  ;;  %v1391_v57 = vrot.slane %v5168_v0, 2 }
  0xde   :  { %322 = vperm.xlu2 %4417, %v317_v17   ;;  %v1061_v42 = vsel %vm1026_vm7, %v1058_v9, %v1060_v15  ;;  %v1737_v9 = vsel %vm1732_vm15, %v1734_v11, %v1736_v14  ;;  %v2114_v14 = vrot.slane %v5242_v60, 4  ;;  %v1394_v10 = vsel %vm1379_vm14, %v1391_v57, %v1393_v58 }
  0xdf   :  { %4497 = vrot.lane.b32.xlu0 %v4496_v27, %s5001_s13  ;;  %v4511_v52 = vpack.i.bf16 %v1061_v42, %v1059_v40  ;;  %v1735_v27 = vsel %vm1732_vm15, %v1733_v63, %v1734_v11  ;;  %v196_v15 = vpop.permute.xlu2 %195  ;;  %v2514_v40 = vpack.c.bf16 %v2110_v29, %v2108_v34  ;;  %v1739_v42 = vrot.slane %v5139_v47, 3 }
  0xe0   :  { %v4431_v38 = vpack.i.bf16 %v1737_v9, %v1735_v27  ;;  %v1746_v63 = vrot.slane %v5171_v3, 3  ;;  %vm659_vm1 = vcmp.eq.s32.totalorder %v196_v15, %v5113_v32  ;;  %v2112_v11 = vrot.slane %v5245_v61, 4 }
  0xe1   :  { %v1742_v48 = vsel %vm1732_vm15, %v1739_v42, %v1741_v43  ;;  %v5354_v3 = vsel %vm659_vm1, 1.0, %v7607_v35  ;;  %v1749_v58 = vrot.slane %v5199_v25, 3 }
  0xe2   :  { %v2115_v15 = vsel %vm2085_vm6, %v2112_v11, %v2114_v14 }
  0xe4   :  { %4419 = vset.pattern.permute.xlu1 %v5051_v2 }
  0xe6   :  { %4420 = vset.pattern.permute.xlu2 %v5058_v6  ;;  %v171_v53 = vpop.permute.xlu1 %170  ;;  %4269 = vmatmul.msk.bf16.gmra.mxu1 %vm2310_vm8, %v2512_v44 }
  0xe7   :  { %vm656_vm13 = vcmp.eq.s32.totalorder %v171_v53, %v5113_v32  ;;  %4341 = vmatmul.msk.bf16.gmra.mxu3 %vm2310_vm8, %v2512_v44  ;;  %4512 = vrot.lane.b32.xlu0 %v4511_v52, %s5001_s13  ;;  %v1738_v44 = vrot.slane %v5147_v49, 3 }
  0xe8   :  { %v5302_v55 = vsel %vm656_vm13, 1.0, %v7607_v35  ;;  %v209_v18 = vpop.permute.xlu2 %208 }
  0xe9   :  { %7623 = vst [vmem:[#allocation9_spill] sm:$0xff] %v5302_v55  ;;  %v1062_v56 = vrot.slane %v5302_v55, 1  ;;  %vm660_vm4 = vcmp.eq.s32.totalorder %v209_v18, %v5113_v32 }
  0xeb   :  { %v1064_v62 = vsel %vm1026_vm7, %v1062_v56, %v1063_v28  ;;  %v1740_v56 = vsel %vm1732_vm15, %v1738_v44, %v1739_v42  ;;  %v5377_v44 = vsel %vm661_vm3, 1.0, %v7607_v35 }
  0xec   :  { %328 = vperm.xlu1 %4419, %v317_v17   ;;  %v4526_v13 = vpack.i.bf16 %v1066_v7, %v1064_v62  ;;  %v1744_v62 = vrot.slane %v5168_v0, 3  ;;  %v1390_v7 = vrot.slane %v5174_v4, 2 }
  0xee   :  { %334 = vperm.xlu2 %4420, %v317_v17   ;;  %v1386_v17 = vrot.slane %v5139_v47, 2  ;;  %v190_v52 = vpop.permute.xlu1 %189  ;;  %v1392_v9 = vsel %vm1379_vm14, %v1390_v7, %v1391_v57  ;;  %v1747_v29 = vsel %vm1732_vm15, %v1744_v62, %v1746_v63  ;;  %v1751_v57 = vrot.slane %v5196_v23, 3 }
  0xef   :  { %4527 = vrot.lane.b32.xlu0 %v4526_v13, %s5001_s13  ;;  %vm658_vm0 = vcmp.eq.s32.totalorder %v190_v52, %v5113_v32  ;;  %v4446_v13 = vpack.i.bf16 %v1742_v48, %v1740_v56  ;;  %v5380_v52 = vsel %vm660_vm4, 1.0, %v7607_v35  ;;  %v1396_v56 = vrot.slane %v5199_v25, 2 }
  0xf0   :  { %v1387_v53 = vsel %vm1379_vm14, %v1385_v33, %v1386_v17  ;;  %v1389_v28 = vsel %vm1379_vm14, %v1386_v17, %v1388_v30  ;;  %v5348_v12 = vsel %vm658_vm0, 1.0, %v7607_v35  ;;  %v1745_v17 = vsel %vm1732_vm15, %v1743_v8, %v1744_v62  ;;  %v228_v8 = vpop.permute.xlu2 %227 }
  0xf1   :  { %v4441_v59 = vpack.i.bf16 %v1389_v28, %v1387_v53  ;;  %v1067_v27 = vrot.slane %v5348_v12, 1  ;;  %v2113_v30 = vsel %vm2085_vm6, %v2111_v16, %v2112_v11  ;;  %v1068_v33 = vrot.slane %v5354_v3, 1 }
  0xf2   :  { %v4461_v42 = vpack.i.bf16 %v1747_v29, %v1745_v17  ;;  %v2516_v53 = vpack.c.bf16 %v2115_v15, %v2113_v30  ;;  %v1395_v48 = vrot.slane %v5202_v26, 2  ;;  %v1073_v63 = vrot.slane %v5377_v44, 1 }
  0xf3   :  { %v1069_v22 = vsel %vm1026_vm7, %v1067_v27, %v1068_v33  ;;  %v1072_v7 = vrot.slane %v5380_v52, 1  ;;  %v1752_v16 = vsel %vm1732_vm15, %v1749_v58, %v1751_v57  ;;  %v1400_v29 = vrot.slane %v5225_v50, 2 }
  0xf4   :  { %4427 = vrot.lane.b32.xlu1 %v4426_v37, %s5002_s14  ;;  %v1397_v14 = vsel %vm1379_vm14, %v1395_v48, %v1396_v56  ;;  %v1401_v17 = vrot.slane %v5228_v51, 2  ;;  %v2117_v15 = vrot.slane %v5265_v20, 4  ;;  %vm662_vm10 = vcmp.eq.s32.totalorder %v228_v8, %v5113_v32 }
  0xf5   :  { %v1074_v27 = vsel %vm1026_vm7, %v1072_v7, %v1073_v63 }
  0xf6   :  { %4432 = vrot.lane.b32.xlu2 %v4431_v38, %s5003_s15  ;;  %4270 = vmatmul.msk.bf16.gmra.mxu1 %vm2310_vm8, %v2514_v40  ;;  %v4456_v38 = vpack.i.bf16 %v1394_v10, %v1392_v9 }
  0xf7   :  { %4342 = vmatmul.msk.bf16.gmra.mxu3 %vm2310_vm8, %v2514_v40  ;;  %v1398_v40 = vrot.slane %v5196_v23, 2 }
  0xf9   :  { %v1399_v23 = vsel %vm1379_vm14, %v1396_v56, %v1398_v40  ;;  %v1753_v40 = vrot.slane %v5225_v50, 3 }
  0xfa   :  { %v4471_v18 = vpack.i.bf16 %v1399_v23, %v1397_v14  ;;  %v1761_v14 = vrot.slane %v5242_v60, 3 }
  0xfc   :  { %4442 = vrot.lane.b32.xlu1 %v4441_v59, %s5002_s14  ;;  %v1748_v59 = vrot.slane %v5202_v26, 3 }
  0xfe   :  { %v202_v19 = vpop.permute.xlu1 %201  ;;  %4447 = vrot.lane.b32.xlu2 %v4446_v13, %s5003_s15  ;;  %v1750_v10 = vsel %vm1732_vm15, %v1748_v59, %v1749_v58  ;;  %v1408_v58 = vrot.slane %v5242_v60, 2  ;;  %v1406_v59 = vrot.slane %v5245_v61, 2 }
  0xff   :  { %vm842_vm2 = vcmp.eq.s32.totalorder %v202_v19, %v5113_v32  ;;  %v1403_v19 = vrot.slane %v5215_v39, 2  ;;  %v4476_v30 = vpack.i.bf16 %v1752_v16, %v1750_v10  ;;  %v1759_v16 = vrot.slane %v5245_v61, 3 }
 0x100   :  { %v5365_v37 = vsel %vm842_vm2, 1.0, %v7607_v35  ;;  %vm846_vm2 = vcmp.eq.s32.totalorder %v5110_v31, %v5113_v32  ;;  %v4387_v31 = vld [vmem:[%s7601_s2 + $0x38] sm:$0xff] }
 0x101   :  { %v1070_v34 = vrot.slane %v5365_v37, 1  ;;  %2765 = vmatpush.bf16.msra.mxu0 %v4387_v31 }
 0x103   :  { %v1071_v43 = vsel %vm1026_vm7, %v1068_v33, %v1070_v34  ;;  %v1756_v34 = vrot.slane %v5215_v39, 3 }
 0x104   :  { %4457 = vrot.lane.b32.xlu1 %v4456_v38, %s5002_s14  ;;  %v4541_v28 = vpack.i.bf16 %v1071_v43, %v1069_v22  ;;  %v2116_v38 = vrot.slane %v5268_v21, 4  ;;  %v2119_v22 = vrot.slane %v5273_v24, 4  ;;  %v1404_v43 = vsel %vm1379_vm14, %v1401_v17, %v1403_v19 }
 0x105   :  { %v5436_v19 = vsel %vm662_vm10, 1.0, %v7607_v35  ;;  %vm671_vm10 = vcmp.eq.s32.totalorder %v5221_v45, %v5113_v32 }
 0x106   :  { %v221_v62 = vpop.permute.xlu1 %220  ;;  %4462 = vrot.lane.b32.xlu2 %v4461_v42, %s5003_s15  ;;  %4271 = vmatmul.msk.bf16.gmra.mxu1 %vm2310_vm8, %v2516_v53  ;;  %v1754_v42 = vrot.slane %v5228_v51, 3  ;;  %v2118_v56 = vsel %vm2085_vm6, %v2116_v38, %v2117_v15  ;;  %v2120_v48 = vsel %vm2085_vm6, %v2117_v15, %v2119_v22  ;;  %v1411_v15 = vrot.slane %v5265_v20, 2 }
 0x107   :  { %vm843_vm5 = vcmp.eq.s32.totalorder %v221_v62, %v5113_v32  ;;  %4343 = vmatmul.msk.bf16.gmra.mxu3 %vm2310_vm8, %v2516_v53  ;;  %4542 = vrot.lane.b32.xlu0 %v4541_v28, %s5001_s13  ;;  %v240_v53 = vpop.permute.xlu2 %239  ;;  %v1402_v28 = vsel %vm1379_vm14, %v1400_v29, %v1401_v17  ;;  %v2518_v23 = vpack.c.bf16 %v2120_v48, %v2118_v56  ;;  %v247_v29 = vpop.permute.xlu0 %246  ;;  %v1077_v17 = vrot.slane %v5436_v19, 1 }
 0x108   :  { %v5397_v11 = vsel %vm843_vm5, 1.0, %v7607_v35  ;;  %vm844_vm9 = vcmp.eq.s32.totalorder %v240_v53, %v5113_v32  ;;  %v1757_v39 = vsel %vm1732_vm15, %v1754_v42, %v1756_v34  ;;  %v4486_v57 = vpack.i.bf16 %v1404_v43, %v1402_v28 }
 0x109   :  { %v1075_v13 = vrot.slane %v5397_v11, 1  ;;  %v1755_v62 = vsel %vm1732_vm15, %v1753_v40, %v1754_v42  ;;  %v1762_v34 = vsel %vm1732_vm15, %v1759_v16, %v1761_v14  ;;  %v1410_v38 = vrot.slane %v5268_v21, 2 }
 0x10a   :  { %v4491_v7 = vpack.i.bf16 %v1757_v39, %v1755_v62  ;;  %vm664_vm13 = vcmp.eq.s32.totalorder %v247_v29, %v5113_v32  ;;  %v1764_v53 = vrot.slane %v5265_v20, 3  ;;  %v1763_v28 = vrot.slane %v5268_v21, 3 }
 0x10b   :  { %v1076_v9 = vsel %vm1026_vm7, %v1073_v63, %v1075_v13  ;;  %v5428_v63 = vsel %vm844_vm9, 1.0, %v7607_v35  ;;  %v1405_v13 = vrot.slane %v5249_v5, 2  ;;  %v1413_v56 = vrot.slane %v5273_v24, 2 }
 0x10c   :  { %4472 = vrot.lane.b32.xlu1 %v4471_v18, %s5002_s14  ;;  %v4556_v33 = vpack.i.bf16 %v1076_v9, %v1074_v27  ;;  %v1758_v18 = vrot.slane %v5249_v5, 3  ;;  %v1080_v10 = vrot.slane %v5428_v63, 1  ;;  %v1409_v27 = vsel %vm1379_vm14, %v1406_v59, %v1408_v58 }
 0x10d   :  { %v1407_v60 = vsel %vm1379_vm14, %v1405_v13, %v1406_v59  ;;  %v2121_v48 = vrot.slane %v5302_v55, 4  ;;  %v1766_v58 = vrot.slane %v5273_v24, 3  ;;  %v5468_v62 = vsel %vm664_vm13, 1.0, %v7607_v35 }
 0x10e   :  { %4477 = vrot.lane.b32.xlu2 %v4476_v30, %s5003_s15  ;;  %v4501_v42 = vpack.i.bf16 %v1409_v27, %v1407_v60  ;;  %7624 = vst [vmem:[#allocation10_spill] sm:$0xff] %v5468_v62  ;;  %v1412_v13 = vsel %vm1379_vm14, %v1410_v38, %v1411_v15  ;;  %v1414_v14 = vsel %vm1379_vm14, %v1411_v15, %v1413_v56  ;;  %v2124_v24 = vrot.slane %v5295_v54, 4 }
 0x10f   :  { %4557 = vrot.lane.b32.xlu0 %v4556_v33, %s5001_s13  ;;  %v1760_v33 = vsel %vm1732_vm15, %v1758_v18, %v1759_v16  ;;  %v259_v40 = vpop.permute.xlu2 %258  ;;  %v1765_v18 = vsel %vm1732_vm15, %v1763_v28, %v1764_v53  ;;  %v1082_v60 = vrot.slane %v5468_v62, 1  ;;  %v1418_v28 = vrot.slane %v5295_v54, 2 }
 0x110   :  { %vm845_vm12 = vcmp.eq.s32.totalorder %v259_v40, %v5113_v32  ;;  %v4506_v39 = vpack.i.bf16 %v1762_v34, %v1760_v33  ;;  %vm2375_vm13 = vcmask 523264  }
 0x111   :  { %v5465_v59 = vsel %vm845_vm12, 1.0, %v7607_v35 }
 0x114   :  { %4487 = vrot.lane.b32.xlu1 %v4486_v57, %s5002_s14 }
 0x116   :  { %v234_v8 = vpop.permute.xlu1 %233  ;;  %4492 = vrot.lane.b32.xlu2 %v4491_v7, %s5003_s15  ;;  %4272 = vmatmul.msk.bf16.gmra.mxu1 %vm2310_vm8, %v2518_v23 }
 0x117   :  { %vm663_vm11 = vcmp.eq.s32.totalorder %v234_v8, %v5113_v32  ;;  %4344 = vmatmul.msk.bf16.gmra.mxu3 %vm2310_vm8, %v2518_v23  ;;  %v2122_v23 = vrot.slane %v5290_v46, 4  ;;  %v1767_v8 = vsel %vm1732_vm15, %v1764_v53, %v1766_v58  ;;  %v1768_v53 = vrot.slane %v5302_v55, 3 }
 0x118   :  { %v5446_v9 = vsel %vm663_vm11, 1.0, %v7607_v35  ;;  %v272_v38 = vpop.permute.xlu2 %271 }
 0x119   :  { %v1078_v30 = vrot.slane %v5446_v9, 1  ;;  %v2123_v29 = vsel %vm2085_vm6, %v2121_v48, %v2122_v23  ;;  %v2125_v33 = vsel %vm2085_vm6, %v2122_v23, %v2124_v24  ;;  %v1771_v48 = vrot.slane %v5295_v54, 3 }
 0x11a   :  { %v2520_v40 = vpack.c.bf16 %v2125_v33, %v2123_v29  ;;  %vm667_vm1 = vcmp.eq.s32.totalorder %v272_v38, %v5113_v32  ;;  %v1423_v23 = vrot.slane %v5365_v37, 2  ;;  %v5525_v29 = vsel %vm846_vm2, 1.0, %v7607_v35 }
 0x11b   :  { %v1079_v22 = vsel %vm1026_vm7, %v1077_v17, %v1078_v30  ;;  %v1081_v43 = vsel %vm1026_vm7, %v1078_v30, %v1080_v10  ;;  %v1085_v10 = vrot.slane %v5465_v59, 1  ;;  %v4516_v17 = vpack.i.bf16 %v1414_v14, %v1412_v13 }
 0x11c   :  { %4502 = vrot.lane.b32.xlu1 %v4501_v42, %s5002_s14  ;;  %v4571_v57 = vpack.i.bf16 %v1081_v43, %v1079_v22  ;;  %v1415_v30 = vrot.slane %v5302_v55, 2  ;;  %v4521_v42 = vpack.i.bf16 %v1767_v8, %v1765_v18  ;;  %v1416_v43 = vrot.slane %v5290_v46, 2 }
 0x11d   :  { %v1421_v14 = vrot.slane %v5354_v3, 2  ;;  %v1420_v18 = vrot.slane %v5348_v12, 2  ;;  %v1776_v8 = vrot.slane %v5365_v37, 3 }
 0x11e   :  { %v253_v7 = vpop.permute.xlu1 %252  ;;  %4507 = vrot.lane.b32.xlu2 %v4506_v39, %s5003_s15  ;;  %4572 = vrot.lane.b32.xlu0 %v4571_v57, %s5001_s13  ;;  %v1769_v39 = vrot.slane %v5290_v46, 3  ;;  %v1417_v56 = vsel %vm1379_vm14, %v1415_v30, %v1416_v43  ;;  %v1419_v57 = vsel %vm1379_vm14, %v1416_v43, %v1418_v28  ;;  %v2127_v30 = vrot.slane %v5354_v3, 4 }
 0x11f   :  { %vm665_vm0 = vcmp.eq.s32.totalorder %v253_v7, %v5113_v32  ;;  %v4531_v7 = vpack.i.bf16 %v1419_v57, %v1417_v56  ;;  %v1090_v28 = vrot.slane %v5525_v29, 1  ;;  %v1428_v56 = vrot.slane %v5397_v11, 2 }
 0x120   :  { %v5478_v16 = vsel %vm665_vm0, 1.0, %v7607_v35  ;;  %v1770_v58 = vsel %vm1732_vm15, %v1768_v53, %v1769_v39  ;;  %v1772_v13 = vsel %vm1732_vm15, %v1769_v39, %v1771_v48  ;;  %v5509_v24 = vpop.permute.xlu2 %290  ;;  %vm2440_vm0 = vcmask 785408  }
 0x121   :  { %v1083_v27 = vrot.slane %v5478_v16, 1  ;;  %v4536_v54 = vpack.i.bf16 %v1772_v13, %v1770_v58  ;;  %vm669_vm5 = vcmp.eq.s32.totalorder %v5509_v24, %v5113_v32  ;;  %v4372_v24 = vld [vmem:[%s7600_s1 + $0x10] sm:$0xff] }
 0x123   :  { %v1084_v34 = vsel %vm1026_vm7, %v1082_v60, %v1083_v27  ;;  %v1086_v15 = vsel %vm1026_vm7, %v1083_v27, %v1085_v10  ;;  %v2129_v10 = vrot.slane %v5365_v37, 4  ;;  %v5516_v60 = vsel %vm667_vm1, 1.0, %v7607_v35  ;;  %v4377_v27 = vld [vmem:[%s7600_s1 + $0x38] sm:$0xff] }
 0x124   :  { %4517 = vrot.lane.b32.xlu1 %v4516_v17, %s5002_s14  ;;  %v4586_v22 = vpack.i.bf16 %v1086_v15, %v1084_v34  ;;  %v1774_v17 = vrot.slane %v5354_v3, 3  ;;  %v1773_v37 = vrot.slane %v5348_v12, 3  ;;  %v2126_v34 = vrot.slane %v5348_v12, 4  ;;  %3163 = vmatpush.bf16.msra.mxu2 %v4377_v27 }
 0x125   :  { %v1424_v15 = vsel %vm1379_vm14, %v1421_v14, %v1423_v23  ;;  %v1088_v38 = vrot.slane %v5516_v60, 1  ;;  %v2130_v43 = vsel %vm2085_vm6, %v2127_v30, %v2129_v10  ;;  %v1781_v10 = vrot.slane %v5397_v11, 3 }
 0x126   :  { %4273 = vmatmul.msk.bf16.gmra.mxu1 %vm2310_vm8, %v2520_v40  ;;  %4522 = vrot.lane.b32.xlu2 %v4521_v42, %s5003_s15  ;;  %v1777_v53 = vsel %vm1732_vm15, %v1774_v17, %v1776_v8  ;;  %v2128_v48 = vsel %vm2085_vm6, %v2126_v34, %v2127_v30  ;;  %v1775_v57 = vsel %vm1732_vm15, %v1773_v37, %v1774_v17  ;;  %v1425_v8 = vrot.slane %v5380_v52, 2  ;;  %v4385_v37 = vld [vmem:[%s7601_s2 + $0x28] sm:$0xff] }
 0x127   :  { %4345 = vmatmul.msk.bf16.gmra.mxu3 %vm2310_vm8, %v2520_v40  ;;  %4587 = vrot.lane.b32.xlu0 %v4586_v22, %s5001_s13  ;;  %v1422_v22 = vsel %vm1379_vm14, %v1420_v18, %v1421_v14  ;;  %v4551_v23 = vpack.i.bf16 %v1777_v53, %v1775_v57  ;;  %v1091_v13 = vsel %vm1026_vm7, %v1088_v38, %v1090_v28  ;;  %v4386_v14 = vld [vmem:[%s7601_s2 + $0x30] sm:$0xff]  ;;  %v1426_v18 = vrot.slane %v5377_v44, 2 }
 0x128   :  { %v4546_v39 = vpack.i.bf16 %v1424_v15, %v1422_v22  ;;  %v1779_v17 = vrot.slane %v5377_v44, 3  ;;  %v1778_v30 = vrot.slane %v5380_v52, 3  ;;  %2766 = vmatpush.bf16.msra.mxu0 %v4386_v14  ;;  %v1433_v22 = vrot.slane %v5428_v63, 2 }
 0x129   :  { %v1427_v34 = vsel %vm1379_vm14, %v1425_v8, %v1426_v18  ;;  %v1786_v57 = vrot.slane %v5428_v63, 3 }
 0x12a   :  { %v1782_v15 = vsel %vm1732_vm15, %v1779_v17, %v1781_v10  ;;  %v1780_v53 = vsel %vm1732_vm15, %v1778_v30, %v1779_v17  ;;  %v4383_v10 = vld [vmem:[%s7601_s2 + $0x18] sm:$0xff] }
 0x12b   :  { %v4566_v28 = vpack.i.bf16 %v1782_v15, %v1780_v53  ;;  %v1435_v53 = vrot.slane %v5468_v62, 2 }
 0x12c   :  { %4532 = vrot.lane.b32.xlu1 %v4531_v7, %s5002_s14  ;;  %v2522_v7 = vpack.c.bf16 %v2130_v43, %v2128_v48  ;;  %v1431_v43 = vrot.slane %v5446_v9, 2  ;;  %2767 = vmatpush.bf16.msra.mxu0 %v4385_v37  ;;  %v2134_v48 = vrot.slane %v5397_v11, 4  ;;  %v1783_v11 = vrot.slane %v5436_v19, 3 }
 0x12e   :  { %v266_v33 = vpop.permute.xlu1 %265  ;;  %4537 = vrot.lane.b32.xlu2 %v4536_v54, %s5003_s15  ;;  %v4376_v54 = vld [vmem:[%s7600_s1 + $0x30] sm:$0xff]  ;;  %v1434_v8 = vsel %vm1379_vm14, %v1431_v43, %v1433_v22 }
 0x12f   :  { %vm666_vm3 = vcmp.eq.s32.totalorder %v266_v33, %v5113_v32  ;;  %v1429_v33 = vsel %vm1379_vm14, %v1426_v18, %v1428_v56  ;;  %3164 = vmatpush.bf16.msra.mxu2 %v4376_v54  ;;  %v1430_v56 = vrot.slane %v5436_v19, 2  ;;  %v2131_v54 = vrot.slane %v5380_v52, 4  ;;  %v4382_v22 = vld [vmem:[%s7601_s2 + $0x10] sm:$0xff] }
 0x130   :  { %v5536_v40 = vsel %vm666_vm3, 1.0, %v7607_v35  ;;  %v5558_v27 = vpop.permute.xlu2 %303 }
 0x131   :  { %v1087_v42 = vrot.slane %v5536_v40, 1  ;;  %v1432_v18 = vsel %vm1379_vm14, %v1430_v56, %v1431_v43  ;;  %v1438_v43 = vrot.slane %v5465_v59, 2  ;;  %v1788_v56 = vrot.slane %v5468_v62, 3 }
 0x132   :  { %v4576_v37 = vpack.i.bf16 %v1434_v8, %v1432_v18  ;;  %v4381_v8 = vld [vmem:[%s7601_s2 + $0x8] sm:$0xff]  ;;  %vm670_vm12 = vcmp.eq.s32.totalorder %v5558_v27, %v5113_v32 }
 0x133   :  { %v1089_v58 = vsel %vm1026_vm7, %v1087_v42, %v1088_v38  ;;  %v4375_v38 = vld [vmem:[%s7600_s1 + $0x28] sm:$0xff]  ;;  %v4561_v42 = vpack.i.bf16 %v1429_v33, %v1427_v34  ;;  %v4373_v33 = vld [vmem:[%s7600_s1 + $0x18] sm:$0xff]  ;;  %v1436_v34 = vrot.slane %v5478_v16, 2 }
 0x134   :  { %4547 = vrot.lane.b32.xlu1 %v4546_v39, %s5002_s14  ;;  %v4601_v31 = vpack.i.bf16 %v1091_v13, %v1089_v58  ;;  %v4384_v39 = vld [vmem:[%s7601_s2 + $0x20] sm:$0xff]  ;;  %v1784_v58 = vrot.slane %v5446_v9, 3  ;;  %3165 = vmatpush.bf16.msra.mxu2 %v4375_v38 }
 0x135   :  { %2768 = vmatpush.bf16.msra.mxu0 %v4384_v39 }
 0x136   :  { %4274 = vmatmul.msk.bf16.gmra.mxu1 %vm2310_vm8, %v2522_v7  ;;  %4552 = vrot.lane.b32.xlu2 %v4551_v23, %s5003_s15  ;;  %v2132_v23 = vrot.slane %v5377_v44, 4  ;;  %v285_v13 = vpop.permute.xlu1 %284  ;;  %v1785_v17 = vsel %vm1732_vm15, %v1783_v11, %v1784_v58  ;;  %v1787_v30 = vsel %vm1732_vm15, %v1784_v58, %v1786_v57  ;;  %v1791_v58 = vrot.slane %v5465_v59, 3 }
 0x137   :  { %4346 = vmatmul.msk.bf16.gmra.mxu3 %vm2310_vm8, %v2522_v7  ;;  %4602 = vrot.lane.b32.xlu0 %v4601_v31, %s5001_s13  ;;  %v4374_v7 = vld [vmem:[%s7600_s1 + $0x20] sm:$0xff]  ;;  %vm668_vm4 = vcmp.eq.s32.totalorder %v285_v13, %v5113_v32  ;;  %v1439_v13 = vsel %vm1379_vm14, %v1436_v34, %v1438_v43 }
 0x138   :  { %v5591_v14 = vpop.permute.xlu2 %322  ;;  %v2135_v31 = vsel %vm2085_vm6, %v2132_v23, %v2134_v48  ;;  %3166 = vmatpush.bf16.msra.mxu2 %v4374_v7  ;;  %v2133_v15 = vsel %vm2085_vm6, %v2131_v54, %v2132_v23  ;;  %v5619_v39 = vsel %vm668_vm4, 1.0, %v7607_v35  ;;  %v5626_v48 = vsel %vm669_vm5, 1.0, %v7607_v35  ;;  %v5631_v7 = vpop.permute.xlu0 %4422  ;;  %v4380_v43 = vld [vmem:[%s7601_s2] sm:$0xff] }
 0x139   :  { %v2524_v38 = vpack.c.bf16 %v2135_v31, %v2133_v15  ;;  %2769 = vmatpush.bf16.msra.mxu0 %v4383_v10  ;;  %v1437_v23 = vsel %vm1379_vm14, %v1435_v53, %v1436_v34  ;;  %v1092_v54 = vrot.slane %v5619_v39, 1  ;;  %v1093_v10 = vrot.slane %v5626_v48, 1 }
 0x13a   :  { %v1440_v34 = vrot.slane %v5536_v40, 2  ;;  %v2137_v53 = vrot.slane %v5446_v9, 4  ;;  %v1799_v45 = vrot.slane %v5626_v48, 3  ;;  %vm672_vm3 = vcmp.eq.s32.totalorder %v5591_v14, %v5113_v32 }
 0x13c   :  { %4562 = vrot.lane.b32.xlu1 %v4561_v42, %s5002_s14  ;;  %v4581_v42 = vpack.i.bf16 %v1787_v30, %v1785_v17  ;;  %3167 = vmatpush.bf16.msra.mxu2 %v4373_v33  ;;  %v4371_v33 = vld [vmem:[%s7600_s1 + $0x8] sm:$0xff] }
 0x13d   :  { %2770 = vmatpush.bf16.msra.mxu0 %v4382_v22  ;;  %v1094_v22 = vsel %vm1026_vm7, %v1092_v54, %v1093_v10 }
 0x13e   :  { %4567 = vrot.lane.b32.xlu2 %v4566_v28, %s5003_s15  ;;  %v1789_v28 = vrot.slane %v5478_v16, 3 }
 0x140   :  { %v1790_v17 = vsel %vm1732_vm15, %v1788_v56, %v1789_v28  ;;  %v1792_v30 = vsel %vm1732_vm15, %v1789_v28, %v1791_v58  ;;  %3168 = vmatpush.bf16.msra.mxu2 %v4372_v24  ;;  %v1441_v28 = vrot.slane %v5516_v60, 2  ;;  %v1793_v24 = vrot.slane %v5536_v40, 3 }
 0x141   :  { %2771 = vmatpush.bf16.msra.mxu0 %v4381_v8  ;;  %v1443_v58 = vrot.slane %v5525_v29, 2  ;;  %v1796_v8 = vrot.slane %v5525_v29, 3 }
 0x142   :  { %v1442_v54 = vsel %vm1379_vm14, %v1440_v34, %v1441_v28 }
 0x144   :  { %4577 = vrot.lane.b32.xlu1 %v4576_v37, %s5002_s14  ;;  %v4591_v37 = vpack.i.bf16 %v1439_v13, %v1437_v23  ;;  %3169 = vmatpush.bf16.msra.mxu2 %v4371_v33  ;;  %v2136_v23 = vrot.slane %v5436_v19, 4  ;;  %v1794_v13 = vrot.slane %v5516_v60, 3 }
 0x145   :  { %2772 = vmatpush.bf16.msra.mxu0 %v4380_v43 }
 0x146   :  { %v297_v57 = vpop.permute.xlu1 %296  ;;  %4275 = vmatmul.msk.bf16.gmra.mxu1 %vm2310_vm8, %v2524_v38  ;;  %4582 = vrot.lane.b32.xlu2 %v4581_v42, %s5003_s15  ;;  %v4596_v42 = vpack.i.bf16 %v1792_v30, %v1790_v17  ;;  %v5684_v17 = vpop.permute.xlu0 %4437  ;;  %v1444_v30 = vsel %vm1379_vm14, %v1441_v28, %v1443_v58  ;;  %v2138_v33 = vsel %vm2085_vm6, %v2136_v23, %v2137_v53  ;;  %v1798_v23 = vrot.slane %v5619_v39, 3 }
 0x147   :  { %vm847_vm9 = vcmp.eq.s32.totalorder %v297_v57, %v5113_v32  ;;  %4347 = vmatmul.msk.bf16.gmra.mxu3 %vm2310_vm8, %v2524_v38  ;;  %v2139_v38 = vrot.slane %v5428_v63, 4  ;;  %v4370_v63 = vld [vmem:[%s7600_s1] sm:$0xff]  ;;  %v1795_v34 = vsel %vm1732_vm15, %v1793_v24, %v1794_v13  ;;  %v1797_v43 = vsel %vm1732_vm15, %v1794_v13, %v1796_v8 }
 0x148   :  { %v5639_v11 = vsel %vm847_vm9, 1.0, %v7607_v35  ;;  %v5641_v18 = vpop.permute.xlu2 %334  ;;  %3170 = vmatpush.bf16.msra.mxu2 %v4370_v63  ;;  %v4611_v27 = vpack.i.bf16 %v1797_v43, %v1795_v34  ;;  %v1446_v24 = vrot.slane %v5626_v48, 2  ;;  %v1445_v63 = vrot.slane %v5619_v39, 2 }
 0x149   :  { %v1095_v31 = vrot.slane %v5639_v11, 1  ;;  %vm849_vm1 = vcmp.eq.s32.totalorder %v5641_v18, %v5113_v32  ;;  %v2149_v18 = vrot.slane %v5525_v29, 4 }
 0x14b   :  { %v1096_v15 = vsel %vm1026_vm7, %v1093_v10, %v1095_v31  ;;  %v5682_v31 = vld [vmem:[%s7599_s0 + $0x10] sm:$0xff] }
 0x14c   :  { %4592 = vrot.lane.b32.xlu1 %v4591_v37, %s5002_s14  ;;  %v4616_v56 = vpack.i.bf16 %v1096_v15, %v1094_v22  ;;  %v2140_v37 = vsel %vm2085_vm6, %v2137_v53, %v2139_v38  ;;  %v4606_v15 = vpack.i.bf16 %v1444_v30, %v1442_v54  ;;  %v336_v28 = vperm.slane %v5682_v31, 0 }
 0x14d   :  { %v5702_v38 = vsel %vm671_vm10, 1.0, %v7607_v35  ;;  %v2526_v53 = vpack.c.bf16 %v2140_v37, %v2138_v33  ;;  %v1447_v33 = vsel %vm1379_vm14, %v1445_v63, %v1446_v24  ;;  %v2141_v63 = vrot.slane %v5468_v62, 4 }
 0x14e   :  { %v316_v57 = vpop.permute.xlu1 %315  ;;  %4597 = vrot.lane.b32.xlu2 %v4596_v42, %s5003_s15  ;;  %4617 = vrot.lane.b32.xlu0 %v4616_v56, %s5001_s13  ;;  %v1448_v42 = vrot.slane %v5639_v11, 2  ;;  %v5707_v56 = vsel %vm670_vm12, 1.0, %v7607_v35  ;;  %v1804_v54 = vrot.slane %v5702_v38, 3  ;;  %v5725_v43 = vpop.permute.xlu0 %4452  ;;  %v2146_v62 = vrot.slane %v5536_v40, 4 }
 0x14f   :  { %vm848_vm11 = vcmp.eq.s32.totalorder %v316_v57, %v5113_v32  ;;  %v1801_v57 = vrot.slane %v5639_v11, 3  ;;  %v1803_v8 = vrot.slane %v5707_v56, 3 }
 0x150   :  { %v5677_v10 = vpop.permute.xlu2 %4432  ;;  %v5694_v22 = vsel %vm848_vm11, 1.0, %v7607_v35  ;;  %v1449_v13 = vsel %vm1379_vm14, %v1446_v24, %v1448_v42  ;;  %v2142_v35 = vrot.slane %v5478_v16, 4  ;;  %v2144_v24 = vrot.slane %v5465_v59, 4 }
 0x151   :  { %v1806_v58 = vrot.slane %v5694_v22, 3  ;;  %v1802_v37 = vsel %vm1732_vm15, %v1799_v45, %v1801_v57  ;;  %v4621_v34 = vpack.i.bf16 %v1449_v13, %v1447_v33  ;;  %v5737_v57 = vpop.f32.mrf.mxu1  ;;  %v4424_v59 = vunpack.i.l.bf16 %v5631_v7 }
 0x152   :  { %7625 = vst [vmem:[#allocation11_spill] sm:$0xff] %v5737_v57  ;;  %v2145_v13 = vsel %vm2085_vm6, %v2142_v35, %v2144_v24  ;;  %v5750_v33 = vperm.slane %v5682_v31, 1 }
 0x154   :  { %4607 = vrot.lane.b32.xlu1 %v4606_v15, %s5002_s14  ;;  %v1807_v15 = vsel %vm1732_vm15, %v1804_v54, %v1806_v58 }
 0x156   :  { %4276 = vmatmul.msk.bf16.gmra.mxu1 %vm2310_vm8, %v2526_v53  ;;  %4612 = vrot.lane.b32.xlu2 %v4611_v27, %s5003_s15  ;;  %v1805_v27 = vsel %vm1732_vm15, %v1803_v8, %v1804_v54  ;;  %v4425_v54 = vunpack.i.h.bf16 %v5631_v7  ;;  %v1100_v8 = vrot.slane %v5694_v22, 1  ;;  %v1453_v7 = vrot.slane %v5694_v22, 2 }
 0x157   :  { %4348 = vmatmul.msk.bf16.gmra.mxu3 %vm2310_vm8, %v2526_v53  ;;  %341 = vperm.xlu0 %4418, %v336_v28   ;;  %v1800_v53 = vsel %vm1732_vm15, %v1798_v23, %v1799_v45  ;;  %v4641_v55 = vpack.i.bf16 %v1807_v15, %v1805_v27  ;;  %v5742_v45 = vpop.f32.mrf.mxu3  ;;  %v2143_v23 = vsel %vm2085_vm6, %v2141_v63, %v2142_v35  ;;  %v5754_v15 = vpop.permute.xlu0 %4467 }
 0x158   :  { %v5720_v30 = vpop.permute.xlu2 %4447  ;;  %v4626_v42 = vpack.i.bf16 %v1802_v37, %v1800_v53  ;;  %7626 = vst [vmem:[#allocation12_spill] sm:$0xff] %v5742_v45  ;;  %v1098_v37 = vrot.slane %v5702_v38, 1  ;;  %v2312_v35 = vsel %vm2310_vm8, %v5130_v41, %v4425_v54  ;;  %v1097_v53 = vrot.slane %v5707_v56, 1 }
 0x159   :  { %v2311_v27 = vsel %vm2310_vm8, %v5118_v36, %v4424_v59  ;;  %v4435_v41 = vunpack.i.h.bf16 %v5677_v10  ;;  %v5773_v59 = vpop.f32.mrf.mxu1 }
 0x15a   :  { %v1101_v45 = vsel %vm1026_vm7, %v1098_v37, %v1100_v8 }
 0x15c   :  { %4622 = vrot.lane.b32.xlu1 %v4621_v34, %s5002_s14  ;;  %v1451_v34 = vrot.slane %v5702_v38, 2 }
 0x15e   :  { %v5731_v46 = vpop.permute.xlu1 %328  ;;  %4627 = vrot.lane.b32.xlu2 %v4626_v42, %s5003_s15 }
 0x15f   :  { %4642 = vrot.lane.b32.xlu0 %v4641_v55, %s5003_s15  ;;  %v2528_v55 = vpack.c.bf16 %v2145_v13, %v2143_v23  ;;  %v1450_v23 = vrot.slane %v5707_v56, 2  ;;  %v4434_v13 = vunpack.i.l.bf16 %v5677_v10  ;;  %v1454_v10 = vsel %vm1379_vm14, %v1451_v34, %v1453_v7  ;;  %v5779_v21 = vpop.f32.mrf.mxu3 }
 0x160   :  { %v5739_v58 = vpop.permute.xlu2 %4462  ;;  %4648 = vset.pattern.permute.xlu0 %v5058_v6  ;;  %vm673_vm2 = vcmp.eq.s32.totalorder %v5731_v46, %v5113_v32 }
 0x164   :  { %347 = vperm.xlu1 %4419, %v336_v28  }
 0x166   :  { %v4428_v42 = vpop.permute.xlu1 %4427  ;;  %4277 = vmatmul.msk.bf16.gmra.mxu1 %vm2310_vm8, %v2528_v55  ;;  %353 = vperm.xlu2 %4420, %v336_v28  }
 0x167   :  { %v4430_v24 = vunpack.i.h.bf16 %v4428_v42  ;;  %v4429_v63 = vunpack.i.l.bf16 %v4428_v42  ;;  %4349 = vmatmul.msk.bf16.gmra.mxu3 %vm2310_vm8, %v2528_v55  ;;  %v1099_v55 = vsel %vm1026_vm7, %v1097_v53, %v1098_v37  ;;  %v2147_v53 = vrot.slane %v5516_v60, 4 }
 0x168   :  { %v5767_v54 = vpop.permute.xlu2 %4477  ;;  %372 = vperm.xlu0 %4648, %v5750_v33   ;;  %v4631_v20 = vpack.i.bf16 %v1101_v45, %v1099_v55  ;;  %v4440_v45 = vunpack.i.h.bf16 %v5684_v17 }
 0x169   :  { %v2376_v28 = vsel %vm2375_vm13, %v2311_v27, %v4429_v63  ;;  %v2377_v36 = vsel %vm2375_vm13, %v2312_v35, %v4430_v24  ;;  %v1452_v35 = vsel %vm1379_vm14, %v1450_v23, %v1451_v34  ;;  %v4439_v34 = vunpack.i.l.bf16 %v5684_v17 }
 0x16a   :  { %v2441_v42 = vsel %vm2440_vm0, %v2376_v28, %v4434_v13  ;;  %v2442_v57 = vsel %vm2440_vm0, %v2377_v36, %v4435_v41  ;;  %v4636_v37 = vpack.i.bf16 %v1454_v10, %v1452_v35  ;;  %v2148_v46 = vsel %vm2085_vm6, %v2146_v62, %v2147_v53  ;;  %v5817_v13 = vpop.f32.mrf.mxu1 }
 0x16b   :  { %v2505_v8 = vpack.c.bf16 %v2442_v57, %v2441_v42  ;;  %v7627_v27 = vmov 0.0   ;;  %v2314_v29 = vsel %vm2310_vm8, %v5139_v47, %v4440_v45  ;;  %v2313_v41 = vsel %vm2310_vm8, %v5147_v49, %v4439_v34 }
 0x16c   :  { %4646 = vset.pattern.permute.xlu1 %v5046_v1  ;;  %v5804_v24 = vsel %vm849_vm1, 1.0, %v7627_v27  ;;  %v5807_v17 = vsel %vm673_vm2, 1.0, %v7627_v27  ;;  %v5810_v23 = vsel %vm672_vm3, 1.0, %v7627_v27  ;;  %v2150_v62 = vsel %vm2085_vm6, %v2147_v53, %v2149_v18 }
 0x16d   :  { %4632 = vrot.lane.b32.xlu1 %v4631_v20, %s5001_s13  ;;  %2773 = vmatmul.bf16.vlgmr.msra.gmra.mxu0 %v2505_v8  ;;  %v5795_v20 = vpop.permute.xlu0 %4482  ;;  %v1105_v28 = vrot.slane %v5804_v24, 1  ;;  %v1103_v36 = vrot.slane %v5807_v17, 1  ;;  %v2530_v55 = vpack.c.bf16 %v2150_v62, %v2148_v46  ;;  %v5822_v42 = vperm.slane %v5682_v31, 2 }
 0x16e   :  { %3171 = vmatmul.bf16.vlgmr.msra.gmra.mxu2 %v2505_v8  ;;  %v4443_v57 = vpop.permute.xlu1 %4442  ;;  %4647 = vset.pattern.permute.xlu2 %v5051_v2  ;;  %v1102_v10 = vrot.slane %v5810_v23, 1  ;;  %v5825_v8 = vpop.f32.mrf.mxu3  ;;  %v1458_v35 = vrot.slane %v5804_v24, 2  ;;  %v4449_v53 = vunpack.i.l.bf16 %v5720_v30  ;;  %v1455_v34 = vrot.slane %v5810_v23, 2 }
 0x16f   :  { %4637 = vrot.lane.b32.xlu2 %v4636_v37, %s5002_s14  ;;  %v4445_v63 = vunpack.i.h.bf16 %v4443_v57  ;;  %v4444_v14 = vunpack.i.l.bf16 %v4443_v57  ;;  %7628 = vst [vmem:[#allocation13_spill] sm:$0xff] %v5825_v8  ;;  %v4450_v37 = vunpack.i.h.bf16 %v5720_v30  ;;  %v1456_v57 = vrot.slane %v5807_v17, 2 }
 0x170   :  { %v5799_v7 = vpop.permute.xlu2 %4492  ;;  %4665 = vset.pattern.permute.xlu0 %v5051_v2  ;;  %v1104_v46 = vsel %vm1026_vm7, %v1102_v10, %v1103_v36  ;;  %v1811_v8 = vrot.slane %v5804_v24, 3  ;;  %v1809_v10 = vrot.slane %v5807_v17, 3 }
 0x171   :  { %v2378_v47 = vsel %vm2375_vm13, %v2313_v41, %v4444_v14  ;;  %v2379_v49 = vsel %vm2375_vm13, %v2314_v29, %v4445_v63  ;;  %v1106_v63 = vsel %vm1026_vm7, %v1103_v36, %v1105_v28  ;;  %v1457_v41 = vsel %vm1379_vm14, %v1455_v34, %v1456_v57 }
 0x172   :  { %v2443_v14 = vsel %vm2440_vm0, %v2378_v47, %v4449_v53  ;;  %v2444_v30 = vsel %vm2440_vm0, %v2379_v49, %v4450_v37  ;;  %v1459_v62 = vsel %vm1379_vm14, %v1456_v57, %v1458_v35  ;;  %v2154_v28 = vrot.slane %v5639_v11, 4  ;;  %v5854_v49 = vpop.f32.mrf.mxu1 }
 0x173   :  { %v4654_v36 = vpack.i.bf16 %v1459_v62, %v1457_v41  ;;  %v1808_v47 = vrot.slane %v5810_v23, 3  ;;  %v2152_v35 = vrot.slane %v5626_v48, 4  ;;  %v2151_v53 = vrot.slane %v5619_v39, 4 }
 0x174   :  { %v4455_v11 = vunpack.i.h.bf16 %v5725_v43  ;;  %v4454_v34 = vunpack.i.l.bf16 %v5725_v43 }
 0x175   :  { %360 = vperm.xlu1 %4646, %v5750_v33   ;;  %v5845_v29 = vpop.permute.xlu0 %4497  ;;  %v2155_v62 = vsel %vm2085_vm6, %v2152_v35, %v2154_v28  ;;  %v4465_v28 = vunpack.i.h.bf16 %v5739_v58 }
 0x176   :  { %v4458_v45 = vpop.permute.xlu1 %4457  ;;  %4278 = vmatmul.msk.bf16.gmra.mxu1 %vm2310_vm8, %v2530_v55  ;;  %v5859_v57 = vpop.f32.mrf.mxu3  ;;  %v2316_v43 = vsel %vm2310_vm8, %v5168_v0, %v4455_v11 }
 0x177   :  { %4350 = vmatmul.msk.bf16.gmra.mxu3 %vm2310_vm8, %v2530_v55  ;;  %366 = vperm.xlu2 %4647, %v5750_v33   ;;  %v4649_v55 = vpack.i.bf16 %v1106_v63, %v1104_v46  ;;  %v2507_v33 = vpack.c.bf16 %v2444_v30, %v2443_v14  ;;  %7629 = vst [vmem:[#allocation14_spill] sm:$0xff] %v5859_v57  ;;  %v4460_v30 = vunpack.i.h.bf16 %v4458_v45  ;;  %v4459_v41 = vunpack.i.l.bf16 %v4458_v45 }
 0x178   :  { %v5838_v18 = vpop.permute.xlu2 %4507  ;;  %385 = vperm.xlu0 %4665, %v5822_v42   ;;  %v1810_v63 = vsel %vm1732_vm15, %v1808_v47, %v1809_v10  ;;  %v1812_v14 = vsel %vm1732_vm15, %v1809_v10, %v1811_v8  ;;  %v2315_v47 = vsel %vm2310_vm8, %v5174_v4, %v4454_v34  ;;  %v4464_v57 = vunpack.i.l.bf16 %v5739_v58 }
 0x179   :  { %v2380_v10 = vsel %vm2375_vm13, %v2315_v47, %v4459_v41  ;;  %v2381_v45 = vsel %vm2375_vm13, %v2316_v43, %v4460_v30  ;;  %v2159_v58 = vrot.slane %v5694_v22, 4  ;;  %v2157_v41 = vrot.slane %v5702_v38, 4 }
 0x17a   :  { %v5887_v0 = vpop.f32.mrf.mxu1 }
 0x17d   :  { %4650 = vrot.lane.b32.xlu1 %v4649_v55, %s5001_s13  ;;  %2778 = vmatmul.bf16.gmra.mxu0 %v2507_v33  ;;  %v5871_v55 = vpop.permute.xlu0 %4512 }
 0x17e   :  { %3176 = vmatmul.bf16.gmra.mxu2 %v2507_v33  ;;  %v4473_v37 = vpop.permute.xlu1 %4472  ;;  %4666 = vset.pattern.permute.xlu1 %v5058_v6  ;;  %v4659_v33 = vpack.i.bf16 %v1812_v14, %v1810_v63  ;;  %v5894_v11 = vpop.f32.mrf.mxu3 }
 0x17f   :  { %4655 = vrot.lane.b32.xlu2 %v4654_v36, %s5002_s14  ;;  %v2153_v36 = vsel %vm2085_vm6, %v2151_v53, %v2152_v35  ;;  %v2445_v35 = vsel %vm2440_vm0, %v2380_v10, %v4464_v57  ;;  %v2446_v53 = vsel %vm2440_vm0, %v2381_v45, %v4465_v28  ;;  %v2156_v57 = vrot.slane %v5707_v56, 4 }
 0x180   :  { %v5864_v46 = vpop.permute.xlu2 %4522  ;;  %4664 = vset.pattern.permute.xlu2 %v5046_v1  ;;  %4682 = vset.pattern.permute.xlu0 %v5046_v1  ;;  %v2532_v8 = vpack.c.bf16 %v2155_v62, %v2153_v36  ;;  %v2509_v34 = vpack.c.bf16 %v2446_v53, %v2445_v35  ;;  %v4470_v62 = vunpack.i.h.bf16 %v5754_v15  ;;  %v4475_v22 = vunpack.i.h.bf16 %v4473_v37 }
 0x181   :  { %v4474_v43 = vunpack.i.l.bf16 %v4473_v37  ;;  %v2158_v10 = vsel %vm2085_vm6, %v2156_v57, %v2157_v41 }
 0x182   :  { %v5910_v47 = vpop.f32.mrf.mxu1  ;;  %v2318_v45 = vsel %vm2310_vm8, %v5199_v25, %v4470_v62 }
 0x183   :  { %v2383_v37 = vsel %vm2375_vm13, %v2318_v45, %v4475_v22  ;;  %v2162_v22 = vrot.slane %v5807_v17, 4  ;;  %v4485_v45 = vunpack.i.h.bf16 %v5795_v20 }
 0x185   :  { %4660 = vrot.lane.b32.xlu1 %v4659_v33, %s5003_s15  ;;  %v5897_v14 = vpop.permute.xlu0 %4527  ;;  %v4469_v33 = vunpack.i.l.bf16 %v5754_v15 }
 0x186   :  { %v5883_v63 = vpop.permute.xlu1 %4487  ;;  %4279 = vmatmul.msk.bf16.gmra.mxu1 %vm2310_vm8, %v2532_v8 }
 0x187   :  { %4351 = vmatmul.msk.bf16.gmra.mxu3 %vm2310_vm8, %v2532_v8  ;;  %v5912_v8 = vpop.f32.mrf.mxu3  ;;  %v2317_v15 = vsel %vm2310_vm8, %v5202_v26, %v4469_v33  ;;  %v2164_v33 = vrot.slane %v5804_v24, 4 }
 0x188   :  { %v5889_v4 = vpop.permute.xlu2 %4537  ;;  %379 = vperm.xlu2 %4664, %v5822_v42   ;;  %7630 = vst [vmem:[#allocation15_spill] sm:$0xff] %v5912_v8  ;;  %v2382_v53 = vsel %vm2375_vm13, %v2317_v15, %v4474_v43  ;;  %v4484_v15 = vunpack.i.l.bf16 %v5795_v20 }
 0x18a   :  { %v5932_v62 = vpop.f32.mrf.mxu1 }
 0x18b   :  { %7631 = vst [vmem:[#allocation16_spill] sm:$0xff] %v5932_v62 }
 0x18d   :  { %391 = vperm.xlu1 %4666, %v5822_v42   ;;  %2783 = vmatmul.bf16.gmra.mxu0 %v2509_v34  ;;  %v2160_v42 = vsel %vm2085_vm6, %v2157_v41, %v2159_v58  ;;  %v4543_v35 = vpop.permute.xlu0 %4542  ;;  %v4479_v58 = vunpack.i.l.bf16 %v5767_v54 }
 0x18e   :  { %3181 = vmatmul.bf16.gmra.mxu2 %v2509_v34  ;;  %v5900_v30 = vpop.permute.xlu1 %4502  ;;  %v2534_v28 = vpack.c.bf16 %v2160_v42, %v2158_v10  ;;  %v4480_v34 = vunpack.i.h.bf16 %v5767_v54  ;;  %v2161_v42 = vrot.slane %v5810_v23, 4 }
 0x18f   :  { %v2447_v26 = vsel %vm2440_vm0, %v2382_v53, %v4479_v58  ;;  %v5936_v54 = vpop.f32.mrf.mxu3  ;;  %v4489_v53 = vunpack.i.l.bf16 %v5883_v63  ;;  %v4545_v58 = vunpack.i.h.bf16 %v4543_v35 }
 0x190   :  { %v5906_v36 = vpop.permute.xlu2 %4552  ;;  %4684 = vset.pattern.permute.xlu2 %v5058_v6  ;;  %v2448_v41 = vsel %vm2440_vm0, %v2383_v37, %v4480_v34  ;;  %7632 = vst [vmem:[#allocation17_spill] sm:$0xff] %v5936_v54  ;;  %v2163_v24 = vsel %vm2085_vm6, %v2161_v42, %v2162_v22  ;;  %v2165_v37 = vsel %vm2085_vm6, %v2162_v22, %v2164_v33  ;;  %v4495_v42 = vunpack.i.h.bf16 %v5799_v7 }
 0x191   :  { %v2511_v57 = vpack.c.bf16 %v2448_v41, %v2447_v26  ;;  %v4544_v26 = vunpack.i.l.bf16 %v4543_v35  ;;  %v2320_v41 = vsel %vm2310_vm8, %v5228_v51, %v4485_v45  ;;  %v2536_v54 = vpack.c.bf16 %v2165_v37, %v2163_v24 }
 0x192   :  { %v4494_v33 = vunpack.i.l.bf16 %v5799_v7  ;;  %v2328_v51 = vsel %vm2310_vm8, %v5354_v3, %v4545_v58  ;;  %v4554_v7 = vunpack.i.l.bf16 %v5906_v36 }
 0x195   :  { %4683 = vset.pattern.permute.xlu1 %v5051_v2  ;;  %v4558_v10 = vpop.permute.xlu0 %4557 }
 0x196   :  { %v5924_v8 = vpop.permute.xlu1 %4517  ;;  %4280 = vmatmul.msk.bf16.gmra.mxu1 %vm2310_vm8, %v2534_v28 }
 0x197   :  { %4352 = vmatmul.msk.bf16.gmra.mxu3 %vm2310_vm8, %v2534_v28  ;;  %v4490_v28 = vunpack.i.h.bf16 %v5883_v63  ;;  %v5955_v63 = vpop.f32.mrf.mxu1  ;;  %v5960_v35 = vpop.f32.mrf.mxu3 }
 0x198   :  { %v5928_v25 = vpop.permute.xlu2 %4567  ;;  %7633 = vst [vmem:[#allocation18_spill] sm:$0xff] %v5960_v35 }
 0x199   :  { %v2385_v62 = vsel %vm2375_vm13, %v2320_v41, %v4490_v28 }
 0x19a   :  { %v2450_v37 = vsel %vm2440_vm0, %v2385_v62, %v4495_v42  ;;  %v4499_v62 = vunpack.i.l.bf16 %v5845_v29 }
 0x19d   :  { %2788 = vmatmul.bf16.gmra.mxu0 %v2511_v57  ;;  %v4573_v45 = vpop.permute.xlu0 %4572 }
 0x19e   :  { %3186 = vmatmul.bf16.gmra.mxu2 %v2511_v57  ;;  %v5938_v43 = vpop.permute.xlu1 %4532  ;;  %v2319_v57 = vsel %vm2310_vm8, %v5225_v50, %v4484_v15  ;;  %v2327_v50 = vsel %vm2310_vm8, %v5348_v12, %v4544_v26  ;;  %v4560_v26 = vunpack.i.h.bf16 %v4558_v10 }
 0x19f   :  { %v2384_v20 = vsel %vm2375_vm13, %v2319_v57, %v4489_v53  ;;  %v4555_v53 = vunpack.i.h.bf16 %v5906_v36  ;;  %v4559_v57 = vunpack.i.l.bf16 %v4558_v10  ;;  %v4500_v36 = vunpack.i.h.bf16 %v5845_v29 }
 0x1a0   :  { %v5947_v34 = vpop.permute.xlu2 %4582  ;;  %v2449_v24 = vsel %vm2440_vm0, %v2384_v20, %v4494_v33  ;;  %v2330_v42 = vsel %vm2310_vm8, %v5377_v44, %v4560_v26  ;;  %v4510_v26 = vunpack.i.h.bf16 %v5838_v18 }
 0x1a1   :  { %v2329_v33 = vsel %vm2310_vm8, %v5380_v52, %v4559_v57  ;;  %v2322_v52 = vsel %vm2310_vm8, %v5245_v61, %v4500_v36  ;;  %v4509_v57 = vunpack.i.l.bf16 %v5838_v18 }
 0x1a6   :  { %v4548_v22 = vpop.permute.xlu1 %4547  ;;  %4281 = vmatmul.msk.bf16.gmra.mxu1 %vm2310_vm8, %v2536_v54 }
 0x1a7   :  { %v4550_v15 = vunpack.i.h.bf16 %v4548_v22  ;;  %v4549_v28 = vunpack.i.l.bf16 %v4548_v22  ;;  %4353 = vmatmul.msk.bf16.gmra.mxu3 %vm2310_vm8, %v2536_v54  ;;  %v2513_v22 = vpack.c.bf16 %v2450_v37, %v2449_v24 }
 0x1a8   :  { %v5977_v35 = vpop.permute.xlu2 %4597 }
 0x1a9   :  { %v2392_v41 = vsel %vm2375_vm13, %v2327_v50, %v4549_v28  ;;  %v2393_v3 = vsel %vm2375_vm13, %v2328_v51, %v4550_v15  ;;  %v4505_v50 = vunpack.i.h.bf16 %v5900_v30  ;;  %v4504_v15 = vunpack.i.l.bf16 %v5900_v30 }
 0x1aa   :  { %v2457_v58 = vsel %vm2440_vm0, %v2392_v41, %v4554_v7  ;;  %v2458_v12 = vsel %vm2440_vm0, %v2393_v3, %v4555_v53  ;;  %v4570_v28 = vunpack.i.h.bf16 %v5928_v25  ;;  %v4569_v53 = vunpack.i.l.bf16 %v5928_v25  ;;  %v4588_v7 = vpop.permute.xlu0 %4587 }
 0x1ab   :  { %v5975_v54 = vpack.c.bf16 %v2458_v12, %v2457_v58  ;;  %v2321_v41 = vsel %vm2310_vm8, %v5249_v5, %v4499_v62  ;;  %v4575_v3 = vunpack.i.h.bf16 %v4573_v45  ;;  %v4574_v58 = vunpack.i.l.bf16 %v4573_v45 }
 0x1ac   :  { %v2386_v25 = vsel %vm2375_vm13, %v2321_v41, %v4504_v15  ;;  %v2387_v12 = vsel %vm2375_vm13, %v2322_v52, %v4505_v50  ;;  %v4514_v52 = vunpack.i.l.bf16 %v5871_v55 }
 0x1ad   :  { %2793 = vmatmul.bf16.gmra.mxu0 %v2513_v22  ;;  %v2451_v36 = vsel %vm2440_vm0, %v2386_v25, %v4509_v57  ;;  %v2452_v5 = vsel %vm2440_vm0, %v2387_v12, %v4510_v26  ;;  %v2332_v45 = vsel %vm2310_vm8, %v5446_v9, %v4575_v3  ;;  %v2331_v62 = vsel %vm2310_vm8, %v5436_v19, %v4574_v58  ;;  %v7634_v3 = vld [vmem:[#allocation10_spill] sm:$0xff] }
 0x1ae   :  { %3191 = vmatmul.bf16.gmra.mxu2 %v2513_v22  ;;  %v4563_v20 = vpop.permute.xlu1 %4562  ;;  %v4590_v9 = vunpack.i.h.bf16 %v4588_v7  ;;  %v4599_v25 = vunpack.i.l.bf16 %v5977_v35  ;;  %v4519_v26 = vunpack.i.l.bf16 %v5924_v8 }
 0x1af   :  { %v4565_v51 = vunpack.i.h.bf16 %v4563_v20  ;;  %v4564_v10 = vunpack.i.l.bf16 %v4563_v20 }
 0x1b0   :  { %v6003_v22 = vpop.permute.xlu2 %4612  ;;  %v2334_v41 = vsel %vm2310_vm8, %v5478_v16, %v4590_v9  ;;  %v7635_v16 = vld [vmem:[#allocation6_spill] sm:$0xff] }
 0x1b1   :  { %v2394_v29 = vsel %vm2375_vm13, %v2329_v33, %v4564_v10  ;;  %v2395_v24 = vsel %vm2375_vm13, %v2330_v42, %v4565_v51  ;;  %v4585_v33 = vunpack.i.h.bf16 %v5947_v34  ;;  %v4584_v51 = vunpack.i.l.bf16 %v5947_v34 }
 0x1b2   :  { %v2459_v44 = vsel %vm2440_vm0, %v2394_v29, %v4569_v53  ;;  %v2460_v37 = vsel %vm2440_vm0, %v2395_v24, %v4570_v28  ;;  %v4603_v18 = vpop.permute.xlu0 %4602  ;;  %v2515_v53 = vpack.c.bf16 %v2452_v5, %v2451_v36  ;;  %v4589_v24 = vunpack.i.l.bf16 %v4588_v7  ;;  %v7636_v5 = vld [vmem:[#allocation7_spill] sm:$0xff] }
 0x1b3   :  { %v5997_v30 = vpack.c.bf16 %v2460_v37, %v2459_v44  ;;  %v4515_v44 = vunpack.i.h.bf16 %v5871_v55  ;;  %v4520_v7 = vunpack.i.h.bf16 %v5924_v8  ;;  %v4600_v55 = vunpack.i.h.bf16 %v5977_v35 }
 0x1b4   :  { %v2333_v58 = vsel %vm2310_vm8, %v7634_v3, %v4589_v24  ;;  %v4525_v35 = vunpack.i.h.bf16 %v5864_v46  ;;  %v6054_v3 = vperm.slane %v5682_v31, 3 }
 0x1b5   :  { %v2324_v36 = vsel %vm2310_vm8, %v7635_v16, %v4515_v44 }
 0x1b6   :  { %v4578_v20 = vpop.permute.xlu1 %4577  ;;  %398 = vperm.xlu0 %4682, %v6054_v3  }
 0x1b7   :  { %v4580_v42 = vunpack.i.h.bf16 %v4578_v20  ;;  %v4579_v61 = vunpack.i.l.bf16 %v4578_v20 }
 0x1b8   :  { %v4628_v12 = vpop.permute.xlu2 %4627 }
 0x1b9   :  { %v2396_v10 = vsel %vm2375_vm13, %v2331_v62, %v4579_v61  ;;  %v2397_v50 = vsel %vm2375_vm13, %v2332_v45, %v4580_v42  ;;  %v2323_v45 = vsel %vm2310_vm8, %v7636_v5, %v4514_v52  ;;  %v4605_v62 = vunpack.i.h.bf16 %v4603_v18 }
 0x1ba   :  { %v2461_v15 = vsel %vm2440_vm0, %v2396_v10, %v4584_v51  ;;  %v2462_v28 = vsel %vm2440_vm0, %v2397_v50, %v4585_v33  ;;  %v4604_v33 = vunpack.i.l.bf16 %v4603_v18  ;;  %v2388_v8 = vsel %vm2375_vm13, %v2323_v45, %v4519_v26 }
 0x1bb   :  { %v6017_v29 = vpack.c.bf16 %v2462_v28, %v2461_v15  ;;  %v2389_v10 = vsel %vm2375_vm13, %v2324_v36, %v4520_v7  ;;  %v4524_v15 = vunpack.i.l.bf16 %v5864_v46  ;;  %v2336_v24 = vsel %vm2310_vm8, %v5516_v60, %v4605_v62 }
 0x1bc   :  { %v2335_v18 = vsel %vm2310_vm8, %v5536_v40, %v4604_v33  ;;  %v2454_v44 = vsel %vm2440_vm0, %v2389_v10, %v4525_v35  ;;  %v4534_v5 = vunpack.i.l.bf16 %v5938_v43  ;;  %v4629_v45 = vunpack.i.l.bf16 %v4628_v12  ;;  %v7637_v10 = vld [vmem:[#allocation8_spill] sm:$0xff]  ;;  %v7638_v35 = vld [vmem:[#allocation9_spill] sm:$0xff] }
 0x1bd   :  { %2798 = vmatmul.bf16.gmra.mxu0 %v2515_v53  ;;  %v4630_v33 = vunpack.i.h.bf16 %v4628_v12  ;;  %v4540_v12 = vunpack.i.h.bf16 %v5889_v4 }
 0x1be   :  { %3196 = vmatmul.bf16.gmra.mxu2 %v2515_v53  ;;  %v4593_v19 = vpop.permute.xlu1 %4592  ;;  %4702 = vset.pattern.permute.xlu0 %v5058_v6 }
 0x1bf   :  { %v4595_v34 = vunpack.i.h.bf16 %v4593_v19  ;;  %v4594_v37 = vunpack.i.l.bf16 %v4593_v19  ;;  %v2453_v19 = vsel %vm2440_vm0, %v2388_v8, %v4524_v15 }
 0x1c0   :  { %v4618_v57 = vpop.permute.xlu0 %4617 }
 0x1c1   :  { %v2398_v20 = vsel %vm2375_vm13, %v2333_v58, %v4594_v37  ;;  %v2399_v42 = vsel %vm2375_vm13, %v2334_v41, %v4595_v34  ;;  %v4615_v34 = vunpack.i.h.bf16 %v6003_v22  ;;  %v4614_v37 = vunpack.i.l.bf16 %v6003_v22  ;;  %v354_v41 = vpop.permute.xlu2 %353 }
 0x1c2   :  { %v2463_v61 = vsel %vm2440_vm0, %v2398_v20, %v4599_v25  ;;  %v2464_v51 = vsel %vm2440_vm0, %v2399_v42, %v4600_v55  ;;  %v2517_v58 = vpack.c.bf16 %v2454_v44, %v2453_v19  ;;  %v4620_v7 = vunpack.i.h.bf16 %v4618_v57 }
 0x1c3   :  { %v6039_v50 = vpack.c.bf16 %v2464_v51, %v2463_v61  ;;  %v4619_v26 = vunpack.i.l.bf16 %v4618_v57  ;;  %v4530_v20 = vunpack.i.h.bf16 %v5897_v14  ;;  %v4529_v55 = vunpack.i.l.bf16 %v5897_v14 }
 0x1c4   :  { %v4535_v61 = vunpack.i.h.bf16 %v5938_v43  ;;  %v2338_v57 = vsel %vm2310_vm8, %v5626_v48, %v4620_v7  ;;  %vm850_vm4 = vcmp.eq.s32.totalorder %v354_v41, %v5113_v32 }
 0x1c5   :  { %v2337_v62 = vsel %vm2310_vm8, %v5619_v39, %v4619_v26  ;;  %v2326_v43 = vsel %vm2310_vm8, %v7637_v10, %v4530_v20  ;;  %v2325_v48 = vsel %vm2310_vm8, %v7638_v35, %v4529_v55  ;;  %v6079_v39 = vpop.f32.mrf.mxu1  ;;  %v4210_v19 = vsel %vm850_vm4, 1.0, %v7627_v27 }
 0x1c6   :  { %v4608_v28 = vpop.permute.xlu1 %4607  ;;  %vm4001_vm4 = vcmask 1041409  }
 0x1c7   :  { %v4610_v53 = vunpack.i.h.bf16 %v4608_v28  ;;  %v4609_v9 = vunpack.i.l.bf16 %v4608_v28 }
 0x1c9   :  { %v2400_v52 = vsel %vm2375_vm13, %v2335_v18, %v4609_v9  ;;  %v2401_v46 = vsel %vm2375_vm13, %v2336_v24, %v4610_v53  ;;  %v342_v60 = vpop.permute.xlu0 %341  ;;  %v6082_v28 = vpop.permute.xlu2 %4637  ;;  %v2390_v53 = vsel %vm2375_vm13, %v2325_v48, %v4534_v5  ;;  %v2391_v9 = vsel %vm2375_vm13, %v2326_v43, %v4535_v61 }
 0x1ca   :  { %v2465_v40 = vsel %vm2440_vm0, %v2400_v52, %v4614_v37  ;;  %v2466_v25 = vsel %vm2440_vm0, %v2401_v46, %v4615_v34  ;;  %vm674_vm5 = vcmp.eq.s32.totalorder %v342_v60, %v5113_v32  ;;  %v6087_v24 = vpop.f32.mrf.mxu3  ;;  %v4539_v18 = vunpack.i.l.bf16 %v5889_v4 }
 0x1cb   :  { %v6059_v22 = vpack.c.bf16 %v2466_v25, %v2465_v40  ;;  %v6092_v44 = vsel %vm674_vm5, 1.0, %v7627_v27  ;;  %v2456_v41 = vsel %vm2440_vm0, %v2391_v9, %v4540_v12  ;;  %v1463_v60 = vrot.slane %v4210_v19, 2 }
 0x1cc   :  { %v2455_v46 = vsel %vm2440_vm0, %v2390_v53, %v4539_v18  ;;  %v1460_v40 = vrot.slane %v6092_v44, 2  ;;  %v2166_v25 = vrot.slane %v6092_v44, 4  ;;  %v1107_v55 = vrot.slane %v6092_v44, 1 }
 0x1cd   :  { %2803 = vmatmul.bf16.gmra.mxu0 %v2517_v58  ;;  %v2519_v61 = vpack.c.bf16 %v2456_v41, %v2455_v46  ;;  %v6114_v10 = vpop.f32.mrf.mxu1  ;;  %v1813_v53 = vrot.slane %v6092_v44, 3  ;;  %v4639_v46 = vunpack.i.l.bf16 %v6082_v28 }
 0x1ce   :  { %3201 = vmatmul.bf16.gmra.mxu2 %v2517_v58  ;;  %v4623_v42 = vpop.permute.xlu1 %4622  ;;  %v2169_v58 = vrot.slane %v4210_v19, 4 }
 0x1cf   :  { %v4625_v16 = vunpack.i.h.bf16 %v4623_v42  ;;  %v4624_v36 = vunpack.i.l.bf16 %v4623_v42  ;;  %v1110_v42 = vrot.slane %v4210_v19, 1 }
 0x1d1   :  { %v2402_v51 = vsel %vm2375_vm13, %v2337_v62, %v4624_v36  ;;  %v2403_v8 = vsel %vm2375_vm13, %v2338_v57, %v4625_v16  ;;  %v4643_v34 = vpop.permute.xlu0 %4642  ;;  %v367_v43 = vpop.permute.xlu2 %366 }
 0x1d2   :  { %v2467_v14 = vsel %vm2440_vm0, %v2402_v51, %v4629_v45  ;;  %v2468_v15 = vsel %vm2440_vm0, %v2403_v8, %v4630_v33  ;;  %v6118_v48 = vpop.f32.mrf.mxu3  ;;  %vm677_vm10 = vcmp.eq.s32.totalorder %v367_v43, %v5113_v32  ;;  %v4644_v41 = vunpack.i.l.bf16 %v4643_v34 }
 0x1d3   :  { %v6094_v37 = vpack.c.bf16 %v2468_v15, %v2467_v14  ;;  %v1816_v15 = vrot.slane %v4210_v19, 3  ;;  %v4645_v19 = vunpack.i.h.bf16 %v4643_v34 }
 0x1d6   :  { %v348_v52 = vpop.permute.xlu1 %347 }
 0x1d7   :  { %vm675_vm9 = vcmp.eq.s32.totalorder %v348_v52, %v5113_v32  ;;  %v4640_v52 = vunpack.i.h.bf16 %v6082_v28 }
 0x1d8   :  { %v6101_v4 = vsel %vm675_vm9, 1.0, %v7627_v27 }
 0x1d9   :  { %v1108_v7 = vrot.slane %v6101_v4, 1  ;;  %v1461_v26 = vrot.slane %v6101_v4, 2  ;;  %v2167_v20 = vrot.slane %v6101_v4, 4  ;;  %v1814_v35 = vrot.slane %v6101_v4, 3 }
 0x1da   :  { %v373_v14 = vpop.permute.xlu0 %372 }
 0x1db   :  { %v2168_v16 = vsel %vm2085_vm6, %v2166_v25, %v2167_v20  ;;  %v2170_v36 = vsel %vm2085_vm6, %v2167_v20, %v2169_v58  ;;  %v1462_v5 = vsel %vm1379_vm14, %v1460_v40, %v1461_v26  ;;  %v1464_v45 = vsel %vm1379_vm14, %v1461_v26, %v1463_v60 }
 0x1dc   :  { %v2538_v57 = vpack.c.bf16 %v2170_v36, %v2168_v16  ;;  %v4672_v62 = vpack.i.bf16 %v1464_v45, %v1462_v5  ;;  %v1109_v33 = vsel %vm1026_vm7, %v1107_v55, %v1108_v7  ;;  %v1111_v51 = vsel %vm1026_vm7, %v1108_v7, %v1110_v42 }
 0x1dd   :  { %2808 = vmatmul.bf16.gmra.mxu0 %v2519_v61  ;;  %v4667_v8 = vpack.i.bf16 %v1111_v51, %v1109_v33  ;;  %vm851_vm11 = vcmp.eq.s32.totalorder %v373_v14, %v5113_v32  ;;  %v6129_v60 = vsel %vm677_vm10, 1.0, %v7627_v27  ;;  %v1815_v25 = vsel %vm1732_vm15, %v1813_v53, %v1814_v35  ;;  %v4656_v14 = vpop.permute.xlu2 %4655 }
 0x1de   :  { %3206 = vmatmul.bf16.gmra.mxu2 %v2519_v61  ;;  %4282 = vmatmul.msk.bf16.gmra.mxu1 %vm2310_vm8, %v2538_v57  ;;  %v1817_v7 = vsel %vm1732_vm15, %v1814_v35, %v1816_v15  ;;  %v6138_v26 = vsel %vm851_vm11, 1.0, %v7627_v27  ;;  %v1466_v15 = vrot.slane %v6129_v60, 2 }
 0x1df   :  { %v4633_v12 = vpop.permute.xlu1 %4632  ;;  %4354 = vmatmul.msk.bf16.gmra.mxu3 %vm2310_vm8, %v2538_v57  ;;  %4673 = vrot.lane.b32.xlu1 %v4672_v62, %s5002_s14  ;;  %v4677_v61 = vpack.i.bf16 %v1817_v7, %v1815_v25  ;;  %v1115_v16 = vrot.slane %v6138_v26, 1  ;;  %v1821_v36 = vrot.slane %v6138_v26, 3 }
 0x1e0   :  { %v4635_v9 = vunpack.i.h.bf16 %v4633_v12  ;;  %v4634_v18 = vunpack.i.l.bf16 %v4633_v12  ;;  %4668 = vrot.lane.b32.xlu2 %v4667_v8, %s5001_s13 }
 0x1e2   :  { %v2340_v58 = vsel %vm2310_vm8, %v5702_v38, %v4635_v9  ;;  %v2339_v40 = vsel %vm2310_vm8, %v5707_v56, %v4634_v18  ;;  %v1113_v38 = vrot.slane %v6129_v60, 1  ;;  %v1819_v56 = vrot.slane %v6129_v60, 3 }
 0x1e3   :  { %v2404_v28 = vsel %vm2375_vm13, %v2339_v40, %v4639_v46  ;;  %v2405_v34 = vsel %vm2375_vm13, %v2340_v58, %v4640_v52  ;;  %v1468_v18 = vrot.slane %v6138_v26, 2  ;;  %v6167_v52 = vpop.f32.mrf.mxu1  ;;  %v7639_v58 = vld [vmem:[#allocation11_spill] sm:$0xff] }
 0x1e4   :  { %v2469_v20 = vsel %vm2440_vm0, %v2404_v28, %v4644_v41  ;;  %v2470_v42 = vsel %vm2440_vm0, %v2405_v34, %v4645_v19  ;;  %v1822_v51 = vsel %vm1732_vm15, %v1819_v56, %v1821_v36  ;;  %v1116_v8 = vsel %vm1026_vm7, %v1113_v38, %v1115_v16  ;;  %v6171_v19 = vpop.f32.mrf.mxu3 }
 0x1e5   :  { %v6145_v55 = vpack.c.bf16 %v2470_v42, %v2469_v20  ;;  %v2172_v41 = vrot.slane %v6129_v60, 4  ;;  %v4657_v28 = vunpack.i.l.bf16 %v4656_v14  ;;  %v6178_v20 = vperm.slane %v5682_v31, 4 }
 0x1e6   :  { %v1469_v36 = vsel %vm1379_vm14, %v1466_v15, %v1468_v18 }
 0x1e7   :  { %v361_v5 = vpop.permute.xlu1 %360  ;;  %404 = vperm.xlu1 %4683, %v6054_v3  }
 0x1e8   :  { %vm676_vm12 = vcmp.eq.s32.totalorder %v361_v5, %v5113_v32  ;;  %4678 = vrot.lane.b32.xlu2 %v4677_v61, %s5003_s15  ;;  %v2174_v5 = vrot.slane %v6138_v26, 4 }
 0x1e9   :  { %v6154_v45 = vsel %vm676_vm12, 1.0, %v7627_v27 }
 0x1ea   :  { %v1112_v57 = vrot.slane %v6154_v45, 1  ;;  %v1818_v62 = vrot.slane %v6154_v45, 3  ;;  %v2774_v33 = vpop.f32.mrf.mxu0  ;;  %v1465_v12 = vrot.slane %v6154_v45, 2 }
 0x1eb   :  { %v2944_v40 = vadd.f32 %v7639_v58, %v2774_v33  ;;  %v7640_v33 = vld [vmem:[#allocation12_spill] sm:$0xff]  ;;  %v6205_v18 = vpop.f32.mrf.mxu1 }
 0x1ec   :  { %v1820_v43 = vsel %vm1732_vm15, %v1818_v62, %v1819_v56  ;;  %v1114_v35 = vsel %vm1026_vm7, %v1112_v57, %v1113_v38  ;;  %v1467_v42 = vsel %vm1379_vm14, %v1465_v12, %v1466_v15  ;;  %v380_v57 = vpop.permute.xlu2 %379 }
 0x1ed   :  { %2813 = vmatmul.bf16.gmra.mxu0 %v5975_v54  ;;  %v4695_v53 = vpack.i.bf16 %v1822_v51, %v1820_v43  ;;  %v4685_v9 = vpack.i.bf16 %v1116_v8, %v1114_v35  ;;  %v4690_v8 = vpack.i.bf16 %v1469_v36, %v1467_v42  ;;  %vm678_vm1 = vcmp.eq.s32.totalorder %v380_v57, %v5113_v32 }
 0x1ee   :  { %3211 = vmatmul.bf16.gmra.mxu2 %v5975_v54  ;;  %v4658_v54 = vunpack.i.h.bf16 %v4656_v14  ;;  %v2175_v35 = vsel %vm2085_vm6, %v2172_v41, %v2174_v5 }
 0x1ef   :  { %v4651_v46 = vpop.permute.xlu1 %4650  ;;  %4700 = vset.pattern.permute.xlu1 %v5046_v1  ;;  %4696 = vrot.lane.b32.xlu0 %v4695_v53, %s5003_s15 }
 0x1f0   :  { %v4653_v25 = vunpack.i.h.bf16 %v4651_v46  ;;  %v4652_v7 = vunpack.i.l.bf16 %v4651_v46  ;;  %4686 = vrot.lane.b32.xlu1 %v4685_v9, %s5001_s13  ;;  %410 = vperm.xlu2 %4684, %v6054_v3   ;;  %v2171_v3 = vrot.slane %v6154_v45, 4  ;;  %v6208_v46 = vpop.f32.mrf.mxu3 }
 0x1f1   :  { %v3172_v34 = vpop.f32.mrf.mxu2 }
 0x1f2   :  { %v2342_v38 = vsel %vm2310_vm8, %v5807_v17, %v4653_v25  ;;  %v2341_v56 = vsel %vm2310_vm8, %v5810_v23, %v4652_v7  ;;  %v3173_v61 = vadd.f32 %v3172_v34, %v2944_v40  ;;  %v2776_v16 = vpop.f32.mrf.mxu0  ;;  %v6194_v17 = vld [vmem:[%s7602_s3] ss:$0 sm:$0xff]  ;;  %v386_v23 = vpop.permute.xlu0 %385  ;;  %v2173_v26 = vsel %vm2085_vm6, %v2171_v3, %v2172_v41 }
 0x1f3   :  { %v2406_v31 = vsel %vm2375_vm13, %v2341_v56, %v4657_v28  ;;  %v2407_v62 = vsel %vm2375_vm13, %v2342_v38, %v4658_v54  ;;  %v2946_v14 = vadd.f32 %v5773_v59, %v2776_v16  ;;  %vm679_vm2 = vcmp.eq.s32.totalorder %v386_v23, %v5113_v32  ;;  %v6230_v38 = vld [vmem:[%s7603_s4] sm:$0xff] }
 0x1f4   :  { %v3342_v51 = vadd.f32 %v7640_v33, %v3173_v61  ;;  %v2540_v9 = vpack.c.bf16 %v2175_v35, %v2173_v26  ;;  %v6213_v41 = vsel %vm678_vm1, 1.0, %v7627_v27  ;;  %v6218_v25 = vsel %vm679_vm2, 1.0, %v7627_v27 }
 0x1f5   :  { %v1117_v56 = vrot.slane %v6213_v41, 1  ;;  %v1118_v61 = vrot.slane %v6218_v25, 1  ;;  %v1823_v26 = vrot.slane %v6213_v41, 3 }
 0x1f6   :  { %v3505_v15 = vadd.f32 %v6194_v17, %v3342_v51  ;;  %4283 = vmatmul.msk.bf16.gmra.mxu1 %vm2310_vm8, %v2540_v9  ;;  %4355 = vmatmul.msk.bf16.gmra.mxu3 %vm2310_vm8, %v2540_v9 }
 0x1f7   :  { %v4661_v43 = vpop.permute.xlu1 %4660  ;;  %429 = vperm.xlu0 %4702, %v6178_v20   ;;  %v1119_v33 = vsel %vm1026_vm7, %v1117_v56, %v1118_v61  ;;  %v6269_v56 = vpop.f32.mrf.mxu1 }
 0x1f8   :  { %v4663_v12 = vunpack.i.h.bf16 %v4661_v43  ;;  %v4662_v53 = vunpack.i.l.bf16 %v4661_v43  ;;  %417 = vperm.xlu1 %4700, %v6178_v20   ;;  %4701 = vset.pattern.permute.xlu2 %v5051_v2  ;;  %v3569_v28 = vmax.f32 %v3505_v15, 0.0  ;;  %v6258_v15 = vld [vmem:[%s7599_s0 + $0x10] sm:$0xff] }
 0x1f9   :  { %v3174_v59 = vpop.f32.mrf.mxu2  ;;  %4691 = vrot.lane.b32.xlu2 %v4690_v8, %s5002_s14 }
 0x1fa   :  { %v3175_v58 = vadd.f32 %v3174_v59, %v2946_v14  ;;  %v2779_v40 = vpop.f32.mrf.mxu0  ;;  %v2471_v7 = vsel %vm2440_vm0, %v2406_v31, %v4662_v53  ;;  %v2472_v54 = vsel %vm2440_vm0, %v2407_v62, %v4663_v12  ;;  %v3641_v3 = vmul.f32 %v6230_v38, %v3569_v28 }
 0x1fb   :  { %v6225_v42 = vpack.c.bf16 %v2472_v54, %v2471_v7  ;;  %v2949_v57 = vadd.f32 %v5817_v13, %v2779_v40  ;;  %v1470_v31 = vrot.slane %v6213_v41, 2  ;;  %v1471_v14 = vrot.slane %v6218_v25, 2  ;;  %v7642_v40 = vld [vmem:[#allocation13_spill] sm:$0xff] }
 0x1fc   :  { %v3344_v34 = vadd.f32 %v5779_v21, %v3175_v58  ;;  %v6240_v21 = vld [vmem:[%s7603_s4 + $0x8] sm:$0xff]  ;;  %v1824_v13 = vrot.slane %v6218_v25, 3  ;;  %v431_v12 = vperm.slane %v6258_v15, 5 }
 0x1fd   :  { %2818 = vmatmul.bf16.gmra.mxu0 %v5997_v30  ;;  %7641 = vst [vmem:[#allocation10_spill] sm:$0xff] %v6240_v21  ;;  %v1472_v28 = vsel %vm1379_vm14, %v1470_v31, %v1471_v14 }
 0x1fe   :  { %v3506_v16 = vadd.f32 %v6194_v17, %v3344_v34  ;;  %3216 = vmatmul.bf16.gmra.mxu2 %v5997_v30 }
 0x1ff   :  { %v392_v36 = vpop.permute.xlu1 %391  ;;  %4719 = vset.pattern.permute.xlu0 %v5051_v2 }
 0x200   :  { %v3570_v5 = vmax.f32 %v3506_v16, 0.0  ;;  %vm852_vm3 = vcmp.eq.s32.totalorder %v392_v36, %v5113_v32  ;;  %4720 = vset.pattern.permute.xlu1 %v5058_v6  ;;  %v6272_v36 = vpop.f32.mrf.mxu3 }
 0x201   :  { %v4212_v30 = vsel %vm852_vm3, 1.0, %v7627_v27  ;;  %v3177_v62 = vpop.f32.mrf.mxu2  ;;  %423 = vperm.xlu2 %4701, %v6178_v20   ;;  %v3705_v20 = vsel %vm2310_vm8, %v3641_v3, -inf }
 0x202   :  { %v3642_v51 = vmul.f32 %v6240_v21, %v3570_v5  ;;  %v1120_v23 = vrot.slane %v4212_v30, 1  ;;  %v1473_v8 = vrot.slane %v4212_v30, 2  ;;  %v2781_v43 = vpop.f32.mrf.mxu0  ;;  %v3178_v35 = vadd.f32 %v3177_v62, %v2949_v57 }
 0x203   :  { %v1826_v9 = vrot.slane %v4212_v30, 3  ;;  %v1825_v5 = vsel %vm1732_vm15, %v1823_v26, %v1824_v13 }
 0x204   :  { %v3706_v53 = vsel %vm2310_vm8, %v3642_v51, -inf  ;;  %v1121_v59 = vsel %vm1026_vm7, %v1118_v61, %v1120_v23  ;;  %v3347_v7 = vadd.f32 %v7642_v40, %v3178_v35  ;;  %v1474_v34 = vsel %vm1379_vm14, %v1471_v14, %v1473_v8 }
 0x205   :  { %v6264_v58 = vmax.f32 %v3705_v20, %v3706_v53  ;;  %v4703_v54 = vpack.i.bf16 %v1121_v59, %v1119_v33  ;;  %v4708_v16 = vpack.i.bf16 %v1474_v34, %v1472_v28  ;;  %v2951_v61 = vadd.f32 %v5854_v49, %v2781_v43  ;;  %v7643_v20 = vld [vmem:[#allocation14_spill] sm:$0xff] }
 0x206   :  { %v3507_v3 = vadd.f32 %v6194_v17, %v3347_v7  ;;  %v1827_v57 = vsel %vm1732_vm15, %v1824_v13, %v1826_v9  ;;  %v2176_v51 = vrot.slane %v6213_v41, 4  ;;  %v2179_v23 = vrot.slane %v4212_v30, 4  ;;  %v6286_v43 = vld [vmem:[%s7603_s4 + $0x10] sm:$0xff]  ;;  %v6294_v30 = vld [vmem:[%s7603_s4 + $0x18] sm:$0xff] }
 0x207   :  { %4704 = vrot.lane.b32.xlu1 %v4703_v54, %s5001_s13  ;;  %442 = vperm.xlu0 %4719, %v431_v12   ;;  %v2177_v8 = vrot.slane %v6218_v25, 4  ;;  %v4713_v14 = vpack.i.bf16 %v1827_v57, %v1825_v5  ;;  %7644 = vst [vmem:[#allocation6_spill] sm:$0xff] %v6286_v43 }
 0x208   :  { %v3571_v35 = vmax.f32 %v3507_v3, 0.0  ;;  %7645 = vst [vmem:[#allocation7_spill] sm:$0xff] %v6294_v30  ;;  %v6304_v28 = vpop.f32.mrf.mxu3 }
 0x209   :  { %v3179_v62 = vpop.f32.mrf.mxu2  ;;  %4709 = vrot.lane.b32.xlu2 %v4708_v16, %s5002_s14  ;;  %v2178_v13 = vsel %vm2085_vm6, %v2176_v51, %v2177_v8  ;;  %v2180_v53 = vsel %vm2085_vm6, %v2177_v8, %v2179_v23 }
 0x20a   :  { %v3180_v31 = vadd.f32 %v3179_v62, %v2951_v61  ;;  %v2784_v33 = vpop.f32.mrf.mxu0  ;;  %4718 = vset.pattern.permute.xlu2 %v5046_v1  ;;  %v3643_v9 = vmul.f32 %v6286_v43, %v3571_v35  ;;  %v2542_v7 = vpack.c.bf16 %v2180_v53, %v2178_v13 }
 0x20b   :  { %v2954_v40 = vadd.f32 %v5887_v0, %v2784_v33 }
 0x20c   :  { %v3349_v49 = vadd.f32 %v7643_v20, %v3180_v31  ;;  %4356 = vmatmul.msk.bf16.gmra.mxu3 %vm2310_vm8, %v2542_v7  ;;  %v3777_v61 = vsel %vm2310_vm8, %v3643_v9, -inf  ;;  %v6321_v20 = vld [vmem:[%s7603_s4 + $0x20] sm:$0xff] }
 0x20d   :  { %2823 = vmatmul.bf16.gmra.mxu0 %v6017_v29 }
 0x20e   :  { %v3508_v26 = vadd.f32 %v6194_v17, %v3349_v49  ;;  %3221 = vmatmul.bf16.gmra.mxu2 %v6017_v29  ;;  %v6302_v29 = vpop.f32.mrf.mxu1  ;;  %4284 = vmatmul.msk.bf16.gmra.mxu1 %vm2310_vm8, %v2542_v7 }
 0x20f   :  { %4714 = vrot.lane.b32.xlu1 %v4713_v14, %s5003_s15  ;;  %4736 = vset.pattern.permute.xlu0 %v5046_v1  ;;  %v7646_v14 = vld [vmem:[#allocation15_spill] sm:$0xff] }
 0x210   :  { %v3572_v59 = vmax.f32 %v3508_v26, 0.0  ;;  %v7647_v26 = vld [vmem:[#allocation16_spill] sm:$0xff] }
 0x211   :  { %v3182_v54 = vpop.f32.mrf.mxu2 }
 0x212   :  { %v3644_v34 = vmul.f32 %v6294_v30, %v3572_v59  ;;  %v3183_v16 = vadd.f32 %v3182_v54, %v2954_v40  ;;  %v2786_v3 = vpop.f32.mrf.mxu0  ;;  %436 = vperm.xlu2 %4718, %v431_v12   ;;  %v7648_v54 = vld [vmem:[#allocation17_spill] sm:$0xff] }
 0x213   :  { %v2956_v31 = vadd.f32 %v5910_v47, %v2786_v3  ;;  %v6329_v47 = vld [vmem:[%s7603_s4 + $0x28] sm:$0xff] }
 0x214   :  { %v3778_v5 = vsel %vm2310_vm8, %v3644_v34, -inf  ;;  %v3352_v0 = vadd.f32 %v5894_v11, %v3183_v16 }
 0x215   :  { %v6312_v57 = vmax.f32 %v3777_v61, %v3778_v5 }
 0x216   :  { %v3509_v62 = vadd.f32 %v6194_v17, %v3352_v0 }
 0x217   :  { %448 = vperm.xlu1 %4720, %v431_v12  }
 0x218   :  { %v3573_v8 = vmax.f32 %v3509_v62, 0.0 }
 0x219   :  { %v3184_v33 = vpop.f32.mrf.mxu2 }
 0x21a   :  { %v3185_v51 = vadd.f32 %v3184_v33, %v2956_v31  ;;  %v2789_v23 = vpop.f32.mrf.mxu0  ;;  %4738 = vset.pattern.permute.xlu2 %v5058_v6  ;;  %v3645_v12 = vmul.f32 %v6321_v20, %v3573_v8  ;;  %v7649_v33 = vld [vmem:[#allocation18_spill] sm:$0xff] }
 0x21b   :  { %v2959_v13 = vadd.f32 %v7647_v26, %v2789_v23  ;;  %v6346_v23 = vld [vmem:[%s7603_s4 + $0x30] sm:$0xff] }
 0x21c   :  { %v3354_v35 = vadd.f32 %v7646_v14, %v3185_v51  ;;  %v3849_v7 = vsel %vm2310_vm8, %v3645_v12, -inf }
 0x21d   :  { %2828 = vmatmul.bf16.gmra.mxu0 %v6039_v50 }
 0x21e   :  { %v3510_v11 = vadd.f32 %v6194_v17, %v3354_v35  ;;  %3226 = vmatmul.bf16.gmra.mxu2 %v6039_v50 }
 0x21f   :  { %4737 = vset.pattern.permute.xlu1 %v5051_v2 }
 0x220   :  { %v3574_v49 = vmax.f32 %v3510_v11, 0.0 }
 0x221   :  { %v3187_v53 = vpop.f32.mrf.mxu2 }
 0x222   :  { %v3646_v9 = vmul.f32 %v6329_v47, %v3574_v49  ;;  %v3188_v59 = vadd.f32 %v3187_v53, %v2959_v13  ;;  %v2791_v40 = vpop.f32.mrf.mxu0 }
 0x223   :  { %v2961_v61 = vadd.f32 %v5955_v63, %v2791_v40  ;;  %v6354_v63 = vld [vmem:[%s7603_s4 + $0x38] sm:$0xff]  ;;  %v6364_v40 = vpop.f32.mrf.mxu1 }
 0x224   :  { %v3850_v50 = vsel %vm2310_vm8, %v3646_v9, -inf  ;;  %v3357_v34 = vadd.f32 %v7648_v54, %v3188_v59 }
 0x225   :  { %v6338_v16 = vmax.f32 %v3849_v7, %v3850_v50 }
 0x226   :  { %v3511_v3 = vadd.f32 %v6194_v17, %v3357_v34 }
 0x228   :  { %v3575_v31 = vmax.f32 %v3511_v3, 0.0 }
 0x229   :  { %v3189_v5 = vpop.f32.mrf.mxu2 }
 0x22a   :  { %v3190_v0 = vadd.f32 %v3189_v5, %v2961_v61  ;;  %v2794_v62 = vpop.f32.mrf.mxu0  ;;  %v3647_v14 = vmul.f32 %v6346_v23, %v3575_v31 }
 0x22b   :  { %v2964_v11 = vadd.f32 %v6079_v39, %v2794_v62  ;;  %v6368_v39 = vpop.f32.mrf.mxu3  ;;  %v6377_v31 = vpop.f32.mrf.mxu1 }
 0x22c   :  { %v3359_v51 = vadd.f32 %v7649_v33, %v3190_v0  ;;  %v3921_v53 = vsel %vm2310_vm8, %v3647_v14, -inf }
 0x22d   :  { %2833 = vmatmul.bf16.gmra.mxu0 %v6059_v22 }
 0x22e   :  { %v3512_v8 = vadd.f32 %v6194_v17, %v3359_v51  ;;  %3231 = vmatmul.bf16.gmra.mxu2 %v6059_v22 }
 0x230   :  { %v3576_v35 = vmax.f32 %v3512_v8, 0.0 }
 0x231   :  { %v3192_v12 = vpop.f32.mrf.mxu2 }
 0x232   :  { %v3648_v49 = vmul.f32 %v6354_v63, %v3576_v35  ;;  %v3193_v26 = vadd.f32 %v3192_v12, %v2964_v11  ;;  %v2796_v13 = vpop.f32.mrf.mxu0 }
 0x233   :  { %v2966_v50 = vadd.f32 %v6114_v10, %v2796_v13  ;;  %v6383_v12 = vpop.f32.mrf.mxu3 }
 0x234   :  { %v3922_v9 = vsel %vm2310_vm8, %v3648_v49, -inf  ;;  %v3362_v22 = vadd.f32 %v6087_v24, %v3193_v26  ;;  %v3708_v24 = vrot.slane %v6264_v58, 4 }
 0x235   :  { %v6362_v59 = vmax.f32 %v3921_v53, %v3922_v9 }
 0x236   :  { %v3513_v7 = vadd.f32 %v6194_v17, %v3362_v22  ;;  %v3709_v8 = vmax.f32 %v6264_v58, %v3708_v24 }
 0x238   :  { %v3577_v5 = vmax.f32 %v3513_v7, 0.0  ;;  %v3710_v53 = vrot.slane %v3709_v8, 2 }
 0x239   :  { %v3194_v54 = vpop.f32.mrf.mxu2 }
 0x23a   :  { %v6370_v34 = vpop.permute.xlu2 %4668  ;;  %v3195_v3 = vadd.f32 %v3194_v54, %v2966_v50  ;;  %v2799_v61 = vpop.f32.mrf.mxu0  ;;  %v3649_v10 = vmul.f32 %v6230_v38, %v3577_v5  ;;  %v3711_v50 = vmax.f32 %v3709_v8, %v3710_v53  ;;  %v6407_v53 = vperm.slane %v6258_v15, 6 }
 0x23b   :  { %v2969_v51 = vadd.f32 %v6167_v52, %v2799_v61  ;;  %v3780_v52 = vrot.slane %v6312_v57, 4  ;;  %v6393_v61 = vpop.f32.mrf.mxu1 }
 0x23c   :  { %v3364_v0 = vadd.f32 %v6118_v48, %v3195_v3  ;;  %v3714_v49 = vsel %vm2310_vm8, %v3649_v10, -inf  ;;  %455 = vperm.xlu0 %4736, %v6407_v53  }
 0x23d   :  { %2838 = vmatmul.bf16.gmra.mxu0 %v6094_v37  ;;  %v3781_v24 = vmax.f32 %v6312_v57, %v3780_v52 }
 0x23e   :  { %v3514_v62 = vadd.f32 %v6194_v17, %v3364_v0  ;;  %3236 = vmatmul.bf16.gmra.mxu2 %v6094_v37 }
 0x240   :  { %v3578_v33 = vmax.f32 %v3514_v62, 0.0 }
 0x241   :  { %v3197_v14 = vpop.f32.mrf.mxu2 }
 0x242   :  { %v3650_v48 = vmul.f32 %v6240_v21, %v3578_v33  ;;  %v3198_v35 = vadd.f32 %v3197_v14, %v2969_v51  ;;  %v2801_v11 = vpop.f32.mrf.mxu0  ;;  %v6387_v26 = vpop.permute.xlu2 %4678  ;;  %v3712_v14 = vrot.slane %v3711_v50, 1 }
 0x243   :  { %v2971_v7 = vadd.f32 %v6205_v18, %v2801_v11  ;;  %v6399_v18 = vpop.f32.mrf.mxu3 }
 0x244   :  { %v3715_v37 = vsel %vm2310_vm8, %v3650_v48, -inf  ;;  %v3367_v13 = vadd.f32 %v6171_v19, %v3198_v35  ;;  %v3852_v19 = vrot.slane %v6338_v16, 4  ;;  %v3782_v35 = vrot.slane %v3781_v24, 2  ;;  %4756 = vset.pattern.permute.xlu0 %v5058_v6 }
 0x245   :  { %v3716_v9 = vmax.f32 %v3714_v49, %v3715_v37 }
 0x246   :  { %v3515_v22 = vadd.f32 %v6194_v17, %v3367_v13  ;;  %v3853_v57 = vmax.f32 %v6338_v16, %v3852_v19  ;;  %v399_v13 = vpop.permute.xlu0 %398 }
 0x247   :  { %v3717_v58 = vrot.slane %v3716_v9, 4  ;;  %vm680_vm5 = vcmp.eq.s32.totalorder %v399_v13, %v5113_v32 }
 0x248   :  { %v3579_v10 = vmax.f32 %v3515_v22, 0.0 }
 0x249   :  { %v3718_v54 = vmax.f32 %v3716_v9, %v3717_v58  ;;  %v3199_v3 = vpop.f32.mrf.mxu2  ;;  %v3713_v9 = vmax.f32 %v3711_v50, %v3712_v14  ;;  %v4671_v50 = vunpack.i.h.bf16 %v6370_v34 }
 0x24a   :  { %v3200_v5 = vadd.f32 %v3199_v3, %v2971_v7  ;;  %v2804_v0 = vpop.f32.mrf.mxu0  ;;  %v411_v51 = vpop.permute.xlu2 %410  ;;  %v3651_v49 = vmul.f32 %v6286_v43, %v3579_v10  ;;  %v3854_v3 = vrot.slane %v3853_v57, 2  ;;  %v6427_v10 = vsel %vm680_vm5, 1.0, %v7627_v27 }
 0x24b   :  { %v3719_v62 = vrot.slane %v3718_v54, 2  ;;  %vm853_vm9 = vcmp.eq.s32.totalorder %v411_v51, %v5113_v32  ;;  %v2344_v51 = vsel %vm2310_vm8, %v6101_v4, %v4671_v50  ;;  %vm4003_vm5 = vcmask 1042434  }
 0x24c   :  { %v3369_v33 = vadd.f32 %v6208_v46, %v3200_v5  ;;  %v2974_v46 = vadd.f32 %v6269_v56, %v2804_v0  ;;  %v6419_v5 = vpop.f32.mrf.mxu1  ;;  %v3786_v0 = vsel %vm2310_vm8, %v3651_v49, -inf }
 0x24d   :  { %v3720_v48 = vmax.f32 %v3718_v54, %v3719_v62  ;;  %2843 = vmatmul.bf16.gmra.mxu0 %v6145_v55  ;;  %v6413_v54 = vmax.f32 %v3781_v24, %v3782_v35  ;;  %v6435_v35 = vpop.f32.mrf.mxu3 }
 0x24e   :  { %v3516_v8 = vadd.f32 %v6194_v17, %v3369_v33  ;;  %3241 = vmatmul.bf16.gmra.mxu2 %v6145_v55 }
 0x24f   :  { %v3721_v11 = vrot.slane %v3720_v48, 1 }
 0x250   :  { %v3580_v37 = vmax.f32 %v3516_v8, 0.0  ;;  %v6433_v8 = vsel %vm853_vm9, 1.0, %v7627_v27  ;;  %vm4005_vm9 = vcmask 1043459  }
 0x251   :  { %v3722_v52 = vmax.f32 %v3720_v48, %v3721_v11  ;;  %v6409_v58 = vpop.permute.xlu1 %4673  ;;  %v3202_v22 = vpop.f32.mrf.mxu2  ;;  %v6437_v11 = vmax.f32 %v3853_v57, %v3854_v3  ;;  %v1125_v57 = vrot.slane %v6433_v8, 1  ;;  %v2181_v3 = vrot.slane %v6427_v10, 4 }
 0x252   :  { %v3652_v55 = vmul.f32 %v6294_v30, %v3580_v37  ;;  %v3203_v7 = vadd.f32 %v3202_v22, %v2974_v46  ;;  %v2806_v16 = vpop.f32.mrf.mxu0  ;;  %v4676_v50 = vunpack.i.h.bf16 %v6409_v58 }
 0x253   :  { %v6417_v56 = vsel %vm4001_vm4, %v3722_v52, %v3713_v9  ;;  %v6429_v33 = vpop.permute.xlu2 %4691  ;;  %v2976_v49 = vadd.f32 %v6302_v29, %v2806_v16  ;;  %v1122_v9 = vrot.slane %v6427_v10, 1  ;;  %v1475_v52 = vrot.slane %v6427_v10, 2 }
 0x254   :  { %7650 = vst [vmem:[#allocation8_spill] sm:$0xff] %v6417_v56  ;;  %v3787_v19 = vsel %vm2310_vm8, %v3652_v55, -inf  ;;  %v3372_v24 = vadd.f32 %v6272_v36, %v3203_v7  ;;  %v4670_v36 = vunpack.i.l.bf16 %v6370_v34  ;;  %v1478_v55 = vrot.slane %v6433_v8, 2 }
 0x255   :  { %v3788_v62 = vmax.f32 %v3786_v0, %v3787_v19  ;;  %v2184_v16 = vrot.slane %v6433_v8, 4  ;;  %v4675_v0 = vunpack.i.l.bf16 %v6409_v58 }
 0x256   :  { %v3517_v46 = vadd.f32 %v6194_v17, %v3372_v24 }
 0x257   :  { %v3789_v48 = vrot.slane %v3788_v62, 4 }
 0x259   :  { %v3790_v37 = vmax.f32 %v3788_v62, %v3789_v48  ;;  %v405_v13 = vpop.permute.xlu1 %404  ;;  %v3204_v22 = vpop.f32.mrf.mxu2  ;;  %v3581_v48 = vmax.f32 %v3517_v46, 0.0 }
 0x25a   :  { %vm681_vm10 = vcmp.eq.s32.totalorder %v405_v13, %v5113_v32  ;;  %v3205_v4 = vadd.f32 %v3204_v22, %v2976_v49  ;;  %v2809_v7 = vpop.f32.mrf.mxu0  ;;  %v6462_v22 = vpop.f32.mrf.mxu1 }
 0x25b   :  { %v3791_v29 = vrot.slane %v3790_v37, 2  ;;  %v6451_v34 = vsel %vm681_vm10, 1.0, %v7627_v27  ;;  %v424_v21 = vpop.permute.xlu2 %423 }
 0x25c   :  { %v1123_v19 = vrot.slane %v6451_v34, 1  ;;  %v1476_v62 = vrot.slane %v6451_v34, 2  ;;  %v2182_v49 = vrot.slane %v6451_v34, 4  ;;  %v3374_v13 = vadd.f32 %v6304_v28, %v3205_v4 }
 0x25d   :  { %v3792_v24 = vmax.f32 %v3790_v37, %v3791_v29  ;;  %2848 = vmatmul.bf16.gmra.mxu0 %v6225_v42  ;;  %v2979_v4 = vadd.f32 %v6364_v40, %v2809_v7  ;;  %v1829_v40 = vrot.slane %v6451_v34, 3  ;;  %v2409_v7 = vsel %vm2375_vm13, %v2344_v51, %v4676_v50 }
 0x25e   :  { %3246 = vmatmul.bf16.gmra.mxu2 %v6225_v42  ;;  %v1477_v14 = vsel %vm1379_vm14, %v1475_v52, %v1476_v62  ;;  %v1479_v58 = vsel %vm1379_vm14, %v1476_v62, %v1478_v55  ;;  %v1124_v56 = vsel %vm1026_vm7, %v1122_v9, %v1123_v19  ;;  %v1126_v30 = vsel %vm1026_vm7, %v1123_v19, %v1125_v57 }
 0x25f   :  { %v3793_v37 = vrot.slane %v3792_v24, 1  ;;  %v3518_v46 = vadd.f32 %v6194_v17, %v3374_v13  ;;  %v2183_v29 = vsel %vm2085_vm6, %v2181_v3, %v2182_v49  ;;  %v2185_v28 = vsel %vm2085_vm6, %v2182_v49, %v2184_v16  ;;  %v6479_v3 = vpop.f32.mrf.mxu3 }
 0x260   :  { %v2544_v43 = vpack.c.bf16 %v2185_v28, %v2183_v29  ;;  %v4726_v6 = vpack.i.bf16 %v1479_v58, %v1477_v14  ;;  %v4721_v42 = vpack.i.bf16 %v1126_v30, %v1124_v56  ;;  %v2343_v52 = vsel %vm2310_vm8, %v6092_v44, %v4670_v36 }
 0x261   :  { %v3653_v9 = vmul.f32 %v6321_v20, %v3581_v48  ;;  %v1828_v57 = vrot.slane %v6427_v10, 3  ;;  %v3582_v55 = vmax.f32 %v3518_v46, 0.0  ;;  %v6477_v19 = vpop.permute.xlu0 %4696  ;;  %v3207_v62 = vpop.f32.mrf.mxu2  ;;  %v2408_v16 = vsel %vm2375_vm13, %v2343_v52, %v4675_v0 }
 0x262   :  { %v1831_v30 = vrot.slane %v6433_v8, 3  ;;  %v6484_v56 = vpop.permute.xlu1 %4686  ;;  %4285 = vmatmul.msk.bf16.gmra.mxu1 %vm2310_vm8, %v2544_v43  ;;  %4357 = vmatmul.msk.bf16.gmra.mxu3 %vm2310_vm8, %v2544_v43  ;;  %v3208_v44 = vadd.f32 %v3207_v62, %v2979_v4  ;;  %v4680_v14 = vunpack.i.l.bf16 %v6387_v26  ;;  %v3794_v36 = vmax.f32 %v3792_v24, %v3793_v37  ;;  %v2811_v0 = vpop.f32.mrf.mxu0 }
 0x263   :  { %v3654_v48 = vmul.f32 %v6329_v47, %v3582_v55  ;;  %4727 = vrot.lane.b32.xlu1 %v4726_v6, %s5002_s14  ;;  %4722 = vrot.lane.b32.xlu2 %v4721_v42, %s5001_s13  ;;  %v7651_v8 = vrot.slane %v6413_v54, 1  ;;  %v4681_v13 = vunpack.i.h.bf16 %v6387_v26  ;;  %vm683_vm11 = vcmp.eq.s32.totalorder %v424_v21, %v5113_v32  ;;  %v6512_v29 = vpop.f32.mrf.mxu1 }
 0x264   :  { %v3856_v43 = vrot.slane %v6437_v11, 1  ;;  %v3858_v24 = vsel %vm2310_vm8, %v3653_v9, -inf  ;;  %v2473_v50 = vsel %vm2440_vm0, %v2408_v16, %v4680_v14  ;;  %v1830_v58 = vsel %vm1732_vm15, %v1828_v57, %v1829_v40 }
 0x265   :  { %v3785_v49 = vmax.f32 %v6413_v54, %v7651_v8  ;;  %v3859_v51 = vsel %vm2310_vm8, %v3654_v48, -inf  ;;  %v1832_v37 = vsel %vm1732_vm15, %v1829_v40, %v1831_v30  ;;  %v2474_v46 = vsel %vm2440_vm0, %v2409_v7, %v4681_v13 }
 0x266   :  { %v3860_v6 = vmax.f32 %v3858_v24, %v3859_v51  ;;  %v3377_v54 = vadd.f32 %v6368_v39, %v3208_v44  ;;  %v6507_v26 = vsel %vm683_vm11, 1.0, %v7627_v27  ;;  %v3924_v28 = vrot.slane %v6362_v59, 4 }
 0x267   :  { %v6510_v21 = vsel %vm4001_vm4, %v3794_v36, %v3785_v49  ;;  %v6516_v42 = vmax.f32 %v6437_v11, %v3856_v43  ;;  %v2981_v52 = vadd.f32 %v6377_v31, %v2811_v0  ;;  %v4731_v9 = vpack.i.bf16 %v1832_v37, %v1830_v58  ;;  %v6529_v36 = vpop.f32.mrf.mxu3 }
 0x268   :  { %v3861_v4 = vrot.slane %v3860_v6, 4  ;;  %v2537_v39 = vpack.c.bf16 %v2474_v46, %v2473_v50  ;;  %v1128_v16 = vrot.slane %v6507_v26, 1  ;;  %v1834_v40 = vrot.slane %v6507_v26, 3 }
 0x269   :  { %v430_v57 = vpop.permute.xlu0 %429  ;;  %v3209_v55 = vpop.f32.mrf.mxu2  ;;  %v3519_v44 = vadd.f32 %v6194_v17, %v3377_v54  ;;  %v3925_v7 = vmax.f32 %v6362_v59, %v3924_v28  ;;  %v4694_v49 = vunpack.i.h.bf16 %v6429_v33  ;;  %v4693_v13 = vunpack.i.l.bf16 %v6429_v33 }
 0x26a   :  { %v3862_v62 = vmax.f32 %v3860_v6, %v3861_v4  ;;  %v418_v30 = vpop.permute.xlu1 %417  ;;  %vm854_vm12 = vcmp.eq.s32.totalorder %v430_v57, %v5113_v32  ;;  %v3210_v11 = vadd.f32 %v3209_v55, %v2981_v52  ;;  %v2814_v14 = vpop.f32.mrf.mxu0  ;;  %v4689_v50 = vunpack.i.h.bf16 %v6484_v56 }
 0x26b   :  { %vm682_vm1 = vcmp.eq.s32.totalorder %v418_v30, %v5113_v32  ;;  %461 = vperm.xlu1 %4737, %v6407_v53   ;;  %4732 = vrot.lane.b32.xlu2 %v4731_v9, %s5003_s15  ;;  %v6527_v31 = vsel %vm854_vm12, 1.0, %v7627_v27  ;;  %v4688_v59 = vunpack.i.l.bf16 %v6484_v56  ;;  %v3583_v58 = vmax.f32 %v3519_v44, 0.0 }
 0x26c   :  { %v3863_v48 = vrot.slane %v3862_v62, 2  ;;  %v6533_v0 = vsel %vm682_vm1, 1.0, %v7627_v27  ;;  %v1130_v8 = vrot.slane %v6527_v31, 1  ;;  %v1836_v6 = vrot.slane %v6527_v31, 3 }
 0x26d   :  { %v1127_v43 = vrot.slane %v6533_v0, 1  ;;  %v1833_v24 = vrot.slane %v6533_v0, 3  ;;  %2853 = vmatmul.bf16.gmra.mxu0 %v2537_v39  ;;  %v3379_v37 = vadd.f32 %v6383_v12, %v3210_v11  ;;  %v2984_v28 = vadd.f32 %v6393_v61, %v2814_v14 }
 0x26e   :  { %v3864_v51 = vmax.f32 %v3862_v62, %v3863_v48  ;;  %3251 = vmatmul.bf16.gmra.mxu2 %v2537_v39  ;;  %v1837_v4 = vsel %vm1732_vm15, %v1834_v40, %v1836_v6  ;;  %v1131_v52 = vsel %vm1026_vm7, %v1128_v16, %v1130_v8  ;;  %v1481_v9 = vrot.slane %v6507_v26, 2  ;;  %v6551_v62 = vpop.f32.mrf.mxu1 }
 0x26f   :  { %v1835_v46 = vsel %vm1732_vm15, %v1833_v24, %v1834_v40  ;;  %v1129_v33 = vsel %vm1026_vm7, %v1127_v43, %v1128_v16  ;;  %v3520_v56 = vadd.f32 %v6194_v17, %v3379_v37  ;;  %v2346_v30 = vsel %vm2310_vm8, %v6129_v60, %v4689_v50 }
 0x270   :  { %v3865_v54 = vrot.slane %v3864_v51, 1  ;;  %v4749_v57 = vpack.i.bf16 %v1837_v4, %v1835_v46  ;;  %v4739_v55 = vpack.i.bf16 %v1131_v52, %v1129_v33  ;;  %v2345_v61 = vsel %vm2310_vm8, %v6154_v45, %v4688_v59  ;;  %v6565_v45 = vpop.permute.xlu2 %4709 }
 0x271   :  { %v3212_v39 = vpop.f32.mrf.mxu2  ;;  %v3655_v40 = vmul.f32 %v6346_v23, %v3583_v58  ;;  %v1480_v16 = vrot.slane %v6533_v0, 2  ;;  %v1483_v11 = vrot.slane %v6527_v31, 2  ;;  %v3584_v14 = vmax.f32 %v3520_v56, 0.0  ;;  %v6576_v58 = vpop.f32.mrf.mxu3 }
 0x272   :  { %v3866_v12 = vmax.f32 %v3864_v51, %v3865_v54  ;;  %v3213_v44 = vadd.f32 %v3212_v39, %v2984_v28  ;;  %4750 = vrot.lane.b32.xlu0 %v4749_v57, %s5003_s15  ;;  %v2816_v48 = vpop.f32.mrf.mxu0  ;;  %v3926_v8 = vrot.slane %v3925_v7, 2  ;;  %v4699_v43 = vunpack.i.h.bf16 %v6477_v19 }
 0x273   :  { %4754 = vset.pattern.permute.xlu1 %v5046_v1  ;;  %v4698_v60 = vunpack.i.l.bf16 %v6477_v19  ;;  %467 = vperm.xlu2 %4738, %v6407_v53   ;;  %v3656_v51 = vmul.f32 %v6354_v63, %v3584_v14  ;;  %v2410_v59 = vsel %vm2375_vm13, %v2345_v61, %v4693_v13  ;;  %v2411_v6 = vsel %vm2375_vm13, %v2346_v30, %v4694_v49 }
 0x274   :  { %4740 = vrot.lane.b32.xlu1 %v4739_v55, %s5001_s13  ;;  %v6570_v24 = vsel %vm4001_vm4, %v3866_v12, %v6516_v42  ;;  %v3382_v50 = vadd.f32 %v6399_v18, %v3213_v44  ;;  %v6579_v19 = vperm.slane %v6258_v15, 7  ;;  %v3930_v37 = vsel %vm2310_vm8, %v3655_v40, -inf }
 0x275   :  { %v3931_v53 = vsel %vm2310_vm8, %v3656_v51, -inf  ;;  %v1482_v42 = vsel %vm1379_vm14, %v1480_v16, %v1481_v9  ;;  %v1484_v46 = vsel %vm1379_vm14, %v1481_v9, %v1483_v11  ;;  %v3927_v33 = vmax.f32 %v3925_v7, %v3926_v8 }
 0x276   :  { %v3932_v54 = vmax.f32 %v3930_v37, %v3931_v53  ;;  %v2475_v18 = vsel %vm2440_vm0, %v2410_v59, %v4698_v60  ;;  %v2476_v13 = vsel %vm2440_vm0, %v2411_v6, %v4699_v43  ;;  %v3521_v49 = vadd.f32 %v6194_v17, %v3382_v50  ;;  %v6590_v9 = vpop.f32.mrf.mxu1 }
 0x277   :  { %v2986_v28 = vadd.f32 %v6419_v5, %v2816_v48  ;;  %v4744_v56 = vpack.i.bf16 %v1484_v46, %v1482_v42  ;;  %v2539_v39 = vpack.c.bf16 %v2476_v13, %v2475_v18  ;;  %v3928_v7 = vrot.slane %v3927_v33, 1 }
 0x278   :  { %v3933_v52 = vrot.slane %v3932_v54, 4  ;;  %v437_v30 = vpop.permute.xlu2 %436  ;;  %v3585_v61 = vmax.f32 %v3521_v49, 0.0  ;;  %v2187_v44 = vrot.slane %v6507_v26, 4  ;;  %v2186_v40 = vrot.slane %v6533_v0, 4 }
 0x279   :  { %v4705_v15 = vpop.permute.xlu1 %4704  ;;  %v3214_v4 = vpop.f32.mrf.mxu2  ;;  %v2189_v16 = vrot.slane %v6527_v31, 4  ;;  %vm684_vm2 = vcmp.eq.s32.totalorder %v437_v30, %v5113_v32  ;;  %v4712_v50 = vunpack.i.h.bf16 %v6565_v45  ;;  %v4711_v37 = vunpack.i.l.bf16 %v6565_v45 }
 0x27a   :  { %486 = vperm.xlu0 %4756, %v6579_v19   ;;  %v3215_v57 = vadd.f32 %v3214_v4, %v2986_v28  ;;  %v2819_v55 = vpop.f32.mrf.mxu0  ;;  %v3934_v12 = vmax.f32 %v3932_v54, %v3933_v52  ;;  %v443_v14 = vpop.permute.xlu0 %442  ;;  %v4707_v48 = vunpack.i.h.bf16 %v4705_v15  ;;  %v4706_v8 = vunpack.i.l.bf16 %v4705_v15 }
 0x27b   :  { %4755 = vset.pattern.permute.xlu2 %v5051_v2  ;;  %v6601_v60 = vpop.f32.mrf.mxu3  ;;  %v2989_v59 = vadd.f32 %v6462_v22, %v2819_v55  ;;  %v3657_v31 = vmul.f32 %v6230_v38, %v3585_v61  ;;  %vm685_vm3 = vcmp.eq.s32.totalorder %v443_v14, %v5113_v32  ;;  %v6609_v18 = vsel %vm684_vm2, 1.0, %v7627_v27  ;;  %v7652_v22 = vld [vmem:[#allocation10_spill] sm:$0xff] }
 0x27c   :  { %474 = vperm.xlu1 %4754, %v6579_v19   ;;  %v3384_v5 = vadd.f32 %v6435_v35, %v3215_v57  ;;  %v3935_v11 = vrot.slane %v3934_v12, 2  ;;  %4745 = vrot.lane.b32.xlu2 %v4744_v56, %s5002_s14  ;;  %v3929_v35 = vmax.f32 %v3927_v33, %v3928_v7  ;;  %v2188_v33 = vsel %vm2085_vm6, %v2186_v40, %v2187_v44  ;;  %v7653_v57 = vld [vmem:[#allocation5_spill] sm:$0xff] }
 0x27d   :  { %2858 = vmatmul.bf16.gmra.mxu0 %v2539_v39  ;;  %v2348_v13 = vsel %vm2310_vm8, %v6218_v25, %v4707_v48  ;;  %v2347_v38 = vsel %vm2310_vm8, %v6213_v41, %v4706_v8  ;;  %v2190_v28 = vsel %vm2085_vm6, %v2187_v44, %v2189_v16  ;;  %v6620_v56 = vsel %vm685_vm3, 1.0, %v7627_v27 }
 0x27e   :  { %3256 = vmatmul.bf16.gmra.mxu2 %v2539_v39  ;;  %v3522_v43 = vadd.f32 %v6194_v17, %v3384_v5  ;;  %v3936_v51 = vmax.f32 %v3934_v12, %v3935_v11  ;;  %v3723_v25 = vsel %vm2310_vm8, %v3657_v31, -inf  ;;  %v2546_v39 = vpack.c.bf16 %v2190_v28, %v2188_v33  ;;  %v6626_v7 = vpop.f32.mrf.mxu1 }
 0x27f   :  { %v1132_v30 = vrot.slane %v6609_v18, 1  ;;  %v2412_v5 = vsel %vm2375_vm13, %v2347_v38, %v4711_v37  ;;  %v2413_v44 = vsel %vm2375_vm13, %v2348_v13, %v4712_v50  ;;  %v1133_v16 = vrot.slane %v6620_v56, 1 }
 0x280   :  { %v3586_v6 = vmax.f32 %v3522_v43, 0.0  ;;  %v3937_v46 = vrot.slane %v3936_v51, 1  ;;  %4286 = vmatmul.msk.bf16.gmra.mxu1 %vm2310_vm8, %v2546_v39  ;;  %4358 = vmatmul.msk.bf16.gmra.mxu3 %vm2310_vm8, %v2546_v39  ;;  %v1838_v13 = vrot.slane %v6609_v18, 3 }
 0x281   :  { %v4715_v53 = vpop.permute.xlu1 %4714  ;;  %v3217_v42 = vpop.f32.mrf.mxu2 }
 0x282   :  { %v3218_v54 = vadd.f32 %v3217_v42, %v2989_v59  ;;  %v3658_v49 = vmul.f32 %v7652_v22, %v3586_v6  ;;  %v2821_v45 = vpop.f32.mrf.mxu0  ;;  %4773 = vset.pattern.permute.xlu0 %v5051_v2  ;;  %v3938_v15 = vmax.f32 %v3936_v51, %v3937_v46  ;;  %v4717_v4 = vunpack.i.h.bf16 %v4715_v53 }
 0x283   :  { %v4716_v52 = vunpack.i.l.bf16 %v4715_v53  ;;  %v2991_v40 = vadd.f32 %v6512_v29, %v2821_v45  ;;  %v6651_v50 = vpop.f32.mrf.mxu3  ;;  %v1485_v59 = vrot.slane %v6609_v18, 2  ;;  %v1486_v6 = vrot.slane %v6620_v56, 2 }
 0x284   :  { %4774 = vset.pattern.permute.xlu1 %v7653_v57  ;;  %v3724_v55 = vsel %vm2310_vm8, %v3658_v49, -inf  ;;  %v3387_v41 = vadd.f32 %v6479_v3, %v3218_v54  ;;  %480 = vperm.xlu2 %4755, %v6579_v19   ;;  %v6631_v61 = vsel %vm4001_vm4, %v3938_v15, %v3929_v35  ;;  %v6642_v3 = vld [vmem:[%s7599_s0 + $0x18] sm:$0xff]  ;;  %v2478_v14 = vsel %vm2440_vm0, %v2413_v44, %v4717_v4  ;;  %v6666_v15 = vld [vmem:[%s7602_s3] ss:$0 sm:$0xff] }
 0x285   :  { %v3725_v12 = vmax.f32 %v3723_v25, %v3724_v55  ;;  %v2477_v11 = vsel %vm2440_vm0, %v2412_v5, %v4716_v52  ;;  %v6647_v48 = vperm.slane %v6642_v3, 0  ;;  %v1134_v54 = vsel %vm1026_vm7, %v1132_v30, %v1133_v16 }
 0x286   :  { %v3523_v29 = vadd.f32 %v6194_v17, %v3387_v41  ;;  %v2541_v53 = vpack.c.bf16 %v2478_v14, %v2477_v11  ;;  %v1839_v45 = vrot.slane %v6620_v56, 3  ;;  %v6669_v25 = vpop.f32.mrf.mxu1  ;;  %v1487_v41 = vsel %vm1379_vm14, %v1485_v59, %v1486_v6  ;;  %v7656_v59 = vld [vmem:[#allocation8_spill] sm:$0xff] }
 0x287   :  { %v3726_v19 = vrot.slane %v3725_v12, 4 }
 0x288   :  { %v3587_v33 = vmax.f32 %v3523_v29, 0.0  ;;  %v1840_v11 = vsel %vm1732_vm15, %v1838_v13, %v1839_v45  ;;  %v7655_v29 = vld [vmem:[#allocation7_spill] sm:$0xff] }
 0x289   :  { %v449_v8 = vpop.permute.xlu1 %448  ;;  %v3219_v43 = vpop.f32.mrf.mxu2  ;;  %v3727_v35 = vmax.f32 %v3725_v12, %v3726_v19  ;;  %v7654_v12 = vld [vmem:[#allocation6_spill] sm:$0xff] }
 0x28a   :  { %vm855_vm4 = vcmp.eq.s32.totalorder %v449_v8, %v5113_v32  ;;  %v3220_v51 = vadd.f32 %v3219_v43, %v2991_v40  ;;  %v2824_v37 = vpop.f32.mrf.mxu0  ;;  %499 = vperm.xlu0 %4773, %v6647_v48   ;;  %v3659_v30 = vmul.f32 %v7654_v12, %v3587_v33  ;;  %v2191_v43 = vrot.slane %v6609_v18, 4 }
 0x28b   :  { %v4215_v31 = vsel %vm855_vm4, 1.0, %v7627_v27  ;;  %v3728_v42 = vrot.slane %v3727_v35, 2  ;;  %v2994_v55 = vadd.f32 %v6551_v62, %v2824_v37  ;;  %v3398_v37 = vpop.f32.mrf.mxu3 }
 0x28c   :  { %v1135_v17 = vrot.slane %v4215_v31, 1  ;;  %v1488_v46 = vrot.slane %v4215_v31, 2  ;;  %v3389_v38 = vadd.f32 %v6529_v36, %v3220_v51  ;;  %v1841_v49 = vrot.slane %v4215_v31, 3  ;;  %4772 = vset.pattern.permute.xlu2 %v5046_v1 }
 0x28d   :  { %2863 = vmatmul.bf16.gmra.mxu0 %v2541_v53  ;;  %v3729_v22 = vmax.f32 %v3727_v35, %v3728_v42  ;;  %v2192_v35 = vrot.slane %v6620_v56, 4  ;;  %v2194_v42 = vrot.slane %v4215_v31, 4 }
 0x28e   :  { %3261 = vmatmul.bf16.gmra.mxu2 %v2541_v53  ;;  %v1136_v28 = vsel %vm1026_vm7, %v1133_v16, %v1135_v17  ;;  %v3524_v4 = vadd.f32 %v6666_v15, %v3389_v38  ;;  %v1489_v39 = vsel %vm1379_vm14, %v1486_v6, %v1488_v46  ;;  %v1842_v14 = vsel %vm1732_vm15, %v1839_v45, %v1841_v49  ;;  %v3003_v45 = vpop.f32.mrf.mxu1 }
 0x28f   :  { %v4757_v52 = vpack.i.bf16 %v1136_v28, %v1134_v54  ;;  %v3730_v36 = vrot.slane %v3729_v22, 1  ;;  %v4762_v40 = vpack.i.bf16 %v1489_v39, %v1487_v41  ;;  %v3795_v53 = vsel %vm2310_vm8, %v3659_v30, -inf }
 0x290   :  { %v3588_v5 = vmax.f32 %v3524_v4, 0.0  ;;  %v4767_v46 = vpack.i.bf16 %v1842_v14, %v1840_v11  ;;  %v2195_v49 = vsel %vm2085_vm6, %v2192_v35, %v2194_v42 }
 0x291   :  { %4758 = vrot.lane.b32.xlu1 %v4757_v52, %s5001_s13  ;;  %v3222_v44 = vpop.f32.mrf.mxu2  ;;  %v3731_v16 = vmax.f32 %v3729_v22, %v3730_v36  ;;  %4763 = vrot.lane.b32.xlu2 %v4762_v40, %s5002_s14  ;;  %v2193_v22 = vsel %vm2085_vm6, %v2191_v43, %v2192_v35 }
 0x292   :  { %v3223_v19 = vadd.f32 %v3222_v44, %v2994_v55  ;;  %v3660_v62 = vmul.f32 %v7655_v29, %v3588_v5  ;;  %v2826_v8 = vpop.f32.mrf.mxu0  ;;  %4790 = vset.pattern.permute.xlu0 %v5046_v1  ;;  %v2548_v31 = vpack.c.bf16 %v2195_v49, %v2193_v22 }
 0x293   :  { %v6686_v6 = vsel %vm4003_vm5, %v3731_v16, %v7656_v59  ;;  %v2996_v38 = vadd.f32 %v6590_v9, %v2826_v8  ;;  %v3401_v12 = vpop.f32.mrf.mxu3 }
 0x294   :  { %v3392_v51 = vadd.f32 %v6576_v58, %v3223_v19  ;;  %v3796_v17 = vsel %vm2310_vm8, %v3660_v62, -inf  ;;  %4287 = vmatmul.msk.bf16.gmra.mxu1 %vm2310_vm8, %v2548_v31  ;;  %4359 = vmatmul.msk.bf16.gmra.mxu3 %vm2310_vm8, %v2548_v31 }
 0x295   :  { %v3797_v54 = vmax.f32 %v3795_v53, %v3796_v17 }
 0x296   :  { %v3525_v13 = vadd.f32 %v6666_v15, %v3392_v51  ;;  %v3005_v29 = vpop.f32.mrf.mxu1 }
 0x297   :  { %v3798_v33 = vrot.slane %v3797_v54, 4 }
 0x298   :  { %v3589_v55 = vmax.f32 %v3525_v13, 0.0 }
 0x299   :  { %4768 = vrot.lane.b32.xlu1 %v4767_v46, %s5003_s15  ;;  %v3224_v58 = vpop.f32.mrf.mxu2  ;;  %v3799_v28 = vmax.f32 %v3797_v54, %v3798_v33  ;;  %493 = vperm.xlu2 %4772, %v6647_v48  }
 0x29a   :  { %v3225_v4 = vadd.f32 %v3224_v58, %v2996_v38  ;;  %v2829_v52 = vpop.f32.mrf.mxu0  ;;  %v3661_v5 = vmul.f32 %v6321_v20, %v3589_v55 }
 0x29b   :  { %v3800_v36 = vrot.slane %v3799_v28, 2  ;;  %v2999_v40 = vadd.f32 %v6626_v7, %v2829_v52  ;;  %v3403_v51 = vpop.f32.mrf.mxu3 }
 0x29c   :  { %v3394_v41 = vadd.f32 %v6601_v60, %v3225_v4  ;;  %v3867_v62 = vsel %vm2310_vm8, %v3661_v5, -inf }
 0x29d   :  { %v3801_v9 = vmax.f32 %v3799_v28, %v3800_v36 }
 0x29e   :  { %v3526_v39 = vadd.f32 %v6666_v15, %v3394_v41  ;;  %v3008_v13 = vpop.f32.mrf.mxu1 }
 0x29f   :  { %v3802_v30 = vrot.slane %v3801_v9, 1 }
 0x2a0   :  { %v3590_v44 = vmax.f32 %v3526_v39, 0.0 }
 0x2a1   :  { %505 = vperm.xlu1 %4774, %v6647_v48   ;;  %v3227_v16 = vpop.f32.mrf.mxu2  ;;  %v3803_v19 = vmax.f32 %v3801_v9, %v3802_v30  ;;  %4792 = vset.pattern.permute.xlu2 %v7653_v57 }
 0x2a2   :  { %v3662_v60 = vmul.f32 %v6329_v47, %v3590_v44  ;;  %v3228_v11 = vadd.f32 %v3227_v16, %v2999_v40  ;;  %v2831_v14 = vpop.f32.mrf.mxu0 }
 0x2a3   :  { %v6710_v7 = vsel %vm4003_vm5, %v3803_v19, %v6510_v21  ;;  %v3001_v47 = vadd.f32 %v6669_v25, %v2831_v14  ;;  %v3406_v52 = vpop.f32.mrf.mxu3 }
 0x2a4   :  { %v3868_v8 = vsel %vm2310_vm8, %v3662_v60, -inf  ;;  %v3397_v20 = vadd.f32 %v6651_v50, %v3228_v11 }
 0x2a5   :  { %v3869_v48 = vmax.f32 %v3867_v62, %v3868_v8 }
 0x2a6   :  { %v3527_v35 = vadd.f32 %v6666_v15, %v3397_v20  ;;  %v3010_v30 = vpop.f32.mrf.mxu1  ;;  %v6731_v20 = vld [vmem:[%s7603_s4] sm:$0xff] }
 0x2a7   :  { %v3870_v43 = vrot.slane %v3869_v48, 4 }
 0x2a8   :  { %v3591_v54 = vmax.f32 %v3527_v35, 0.0 }
 0x2a9   :  { %v3871_v59 = vmax.f32 %v3869_v48, %v3870_v43  ;;  %v3229_v53 = vpop.f32.mrf.mxu2  ;;  %4791 = vset.pattern.permute.xlu1 %v5051_v2 }
 0x2aa   :  { %v3230_v42 = vadd.f32 %v3229_v53, %v3001_v47  ;;  %v2834_v46 = vpop.f32.mrf.mxu0  ;;  %v3663_v58 = vmul.f32 %v6346_v23, %v3591_v54 }
 0x2ab   :  { %v3872_v17 = vrot.slane %v3871_v59, 2  ;;  %v3004_v49 = vadd.f32 %v3003_v45, %v2834_v46 }
 0x2ac   :  { %v3399_v50 = vadd.f32 %v3398_v37, %v3230_v42  ;;  %v3939_v37 = vsel %vm2310_vm8, %v3663_v58, -inf }
 0x2ad   :  { %v3873_v33 = vmax.f32 %v3871_v59, %v3872_v17 }
 0x2ae   :  { %v3528_v21 = vadd.f32 %v6666_v15, %v3399_v50  ;;  %v3013_v59 = vpop.f32.mrf.mxu1 }
 0x2af   :  { %v3874_v38 = vrot.slane %v3873_v33, 1 }
 0x2b0   :  { %v3592_v22 = vmax.f32 %v3528_v21, 0.0 }
 0x2b1   :  { %v3875_v25 = vmax.f32 %v3873_v33, %v3874_v38  ;;  %v3232_v28 = vpop.f32.mrf.mxu2 }
 0x2b2   :  { %v3664_v4 = vmul.f32 %v6354_v63, %v3592_v22  ;;  %v3233_v31 = vadd.f32 %v3232_v28, %v3004_v49  ;;  %v2836_v36 = vpop.f32.mrf.mxu0 }
 0x2b3   :  { %v6720_v55 = vsel %vm4003_vm5, %v3875_v25, %v6570_v24  ;;  %v3006_v5 = vadd.f32 %v3005_v29, %v2836_v36  ;;  %v3408_v24 = vpop.f32.mrf.mxu3 }
 0x2b4   :  { %v3940_v41 = vsel %vm2310_vm8, %v3664_v4, -inf  ;;  %v3402_v9 = vadd.f32 %v3401_v12, %v3233_v31 }
 0x2b5   :  { %v3941_v39 = vmax.f32 %v3939_v37, %v3940_v41 }
 0x2b6   :  { %v3529_v45 = vadd.f32 %v6666_v15, %v3402_v9  ;;  %v3015_v37 = vpop.f32.mrf.mxu1 }
 0x2b7   :  { %v3942_v23 = vrot.slane %v3941_v39, 4 }
 0x2b8   :  { %v3593_v60 = vmax.f32 %v3529_v45, 0.0  ;;  %v6751_v45 = vld [vmem:[%s7603_s4 + $0x10] sm:$0xff] }
 0x2b9   :  { %v3943_v44 = vmax.f32 %v3941_v39, %v3942_v23  ;;  %v3234_v63 = vpop.f32.mrf.mxu2 }
 0x2ba   :  { %v3235_v40 = vadd.f32 %v3234_v63, %v3006_v5  ;;  %v2839_v19 = vpop.f32.mrf.mxu0  ;;  %v3665_v29 = vmul.f32 %v6731_v20, %v3593_v60 }
 0x2bb   :  { %v3944_v16 = vrot.slane %v3943_v44, 2  ;;  %v3009_v43 = vadd.f32 %v3008_v13, %v2839_v19  ;;  %v3411_v21 = vpop.f32.mrf.mxu3 }
 0x2bc   :  { %v3404_v11 = vadd.f32 %v3403_v51, %v3235_v40  ;;  %v6737_v51 = vld [vmem:[%s7603_s4 + $0x8] sm:$0xff]  ;;  %v3732_v54 = vsel %vm2310_vm8, %v3665_v29, -inf }
 0x2bd   :  { %v3945_v14 = vmax.f32 %v3943_v44, %v3944_v16  ;;  %v6725_v62 = vpop.permute.xlu2 %4722 }
 0x2be   :  { %v3530_v8 = vadd.f32 %v6666_v15, %v3404_v11  ;;  %v4725_v16 = vunpack.i.h.bf16 %v6725_v62  ;;  %v4724_v60 = vunpack.i.l.bf16 %v6725_v62  ;;  %v6759_v11 = vld [vmem:[%s7603_s4 + $0x18] sm:$0xff] }
 0x2bf   :  { %v3946_v12 = vrot.slane %v3945_v14, 1 }
 0x2c0   :  { %v3594_v48 = vmax.f32 %v3530_v8, 0.0  ;;  %v6763_v8 = vperm.slane %v6642_v3, 1 }
 0x2c1   :  { %v3947_v35 = vmax.f32 %v3945_v14, %v3946_v12  ;;  %v3237_v47 = vpop.f32.mrf.mxu2 }
 0x2c2   :  { %v3666_v53 = vmul.f32 %v6737_v51, %v3594_v48  ;;  %v3238_v42 = vadd.f32 %v3237_v47, %v3009_v43  ;;  %v2841_v17 = vpop.f32.mrf.mxu0  ;;  %512 = vperm.xlu0 %4790, %v6763_v8   ;;  %v2350_v47 = vsel %vm2310_vm8, %v6451_v34, %v4725_v16 }
 0x2c3   :  { %v6742_v46 = vsel %vm4003_vm5, %v3947_v35, %v6631_v61  ;;  %v3011_v49 = vadd.f32 %v3010_v30, %v2841_v17  ;;  %v3413_v63 = vpop.f32.mrf.mxu3  ;;  %v456_v35 = vpop.permute.xlu0 %455  ;;  %v2349_v17 = vsel %vm2310_vm8, %v6427_v10, %v4724_v60 }
 0x2c4   :  { %v3733_v50 = vsel %vm2310_vm8, %v3666_v53, -inf  ;;  %v3407_v33 = vadd.f32 %v3406_v52, %v3238_v42  ;;  %v3018_v42 = vpop.f32.mrf.mxu1  ;;  %vm686_vm10 = vcmp.eq.s32.totalorder %v456_v35, %v5113_v32 }
 0x2c5   :  { %v3734_v13 = vmax.f32 %v3732_v54, %v3733_v50  ;;  %v4733_v58 = vpop.permute.xlu2 %4732 }
 0x2c6   :  { %v3531_v22 = vadd.f32 %v6666_v15, %v3407_v33  ;;  %v4735_v33 = vunpack.i.h.bf16 %v4733_v58 }
 0x2c7   :  { %v3735_v38 = vrot.slane %v3734_v13, 4 }
 0x2c8   :  { %v3595_v61 = vmax.f32 %v3531_v22, 0.0 }
 0x2c9   :  { %v3736_v25 = vmax.f32 %v3734_v13, %v3735_v38  ;;  %v3239_v28 = vpop.f32.mrf.mxu2  ;;  %v4734_v13 = vunpack.i.l.bf16 %v4733_v58 }
 0x2ca   :  { %v3240_v4 = vadd.f32 %v3239_v28, %v3011_v49  ;;  %v2844_v36 = vpop.f32.mrf.mxu0  ;;  %v3667_v30 = vmul.f32 %v6751_v45, %v3595_v61  ;;  %v6786_v61 = vsel %vm686_vm10, 1.0, %v7627_v27  ;;  %4810 = vset.pattern.permute.xlu0 %v7653_v57 }
 0x2cb   :  { %v3737_v31 = vrot.slane %v3736_v25, 2  ;;  %v3014_v44 = vadd.f32 %v3013_v59, %v2844_v36 }
 0x2cc   :  { %v3409_v41 = vadd.f32 %v3408_v24, %v3240_v4  ;;  %v3804_v48 = vsel %vm2310_vm8, %v3667_v30, -inf  ;;  %v6794_v30 = vld [vmem:[%s7603_s4 + $0x20] sm:$0xff] }
 0x2cd   :  { %v3738_v9 = vmax.f32 %v3736_v25, %v3737_v31  ;;  %v468_v52 = vpop.permute.xlu2 %467 }
 0x2ce   :  { %v3532_v39 = vadd.f32 %v6666_v15, %v3409_v41  ;;  %vm856_vm11 = vcmp.eq.s32.totalorder %v468_v52, %v5113_v32  ;;  %v3416_v41 = vpop.f32.mrf.mxu3 }
 0x2cf   :  { %v3739_v23 = vrot.slane %v3738_v9, 1 }
 0x2d0   :  { %v3596_v5 = vmax.f32 %v3532_v39, 0.0 }
 0x2d1   :  { %v3740_v40 = vmax.f32 %v3738_v9, %v3739_v23  ;;  %v3242_v19 = vpop.f32.mrf.mxu2 }
 0x2d2   :  { %v3668_v24 = vmul.f32 %v6759_v11, %v3596_v5  ;;  %v3243_v14 = vadd.f32 %v3242_v19, %v3014_v44  ;;  %v2846_v12 = vpop.f32.mrf.mxu0  ;;  %v1490_v19 = vrot.slane %v6786_v61, 2 }
 0x2d3   :  { %v6767_v29 = vsel %vm4005_vm9, %v3740_v40, %v6686_v6  ;;  %v3016_v34 = vadd.f32 %v3015_v37, %v2846_v12  ;;  %v6789_v37 = vsel %vm856_vm11, 1.0, %v7627_v27  ;;  %v1137_v40 = vrot.slane %v6786_v61, 1 }
 0x2d4   :  { %v3805_v62 = vsel %vm2310_vm8, %v3668_v24, -inf  ;;  %v3412_v43 = vadd.f32 %v3411_v21, %v3243_v14  ;;  %v1140_v24 = vrot.slane %v6789_v37, 1  ;;  %v2199_v14 = vrot.slane %v6789_v37, 4 }
 0x2d5   :  { %v3806_v59 = vmax.f32 %v3804_v48, %v3805_v62  ;;  %v4728_v53 = vpop.permute.xlu1 %4727  ;;  %v2196_v12 = vrot.slane %v6786_v61, 4  ;;  %v3020_v48 = vpop.f32.mrf.mxu1 }
 0x2d6   :  { %v3533_v6 = vadd.f32 %v6666_v15, %v3412_v43  ;;  %v4730_v54 = vunpack.i.h.bf16 %v4728_v53  ;;  %v4729_v50 = vunpack.i.l.bf16 %v4728_v53  ;;  %v6783_v31 = vpop.permute.xlu2 %4745 }
 0x2d7   :  { %v3807_v38 = vrot.slane %v3806_v59, 4 }
 0x2d8   :  { %v2414_v21 = vsel %vm2375_vm13, %v2349_v17, %v4729_v50  ;;  %v2415_v22 = vsel %vm2375_vm13, %v2350_v47, %v4730_v54  ;;  %v3597_v25 = vmax.f32 %v3533_v6, 0.0  ;;  %v1843_v6 = vrot.slane %v6786_v61, 3  ;;  %v6817_v50 = vld [vmem:[%s7603_s4 + $0x28] sm:$0xff] }
 0x2d9   :  { %v3808_v49 = vmax.f32 %v3806_v59, %v3807_v38  ;;  %v3244_v28 = vpop.f32.mrf.mxu2  ;;  %v2479_v10 = vsel %vm2440_vm0, %v2414_v21, %v4734_v13  ;;  %v2480_v4 = vsel %vm2440_vm0, %v2415_v22, %v4735_v33 }
 0x2da   :  { %v3245_v58 = vadd.f32 %v3244_v28, %v3016_v34  ;;  %v2543_v36 = vpack.c.bf16 %v2480_v4, %v2479_v10  ;;  %v2849_v39 = vpop.f32.mrf.mxu0  ;;  %v3669_v5 = vmul.f32 %v6794_v30, %v3597_v25 }
 0x2db   :  { %v3809_v9 = vrot.slane %v3808_v49, 2  ;;  %v3019_v47 = vadd.f32 %v3018_v42, %v2849_v39 }
 0x2dc   :  { %v3414_v23 = vadd.f32 %v3413_v63, %v3245_v58  ;;  %2868 = vmatmul.bf16.gmra.mxu0 %v2543_v36  ;;  %3266 = vmatmul.bf16.gmra.mxu2 %v2543_v36  ;;  %v1493_v63 = vrot.slane %v6789_v37, 2  ;;  %v3876_v53 = vsel %vm2310_vm8, %v3669_v5, -inf  ;;  %v4748_v5 = vunpack.i.h.bf16 %v6783_v31 }
 0x2dd   :  { %v3810_v52 = vmax.f32 %v3808_v49, %v3809_v9  ;;  %v462_v44 = vpop.permute.xlu1 %461  ;;  %v3418_v9 = vpop.f32.mrf.mxu3 }
 0x2de   :  { %v3534_v16 = vadd.f32 %v6666_v15, %v3414_v23  ;;  %vm687_vm12 = vcmp.eq.s32.totalorder %v462_v44, %v5113_v32  ;;  %v481_v28 = vpop.permute.xlu2 %480  ;;  %v1846_v23 = vrot.slane %v6789_v37, 3 }
 0x2df   :  { %v6804_v60 = vsel %vm687_vm12, 1.0, %v7627_v27  ;;  %v3811_v59 = vrot.slane %v3810_v52, 1  ;;  %vm689_vm1 = vcmp.eq.s32.totalorder %v481_v28, %v5113_v32 }
 0x2e0   :  { %v3598_v62 = vmax.f32 %v3534_v16, 0.0  ;;  %v1138_v43 = vrot.slane %v6804_v60, 1  ;;  %v1491_v35 = vrot.slane %v6804_v60, 2  ;;  %v2197_v17 = vrot.slane %v6804_v60, 4 }
 0x2e1   :  { %v3247_v54 = vpop.f32.mrf.mxu2 }
 0x2e2   :  { %v3670_v33 = vmul.f32 %v6817_v50, %v3598_v62  ;;  %v3248_v13 = vadd.f32 %v3247_v54, %v3019_v47  ;;  %v1492_v38 = vsel %vm1379_vm14, %v1490_v19, %v1491_v35  ;;  %v1494_v42 = vsel %vm1379_vm14, %v1491_v35, %v1493_v63  ;;  %v2851_v25 = vpop.f32.mrf.mxu0  ;;  %v3023_v62 = vpop.f32.mrf.mxu1 }
 0x2e3   :  { %v2198_v21 = vsel %vm2085_vm6, %v2196_v12, %v2197_v17  ;;  %v2200_v22 = vsel %vm2085_vm6, %v2197_v17, %v2199_v14  ;;  %v4780_v34 = vpack.i.bf16 %v1494_v42, %v1492_v38  ;;  %v1139_v49 = vsel %vm1026_vm7, %v1137_v40, %v1138_v43 }
 0x2e4   :  { %v3877_v10 = vsel %vm2310_vm8, %v3670_v33, -inf  ;;  %v3417_v4 = vadd.f32 %v3416_v41, %v3248_v13  ;;  %v2550_v58 = vpack.c.bf16 %v2200_v22, %v2198_v21  ;;  %v1141_v36 = vsel %vm1026_vm7, %v1138_v43, %v1140_v24  ;;  %v4751_v16 = vpop.permute.xlu0 %4750 }
 0x2e5   :  { %v3878_v39 = vmax.f32 %v3876_v53, %v3877_v10  ;;  %4781 = vrot.lane.b32.xlu1 %v4780_v34, %s5002_s14  ;;  %v4775_v44 = vpack.i.bf16 %v1141_v36, %v1139_v49  ;;  %v1844_v40 = vrot.slane %v6804_v60, 3  ;;  %v4747_v19 = vunpack.i.l.bf16 %v6783_v31  ;;  %v3421_v49 = vpop.f32.mrf.mxu3 }
 0x2e6   :  { %v3535_v63 = vadd.f32 %v6666_v15, %v3417_v4  ;;  %v4741_v41 = vpop.permute.xlu1 %4740  ;;  %4288 = vmatmul.msk.bf16.gmra.mxu1 %vm2310_vm8, %v2550_v58  ;;  %4360 = vmatmul.msk.bf16.gmra.mxu3 %vm2310_vm8, %v2550_v58  ;;  %v4752_v12 = vunpack.i.l.bf16 %v4751_v16  ;;  %v4753_v43 = vunpack.i.h.bf16 %v4751_v16  ;;  %v3021_v35 = vadd.f32 %v3020_v48, %v2851_v25 }
 0x2e7   :  { %v3879_v37 = vrot.slane %v3878_v39, 4  ;;  %v4743_v24 = vunpack.i.h.bf16 %v4741_v41  ;;  %v4742_v14 = vunpack.i.l.bf16 %v4741_v41  ;;  %4776 = vrot.lane.b32.xlu2 %v4775_v44, %s5001_s13  ;;  %v3812_v47 = vmax.f32 %v3810_v52, %v3811_v59 }
 0x2e8   :  { %v6842_v33 = vsel %vm689_vm1, 1.0, %v7627_v27  ;;  %v1845_v38 = vsel %vm1732_vm15, %v1843_v6, %v1844_v40  ;;  %v1847_v42 = vsel %vm1732_vm15, %v1844_v40, %v1846_v23  ;;  %v3599_v52 = vmax.f32 %v3535_v63, 0.0 }
 0x2e9   :  { %v3880_v53 = vmax.f32 %v3878_v39, %v3879_v37  ;;  %v2352_v31 = vsel %vm2310_vm8, %v6507_v26, %v4743_v24  ;;  %v2351_v17 = vsel %vm2310_vm8, %v6533_v0, %v4742_v14  ;;  %v3249_v54 = vpop.f32.mrf.mxu2  ;;  %v4785_v25 = vpack.i.bf16 %v1847_v42, %v1845_v38 }
 0x2ea   :  { %v3250_v13 = vadd.f32 %v3249_v54, %v3021_v35  ;;  %v2416_v21 = vsel %vm2375_vm13, %v2351_v17, %v4747_v19  ;;  %v2854_v59 = vpop.f32.mrf.mxu0  ;;  %v2417_v22 = vsel %vm2375_vm13, %v2352_v31, %v4748_v5  ;;  %v6853_v10 = vsel %vm4005_vm9, %v3812_v47, %v6710_v7  ;;  %v3025_v14 = vpop.f32.mrf.mxu1 }
 0x2eb   :  { %v3881_v48 = vrot.slane %v3880_v53, 2  ;;  %v2481_v26 = vsel %vm2440_vm0, %v2416_v21, %v4752_v12  ;;  %v2482_v0 = vsel %vm2440_vm0, %v2417_v22, %v4753_v43  ;;  %v1143_v36 = vrot.slane %v6842_v33, 1  ;;  %v6880_v43 = vld [vmem:[%s7603_s4 + $0x38] sm:$0xff] }
 0x2ec   :  { %v3419_v34 = vadd.f32 %v3418_v9, %v3250_v13  ;;  %v487_v28 = vpop.permute.xlu0 %486  ;;  %v2545_v6 = vpack.c.bf16 %v2482_v0, %v2481_v26  ;;  %v6861_v9 = vld [vmem:[%s7603_s4 + $0x30] sm:$0xff]  ;;  %v1849_v5 = vrot.slane %v6842_v33, 3  ;;  %v3024_v63 = vadd.f32 %v3023_v62, %v2854_v59 }
 0x2ed   :  { %518 = vperm.xlu1 %4791, %v6763_v8   ;;  %v3882_v4 = vmax.f32 %v3880_v53, %v3881_v48  ;;  %vm857_vm2 = vcmp.eq.s32.totalorder %v487_v28, %v5113_v32  ;;  %v3671_v23 = vmul.f32 %v6861_v9, %v3599_v52  ;;  %v1496_v19 = vrot.slane %v6842_v33, 2  ;;  %v3423_v0 = vpop.f32.mrf.mxu3 }
 0x2ee   :  { %v3536_v58 = vadd.f32 %v6666_v15, %v3419_v34  ;;  %v475_v39 = vpop.permute.xlu1 %474  ;;  %v6868_v7 = vsel %vm857_vm2, 1.0, %v7627_v27  ;;  %2873 = vmatmul.bf16.gmra.mxu0 %v2545_v6  ;;  %3271 = vmatmul.bf16.gmra.mxu2 %v2545_v6 }
 0x2ef   :  { %vm688_vm3 = vcmp.eq.s32.totalorder %v475_v39, %v5113_v32  ;;  %4786 = vrot.lane.b32.xlu2 %v4785_v25, %s5003_s15  ;;  %v1145_v40 = vrot.slane %v6868_v7, 1  ;;  %v3883_v12 = vrot.slane %v3882_v4, 1  ;;  %v1851_v47 = vrot.slane %v6868_v7, 3 }
 0x2f0   :  { %v3600_v44 = vmax.f32 %v3536_v58, 0.0  ;;  %v6871_v16 = vsel %vm688_vm3, 1.0, %v7627_v27  ;;  %v3948_v53 = vsel %vm2310_vm8, %v3671_v23, -inf  ;;  %v1498_v22 = vrot.slane %v6868_v7, 2 }
 0x2f1   :  { %v1142_v41 = vrot.slane %v6871_v16, 1  ;;  %v1848_v37 = vrot.slane %v6871_v16, 3  ;;  %v3252_v24 = vpop.f32.mrf.mxu2  ;;  %v1146_v54 = vsel %vm1026_vm7, %v1143_v36, %v1145_v40  ;;  %v1852_v21 = vsel %vm1732_vm15, %v1849_v5, %v1851_v47 }
 0x2f2   :  { %v3672_v35 = vmul.f32 %v6880_v43, %v3600_v44  ;;  %v3253_v62 = vadd.f32 %v3252_v24, %v3024_v63  ;;  %v2856_v13 = vpop.f32.mrf.mxu0  ;;  %v1495_v59 = vrot.slane %v6871_v16, 2  ;;  %v3884_v34 = vmax.f32 %v3882_v4, %v3883_v12  ;;  %v3028_v4 = vpop.f32.mrf.mxu1 }
 0x2f3   :  { %v1850_v31 = vsel %vm1732_vm15, %v1848_v37, %v1849_v5  ;;  %v1144_v17 = vsel %vm1026_vm7, %v1142_v41, %v1143_v36  ;;  %v3026_v28 = vadd.f32 %v3025_v14, %v2856_v13  ;;  %v1499_v23 = vsel %vm1379_vm14, %v1496_v19, %v1498_v22  ;;  %v4764_v12 = vpop.permute.xlu2 %4763 }
 0x2f4   :  { %v3949_v38 = vsel %vm2310_vm8, %v3672_v35, -inf  ;;  %v3422_v42 = vadd.f32 %v3421_v49, %v3253_v62  ;;  %v4793_v48 = vpack.i.bf16 %v1146_v54, %v1144_v17  ;;  %v4803_v26 = vpack.i.bf16 %v1852_v21, %v1850_v31 }
 0x2f5   :  { %v3950_v52 = vmax.f32 %v3948_v53, %v3949_v38  ;;  %4808 = vset.pattern.permute.xlu1 %v5046_v1  ;;  %v6899_v6 = vsel %vm4005_vm9, %v3884_v34, %v6720_v55  ;;  %v1497_v39 = vsel %vm1379_vm14, %v1495_v59, %v1496_v19  ;;  %v526_v44 = vperm.slane %v6642_v3, 2  ;;  %v3426_v55 = vpop.f32.mrf.mxu3 }
 0x2f6   :  { %4794 = vrot.lane.b32.xlu1 %v4793_v48, %s5001_s13  ;;  %4804 = vrot.lane.b32.xlu0 %v4803_v26, %s5003_s15  ;;  %v3537_v49 = vadd.f32 %v6666_v15, %v3422_v42  ;;  %v4798_v37 = vpack.i.bf16 %v1499_v23, %v1497_v39  ;;  %v2202_v26 = vrot.slane %v6842_v33, 4 }
 0x2f7   :  { %v3951_v25 = vrot.slane %v3950_v52, 4  ;;  %524 = vperm.xlu2 %4792, %v6763_v8  }
 0x2f8   :  { %v3601_v8 = vmax.f32 %v3537_v49, 0.0  ;;  %v4765_v49 = vunpack.i.l.bf16 %v4764_v12 }
 0x2f9   :  { %v3952_v58 = vmax.f32 %v3950_v52, %v3951_v25  ;;  %v3254_v36 = vpop.f32.mrf.mxu2 }
 0x2fa   :  { %v3255_v5 = vadd.f32 %v3254_v36, %v3026_v28  ;;  %v2859_v63 = vpop.f32.mrf.mxu0  ;;  %v3673_v19 = vmul.f32 %v6731_v20, %v3601_v8  ;;  %v3030_v42 = vpop.f32.mrf.mxu1 }
 0x2fb   :  { %v3953_v40 = vrot.slane %v3952_v58, 2  ;;  %v3029_v47 = vadd.f32 %v3028_v4, %v2859_v63  ;;  %v494_v28 = vpop.permute.xlu2 %493 }
 0x2fc   :  { %v3424_v41 = vadd.f32 %v3423_v0, %v3255_v5  ;;  %v3741_v21 = vsel %vm2310_vm8, %v3673_v19, -inf  ;;  %v2204_v0 = vrot.slane %v6868_v7, 4  ;;  %v4766_v5 = vunpack.i.h.bf16 %v4764_v12 }
 0x2fd   :  { %v3954_v24 = vmax.f32 %v3952_v58, %v3953_v40  ;;  %v500_v58 = vpop.permute.xlu0 %499  ;;  %v3428_v23 = vpop.f32.mrf.mxu3  ;;  %vm690_vm4 = vcmp.eq.s32.totalorder %v494_v28, %v5113_v32 }
 0x2fe   :  { %v3538_v14 = vadd.f32 %v6666_v15, %v3424_v41  ;;  %531 = vperm.xlu1 %4808, %v526_v44   ;;  %543 = vperm.xlu0 %4810, %v526_v44   ;;  %vm691_vm5 = vcmp.eq.s32.totalorder %v500_v58, %v5113_v32 }
 0x2ff   :  { %4809 = vset.pattern.permute.xlu2 %v5051_v2  ;;  %v3955_v62 = vrot.slane %v3954_v24, 1 }
 0x300   :  { %v3602_v35 = vmax.f32 %v3538_v14, 0.0  ;;  %4799 = vrot.lane.b32.xlu2 %v4798_v37, %s5002_s14 }
 0x301   :  { %v3257_v53 = vpop.f32.mrf.mxu2  ;;  %v3956_v54 = vmax.f32 %v3954_v24, %v3955_v62 }
 0x302   :  { %v3674_v31 = vmul.f32 %v6737_v51, %v3602_v35  ;;  %v3258_v17 = vadd.f32 %v3257_v53, %v3029_v47  ;;  %v2861_v38 = vpop.f32.mrf.mxu0  ;;  %v2201_v51 = vrot.slane %v6871_v16, 4  ;;  %v3033_v14 = vpop.f32.mrf.mxu1  ;;  %v6932_v53 = vperm.slane %v6642_v3, 3 }
 0x303   :  { %v4759_v13 = vpop.permute.xlu1 %4758  ;;  %v6913_v22 = vsel %vm4005_vm9, %v3956_v54, %v6742_v46  ;;  %v3031_v39 = vadd.f32 %v3030_v42, %v2861_v38  ;;  %v6945_v42 = vsel %vm691_vm5, 1.0, %v7627_v27  ;;  %vm4007_vm9 = vcmask 1044484  }
 0x304   :  { %v3742_v48 = vsel %vm2310_vm8, %v3674_v31, -inf  ;;  %v3427_v52 = vadd.f32 %v3426_v55, %v3258_v17  ;;  %v4760_v59 = vunpack.i.l.bf16 %v4759_v13  ;;  %v4761_v34 = vunpack.i.h.bf16 %v4759_v13 }
 0x305   :  { %v3743_v20 = vmax.f32 %v3741_v21, %v3742_v48  ;;  %v6940_v13 = vsel %vm690_vm4, 1.0, %v7627_v27  ;;  %vm4009_vm5 = vcmask 1045509  }
 0x306   :  { %4828 = vset.pattern.permute.xlu1 %v7653_v57  ;;  %4827 = vset.pattern.permute.xlu0 %v5051_v2  ;;  %v3539_v36 = vadd.f32 %v6666_v15, %v3427_v52  ;;  %v2353_v46 = vsel %vm2310_vm8, %v6609_v18, %v4760_v59  ;;  %v2354_v7 = vsel %vm2310_vm8, %v6620_v56, %v4761_v34  ;;  %v3431_v59 = vpop.f32.mrf.mxu3  ;;  %v1500_v34 = vrot.slane %v6940_v13, 2 }
 0x307   :  { %v3744_v25 = vrot.slane %v3743_v20, 4  ;;  %v2418_v41 = vsel %vm2375_vm13, %v2353_v46, %v4765_v49  ;;  %v2203_v18 = vsel %vm2085_vm6, %v2201_v51, %v2202_v26  ;;  %v2419_v47 = vsel %vm2375_vm13, %v2354_v7, %v4766_v5 }
 0x308   :  { %537 = vperm.xlu2 %4809, %v526_v44   ;;  %v2205_v44 = vsel %vm2085_vm6, %v2202_v26, %v2204_v0  ;;  %v3603_v55 = vmax.f32 %v3539_v36, 0.0  ;;  %v1147_v26 = vrot.slane %v6940_v13, 1  ;;  %v1501_v49 = vrot.slane %v6945_v42, 2 }
 0x309   :  { %v3745_v4 = vmax.f32 %v3743_v20, %v3744_v25  ;;  %v3259_v40 = vpop.f32.mrf.mxu2  ;;  %v2552_v62 = vpack.c.bf16 %v2205_v44, %v2203_v18 }
 0x30a   :  { %v3260_v63 = vadd.f32 %v3259_v40, %v3031_v39  ;;  %v2864_v24 = vpop.f32.mrf.mxu0  ;;  %v3675_v21 = vmul.f32 %v6751_v45, %v3603_v55  ;;  %v1148_v45 = vrot.slane %v6945_v42, 1  ;;  %v3035_v5 = vpop.f32.mrf.mxu1 }
 0x30b   :  { %v3746_v8 = vrot.slane %v3745_v4, 2  ;;  %v4769_v37 = vpop.permute.xlu1 %4768  ;;  %4289 = vmatmul.msk.bf16.gmra.mxu1 %vm2310_vm8, %v2552_v62  ;;  %4361 = vmatmul.msk.bf16.gmra.mxu3 %vm2310_vm8, %v2552_v62  ;;  %v3034_v52 = vadd.f32 %v3033_v14, %v2864_v24 }
 0x30c   :  { %v3429_v12 = vadd.f32 %v3428_v23, %v3260_v63  ;;  %v4771_v19 = vunpack.i.h.bf16 %v4769_v37  ;;  %v4770_v35 = vunpack.i.l.bf16 %v4769_v37  ;;  %v3813_v36 = vsel %vm2310_vm8, %v3675_v21, -inf }
 0x30d   :  { %v3747_v56 = vmax.f32 %v3745_v4, %v3746_v8  ;;  %v1149_v63 = vsel %vm1026_vm7, %v1147_v26, %v1148_v45  ;;  %v1502_v8 = vsel %vm1379_vm14, %v1500_v34, %v1501_v49  ;;  %v1854_v37 = vrot.slane %v6945_v42, 3 }
 0x30e   :  { %v3540_v31 = vadd.f32 %v6666_v15, %v3429_v12  ;;  %v2483_v17 = vsel %vm2440_vm0, %v2418_v41, %v4770_v35  ;;  %v2484_v54 = vsel %vm2440_vm0, %v2419_v47, %v4771_v19  ;;  %556 = vperm.xlu0 %4827, %v6932_v53   ;;  %v1853_v41 = vrot.slane %v6940_v13, 3  ;;  %v3433_v62 = vpop.f32.mrf.mxu3 }
 0x30f   :  { %v2547_v38 = vpack.c.bf16 %v2484_v54, %v2483_v17  ;;  %v3748_v3 = vrot.slane %v3747_v56, 1 }
 0x310   :  { %v3604_v48 = vmax.f32 %v3540_v31, 0.0  ;;  %4826 = vset.pattern.permute.xlu2 %v5046_v1 }
 0x311   :  { %2878 = vmatmul.bf16.gmra.mxu0 %v2547_v38  ;;  %v3262_v20 = vpop.f32.mrf.mxu2  ;;  %3276 = vmatmul.bf16.gmra.mxu2 %v2547_v38  ;;  %v3749_v51 = vmax.f32 %v3747_v56, %v3748_v3  ;;  %v1855_v38 = vsel %vm1732_vm15, %v1853_v41, %v1854_v37 }
 0x312   :  { %v3676_v0 = vmul.f32 %v6759_v11, %v3604_v48  ;;  %v3263_v25 = vadd.f32 %v3262_v20, %v3034_v52  ;;  %v2866_v23 = vpop.f32.mrf.mxu0  ;;  %v2206_v48 = vrot.slane %v6940_v13, 4  ;;  %v2207_v20 = vrot.slane %v6945_v42, 4 }
 0x313   :  { %v506_v28 = vpop.permute.xlu1 %505  ;;  %v6959_v58 = vsel %vm4007_vm9, %v3749_v51, %v6767_v29  ;;  %v3036_v24 = vadd.f32 %v3035_v5, %v2866_v23 }
 0x314   :  { %v3814_v46 = vsel %vm2310_vm8, %v3676_v0, -inf  ;;  %v3432_v39 = vadd.f32 %v3431_v59, %v3263_v25  ;;  %vm858_vm10 = vcmp.eq.s32.totalorder %v506_v28, %v5113_v32 }
 0x315   :  { %v3815_v4 = vmax.f32 %v3813_v36, %v3814_v46  ;;  %v4218_v11 = vsel %vm858_vm10, 1.0, %v7627_v27 }
 0x316   :  { %v1150_v40 = vrot.slane %v4218_v11, 1  ;;  %v1503_v7 = vrot.slane %v4218_v11, 2  ;;  %v3541_v18 = vadd.f32 %v6666_v15, %v3432_v39  ;;  %v1856_v44 = vrot.slane %v4218_v11, 3  ;;  %4844 = vset.pattern.permute.xlu0 %v5046_v1 }
 0x317   :  { %v3816_v29 = vrot.slane %v3815_v4, 4  ;;  %v2209_v59 = vrot.slane %v4218_v11, 4 }
 0x318   :  { %v1151_v14 = vsel %vm1026_vm7, %v1148_v45, %v1150_v40  ;;  %v1504_v55 = vsel %vm1379_vm14, %v1501_v49, %v1503_v7  ;;  %v3605_v17 = vmax.f32 %v3541_v18, 0.0  ;;  %v1857_v3 = vsel %vm1732_vm15, %v1854_v37, %v1856_v44 }
 0x319   :  { %v3817_v12 = vmax.f32 %v3815_v4, %v3816_v29  ;;  %v3264_v19 = vpop.f32.mrf.mxu2  ;;  %v4811_v35 = vpack.i.bf16 %v1151_v14, %v1149_v63  ;;  %v4816_v56 = vpack.i.bf16 %v1504_v55, %v1502_v8  ;;  %v4821_v26 = vpack.i.bf16 %v1857_v3, %v1855_v38  ;;  %v3436_v38 = vpop.f32.mrf.mxu3 }
 0x31a   :  { %v3265_v47 = vadd.f32 %v3264_v19, %v3036_v24  ;;  %v3677_v51 = vmul.f32 %v6794_v30, %v3605_v17  ;;  %v2208_v49 = vsel %vm2085_vm6, %v2206_v48, %v2207_v20  ;;  %v2210_v28 = vsel %vm2085_vm6, %v2207_v20, %v2209_v59 }
 0x31b   :  { %v3818_v31 = vrot.slane %v3817_v12, 2  ;;  %4812 = vrot.lane.b32.xlu1 %v4811_v35, %s5001_s13  ;;  %4817 = vrot.lane.b32.xlu2 %v4816_v56, %s5002_s14  ;;  %v2554_v46 = vpack.c.bf16 %v2210_v28, %v2208_v49 }
 0x31c   :  { %v3434_v54 = vadd.f32 %v3433_v62, %v3265_v47  ;;  %v3885_v36 = vsel %vm2310_vm8, %v3677_v51, -inf  ;;  %v3038_v62 = vpop.f32.mrf.mxu1 }
 0x31d   :  { %v3819_v21 = vmax.f32 %v3817_v12, %v3818_v31  ;;  %4290 = vmatmul.msk.bf16.gmra.mxu1 %vm2310_vm8, %v2554_v46  ;;  %4362 = vmatmul.msk.bf16.gmra.mxu3 %vm2310_vm8, %v2554_v46 }
 0x31e   :  { %v3542_v52 = vadd.f32 %v6666_v15, %v3434_v54 }
 0x31f   :  { %v3820_v34 = vrot.slane %v3819_v21, 1 }
 0x320   :  { %v3606_v0 = vmax.f32 %v3542_v52, 0.0 }
 0x321   :  { %v3821_v25 = vmax.f32 %v3819_v21, %v3820_v34 }
 0x322   :  { %v3678_v45 = vmul.f32 %v6817_v50, %v3606_v0 }
 0x323   :  { %4822 = vrot.lane.b32.xlu1 %v4821_v26, %s5003_s15  ;;  %550 = vperm.xlu2 %4826, %v6932_v53   ;;  %v6988_v15 = vsel %vm4007_vm9, %v3821_v25, %v6853_v10 }
 0x324   :  { %v3886_v30 = vsel %vm2310_vm8, %v3678_v45, -inf }
 0x325   :  { %v3887_v39 = vmax.f32 %v3885_v36, %v3886_v30 }
 0x327   :  { %v3888_v50 = vrot.slane %v3887_v39, 4 }
 0x329   :  { %v3889_v23 = vmax.f32 %v3887_v39, %v3888_v50 }
 0x32b   :  { %v3890_v4 = vrot.slane %v3889_v23, 2  ;;  %562 = vperm.xlu1 %4828, %v6932_v53   ;;  %4846 = vset.pattern.permute.xlu2 %v7653_v57  ;;  %v7004_v53 = vld [vmem:[%s7599_s0 + $0x18] sm:$0xff] }
 0x32c   :  { %v7007_v37 = vperm.slane %v7004_v53, 4 }
 0x32d   :  { %v3891_v11 = vmax.f32 %v3889_v23, %v3890_v4 }
 0x32e   :  { %569 = vperm.xlu0 %4844, %v7007_v37  }
 0x32f   :  { %v3892_v10 = vrot.slane %v3891_v11, 1 }
 0x331   :  { %v3893_v5 = vmax.f32 %v3891_v11, %v3892_v10  ;;  %v3040_v11 = vpop.f32.mrf.mxu1  ;;  %v7047_v10 = vld [vmem:[%s7602_s3] ss:$0 sm:$0xff] }
 0x333   :  { %4845 = vset.pattern.permute.xlu1 %v5051_v2  ;;  %v6999_v40 = vsel %vm4007_vm9, %v3893_v5, %v6899_v6 }
 0x334   :  { %v513_v24 = vpop.permute.xlu0 %512 }
 0x335   :  { %vm692_vm11 = vcmp.eq.s32.totalorder %v513_v24, %v5113_v32 }
 0x336   :  { %v7021_v54 = vsel %vm692_vm11, 1.0, %v7627_v27  ;;  %4864 = vset.pattern.permute.xlu0 %v7653_v57 }
 0x337   :  { %v1505_v52 = vrot.slane %v7021_v54, 2  ;;  %v2211_v59 = vrot.slane %v7021_v54, 4  ;;  %v1152_v25 = vrot.slane %v7021_v54, 1 }
 0x341   :  { %v4777_v7 = vpop.permute.xlu2 %4776 }
 0x342   :  { %v4779_v8 = vunpack.i.h.bf16 %v4777_v7  ;;  %v4778_v41 = vunpack.i.l.bf16 %v4777_v7 }
 0x344   :  { %v2356_v6 = vsel %vm2310_vm8, %v6804_v60, %v4779_v8  ;;  %v2355_v55 = vsel %vm2310_vm8, %v6786_v61, %v4778_v41 }
 0x349   :  { %v4787_v63 = vpop.permute.xlu2 %4786 }
 0x34a   :  { %v4789_v12 = vunpack.i.h.bf16 %v4787_v63  ;;  %v4788_v19 = vunpack.i.l.bf16 %v4787_v63 }
 0x351   :  { %v525_v29 = vpop.permute.xlu2 %524 }
 0x352   :  { %vm859_vm12 = vcmp.eq.s32.totalorder %v525_v29, %v5113_v32 }
 0x353   :  { %v7024_v61 = vsel %vm859_vm12, 1.0, %v7627_v27 }
 0x354   :  { %v1508_v26 = vrot.slane %v7024_v61, 2  ;;  %v2214_v34 = vrot.slane %v7024_v61, 4  ;;  %v1155_v36 = vrot.slane %v7024_v61, 1 }
 0x357   :  { %v4782_v18 = vpop.permute.xlu1 %4781 }
 0x358   :  { %v4784_v44 = vunpack.i.h.bf16 %v4782_v18  ;;  %v4783_v14 = vunpack.i.l.bf16 %v4782_v18  ;;  %v1858_v18 = vrot.slane %v7021_v54, 3 }
 0x359   :  { %v2869_v35 = vpop.f32.mrf.mxu0 }
 0x35a   :  { %v2420_v56 = vsel %vm2375_vm13, %v2355_v55, %v4783_v14  ;;  %v2421_v47 = vsel %vm2375_vm13, %v2356_v6, %v4784_v44  ;;  %v3039_v3 = vadd.f32 %v3038_v62, %v2869_v35  ;;  %v4800_v21 = vpop.permute.xlu2 %4799  ;;  %v1861_v14 = vrot.slane %v7024_v61, 3 }
 0x35b   :  { %v2485_v31 = vsel %vm2440_vm0, %v2420_v56, %v4788_v19  ;;  %v2486_v60 = vsel %vm2440_vm0, %v2421_v47, %v4789_v12  ;;  %v4802_v55 = vunpack.i.h.bf16 %v4800_v21  ;;  %v4801_v12 = vunpack.i.l.bf16 %v4800_v21  ;;  %v3438_v47 = vpop.f32.mrf.mxu3 }
 0x35c   :  { %v2549_v17 = vpack.c.bf16 %v2486_v60, %v2485_v31 }
 0x35e   :  { %2883 = vmatmul.bf16.gmra.mxu0 %v2549_v17  ;;  %3281 = vmatmul.bf16.gmra.mxu2 %v2549_v17 }
 0x35f   :  { %v519_v48 = vpop.permute.xlu1 %518  ;;  %v3267_v20 = vpop.f32.mrf.mxu2 }
 0x360   :  { %vm693_vm1 = vcmp.eq.s32.totalorder %v519_v48, %v5113_v32  ;;  %v3268_v51 = vadd.f32 %v3267_v20, %v3039_v3 }
 0x361   :  { %v7033_v0 = vsel %vm693_vm1, 1.0, %v7627_v27  ;;  %v2871_v46 = vpop.f32.mrf.mxu0 }
 0x362   :  { %v1153_v45 = vrot.slane %v7033_v0, 1  ;;  %v1506_v49 = vrot.slane %v7033_v0, 2  ;;  %v2212_v28 = vrot.slane %v7033_v0, 4  ;;  %v3437_v30 = vadd.f32 %v3436_v38, %v3268_v51  ;;  %v538_v56 = vpop.permute.xlu2 %537 }
 0x363   :  { %v3041_v29 = vadd.f32 %v3040_v11, %v2871_v46  ;;  %v1859_v24 = vrot.slane %v7033_v0, 3  ;;  %vm695_vm2 = vcmp.eq.s32.totalorder %v538_v56, %v5113_v32 }
 0x364   :  { %v2213_v39 = vsel %vm2085_vm6, %v2211_v59, %v2212_v28  ;;  %v2215_v50 = vsel %vm2085_vm6, %v2212_v28, %v2214_v34  ;;  %v1507_v23 = vsel %vm1379_vm14, %v1505_v52, %v1506_v49  ;;  %v1509_v4 = vsel %vm1379_vm14, %v1506_v49, %v1508_v26 }
 0x365   :  { %v3543_v5 = vadd.f32 %v7047_v10, %v3437_v30  ;;  %v2556_v7 = vpack.c.bf16 %v2215_v50, %v2213_v39  ;;  %v4834_v63 = vpack.i.bf16 %v1509_v4, %v1507_v23  ;;  %v1154_v8 = vsel %vm1026_vm7, %v1152_v25, %v1153_v45 }
 0x366   :  { %v1156_v41 = vsel %vm1026_vm7, %v1153_v45, %v1155_v36  ;;  %v1860_v52 = vsel %vm1732_vm15, %v1858_v18, %v1859_v24  ;;  %v1862_v20 = vsel %vm1732_vm15, %v1859_v24, %v1861_v14  ;;  %v7073_v49 = vsel %vm695_vm2, 1.0, %v7627_v27  ;;  %v3043_v36 = vpop.f32.mrf.mxu1 }
 0x367   :  { %4291 = vmatmul.msk.bf16.gmra.mxu1 %vm2310_vm8, %v2556_v7  ;;  %4363 = vmatmul.msk.bf16.gmra.mxu3 %vm2310_vm8, %v2556_v7  ;;  %v4829_v6 = vpack.i.bf16 %v1156_v41, %v1154_v8  ;;  %v3269_v44 = vpop.f32.mrf.mxu2  ;;  %v3607_v62 = vmax.f32 %v3543_v5, 0.0  ;;  %v4839_v30 = vpack.i.bf16 %v1862_v20, %v1860_v52  ;;  %v1864_v50 = vrot.slane %v7073_v49, 3 }
 0x368   :  { %v4795_v19 = vpop.permute.xlu1 %4794  ;;  %4835 = vrot.lane.b32.xlu1 %v4834_v63, %s5002_s14  ;;  %v3270_v35 = vadd.f32 %v3269_v44, %v3041_v29  ;;  %v4805_v17 = vpop.permute.xlu0 %4804  ;;  %v1158_v63 = vrot.slane %v7073_v49, 1 }
 0x369   :  { %v4797_v31 = vunpack.i.h.bf16 %v4795_v19  ;;  %v4796_v60 = vunpack.i.l.bf16 %v4795_v19  ;;  %4830 = vrot.lane.b32.xlu2 %v4829_v6, %s5001_s13  ;;  %v4807_v38 = vunpack.i.h.bf16 %v4805_v17  ;;  %v4806_v3 = vunpack.i.l.bf16 %v4805_v17 }
 0x36a   :  { %v3439_v48 = vadd.f32 %v3438_v47, %v3270_v35  ;;  %v3679_v51 = vmul.f32 %v6861_v9, %v3607_v62 }
 0x36b   :  { %v2358_v61 = vsel %vm2310_vm8, %v6842_v33, %v4797_v31  ;;  %v2357_v21 = vsel %vm2310_vm8, %v6871_v16, %v4796_v60  ;;  %v2874_v25 = vpop.f32.mrf.mxu0 }
 0x36c   :  { %v3544_v59 = vadd.f32 %v7047_v10, %v3439_v48  ;;  %v2422_v26 = vsel %vm2375_vm13, %v2357_v21, %v4801_v12  ;;  %v2423_v34 = vsel %vm2375_vm13, %v2358_v61, %v4802_v55  ;;  %v3957_v9 = vsel %vm2310_vm8, %v3679_v51, -inf }
 0x36d   :  { %v2487_v33 = vsel %vm2440_vm0, %v2422_v26, %v4806_v3  ;;  %v2488_v45 = vsel %vm2440_vm0, %v2423_v34, %v4807_v38  ;;  %v3044_v11 = vadd.f32 %v3043_v36, %v2874_v25  ;;  %v1511_v55 = vrot.slane %v7073_v49, 2 }
 0x36e   :  { %v3608_v16 = vmax.f32 %v3544_v59, 0.0  ;;  %v2551_v28 = vpack.c.bf16 %v2488_v45, %v2487_v33  ;;  %v3045_v48 = vpop.f32.mrf.mxu1 }
 0x370   :  { %v3680_v46 = vmul.f32 %v6880_v43, %v3608_v16  ;;  %v532_v39 = vpop.permute.xlu1 %531  ;;  %575 = vperm.xlu1 %4845, %v7007_v37   ;;  %2888 = vmatmul.bf16.gmra.mxu0 %v2551_v28  ;;  %v544_v23 = vpop.permute.xlu0 %543 }
 0x371   :  { %vm694_vm3 = vcmp.eq.s32.totalorder %v532_v39, %v5113_v32  ;;  %4840 = vrot.lane.b32.xlu2 %v4839_v30, %s5003_s15  ;;  %3286 = vmatmul.bf16.gmra.mxu2 %v2551_v28  ;;  %vm860_vm4 = vcmp.eq.s32.totalorder %v544_v23, %v5113_v32  ;;  %v3441_v43 = vpop.f32.mrf.mxu3  ;;  %v3272_v41 = vpop.f32.mrf.mxu2  ;;  %v7118_v39 = vld [vmem:[%s7603_s4] sm:$0xff]  ;;  %v7125_v23 = vld [vmem:[%s7603_s4 + $0x8] sm:$0xff] }
 0x372   :  { %v3958_v4 = vsel %vm2310_vm8, %v3680_v46, -inf  ;;  %v7083_v5 = vsel %vm694_vm3, 1.0, %v7627_v27  ;;  %v7090_v24 = vsel %vm860_vm4, 1.0, %v7627_v27  ;;  %v3273_v18 = vadd.f32 %v3272_v41, %v3044_v11 }
 0x373   :  { %v3959_v7 = vmax.f32 %v3957_v9, %v3958_v4  ;;  %v1157_v8 = vrot.slane %v7083_v5, 1  ;;  %v1863_v29 = vrot.slane %v7083_v5, 3  ;;  %v1160_v44 = vrot.slane %v7090_v24, 1  ;;  %v2876_v56 = vpop.f32.mrf.mxu0 }
 0x374   :  { %v1866_v14 = vrot.slane %v7090_v24, 3  ;;  %v3442_v12 = vadd.f32 %v3441_v43, %v3273_v18  ;;  %v1510_v60 = vrot.slane %v7083_v5, 2  ;;  %v1513_v17 = vrot.slane %v7090_v24, 2 }
 0x375   :  { %v3960_v6 = vrot.slane %v3959_v7, 4  ;;  %v1865_v19 = vsel %vm1732_vm15, %v1863_v29, %v1864_v50  ;;  %v1159_v62 = vsel %vm1026_vm7, %v1157_v8, %v1158_v63  ;;  %v1161_v31 = vsel %vm1026_vm7, %v1158_v63, %v1160_v44  ;;  %v4818_v8 = vpop.permute.xlu2 %4817 }
 0x376   :  { %v1867_v47 = vsel %vm1732_vm15, %v1864_v50, %v1866_v14  ;;  %v4847_v3 = vpack.i.bf16 %v1161_v31, %v1159_v62  ;;  %v3545_v21 = vadd.f32 %v7047_v10, %v3442_v12  ;;  %v3046_v52 = vadd.f32 %v3045_v48, %v2876_v56  ;;  %v3048_v12 = vpop.f32.mrf.mxu1 }
 0x377   :  { %v3961_v35 = vmax.f32 %v3959_v7, %v3960_v6  ;;  %v4857_v38 = vpack.i.bf16 %v1867_v47, %v1865_v19  ;;  %v1512_v34 = vsel %vm1379_vm14, %v1510_v60, %v1511_v55  ;;  %v1514_v51 = vsel %vm1379_vm14, %v1511_v55, %v1513_v17 }
 0x378   :  { %4862 = vset.pattern.permute.xlu1 %v5046_v1  ;;  %v3609_v45 = vmax.f32 %v3545_v21, 0.0  ;;  %v4852_v28 = vpack.i.bf16 %v1514_v51, %v1512_v34  ;;  %v2217_v18 = vrot.slane %v7073_v49, 4  ;;  %v2216_v6 = vrot.slane %v7083_v5, 4 }
 0x379   :  { %v3962_v61 = vrot.slane %v3961_v35, 2  ;;  %581 = vperm.xlu2 %4846, %v7007_v37   ;;  %4858 = vrot.lane.b32.xlu0 %v4857_v38, %s5003_s15  ;;  %v3274_v59 = vpop.f32.mrf.mxu2  ;;  %v3443_v25 = vpop.f32.mrf.mxu3  ;;  %v583_v37 = vperm.slane %v7004_v53, 5  ;;  %v2219_v44 = vrot.slane %v7090_v24, 4  ;;  %v4820_v56 = vunpack.i.h.bf16 %v4818_v8 }
 0x37a   :  { %4848 = vrot.lane.b32.xlu1 %v4847_v3, %s5001_s13  ;;  %v3275_v26 = vadd.f32 %v3274_v59, %v3046_v52  ;;  %v3681_v9 = vmul.f32 %v7118_v39, %v3609_v45  ;;  %v4819_v47 = vunpack.i.l.bf16 %v4818_v8  ;;  %v2218_v62 = vsel %vm2085_vm6, %v2216_v6, %v2217_v18 }
 0x37b   :  { %v3963_v20 = vmax.f32 %v3961_v35, %v3962_v61  ;;  %v2220_v31 = vsel %vm2085_vm6, %v2217_v18, %v2219_v44  ;;  %v7138_v48 = vperm.slane %v7004_v53, 6 }
 0x37c   :  { %v3444_v16 = vadd.f32 %v3443_v25, %v3275_v26  ;;  %v3750_v4 = vsel %vm2310_vm8, %v3681_v9, -inf  ;;  %v2558_v3 = vpack.c.bf16 %v2220_v31, %v2218_v62 }
 0x37d   :  { %v3964_v33 = vrot.slane %v3963_v20, 1  ;;  %v551_v17 = vpop.permute.xlu2 %550 }
 0x37e   :  { %v3546_v30 = vadd.f32 %v7047_v10, %v3444_v16  ;;  %4292 = vmatmul.msk.bf16.gmra.mxu1 %vm2310_vm8, %v2558_v3  ;;  %4364 = vmatmul.msk.bf16.gmra.mxu3 %vm2310_vm8, %v2558_v3 }
 0x37f   :  { %v3965_v36 = vmax.f32 %v3963_v20, %v3964_v33 }
 0x380   :  { %v3610_v50 = vmax.f32 %v3546_v30, 0.0  ;;  %v557_v38 = vpop.permute.xlu0 %556 }
 0x381   :  { %4863 = vset.pattern.permute.xlu2 %v5051_v2  ;;  %v7113_v46 = vsel %vm4007_vm9, %v3965_v36, %v6913_v22  ;;  %600 = vperm.xlu0 %4864, %v583_v37   ;;  %v3446_v61 = vpop.f32.mrf.mxu3  ;;  %vm696_vm9 = vcmp.eq.s32.totalorder %v551_v17, %v5113_v32  ;;  %vm697_vm10 = vcmp.eq.s32.totalorder %v557_v38, %v5113_v32 }
 0x382   :  { %588 = vperm.xlu1 %4862, %v583_v37   ;;  %4853 = vrot.lane.b32.xlu2 %v4852_v28, %s5002_s14  ;;  %v3682_v22 = vmul.f32 %v7125_v23, %v3610_v50  ;;  %v7159_v30 = vsel %vm696_vm9, 1.0, %v7627_v27  ;;  %v7162_v9 = vsel %vm697_vm10, 1.0, %v7627_v27  ;;  %v3050_v50 = vpop.f32.mrf.mxu1 }
 0x383   :  { %v1869_v62 = vrot.slane %v7162_v9, 3 }
 0x384   :  { %v3751_v11 = vsel %vm2310_vm8, %v3682_v22, -inf }
 0x385   :  { %v3752_v43 = vmax.f32 %v3750_v4, %v3751_v11  ;;  %v1162_v11 = vrot.slane %v7159_v30, 1 }
 0x387   :  { %v3753_v7 = vrot.slane %v3752_v43, 4 }
 0x389   :  { %4881 = vset.pattern.permute.xlu0 %v5051_v2  ;;  %v3754_v63 = vmax.f32 %v3752_v43, %v3753_v7  ;;  %v1515_v43 = vrot.slane %v7159_v30, 2  ;;  %v1163_v7 = vrot.slane %v7162_v9, 1 }
 0x38a   :  { %4882 = vset.pattern.permute.xlu1 %v7653_v57  ;;  %594 = vperm.xlu2 %4863, %v583_v37  }
 0x38b   :  { %v3755_v29 = vrot.slane %v3754_v63, 2 }
 0x38d   :  { %v4813_v41 = vpop.permute.xlu1 %4812  ;;  %v3756_v55 = vmax.f32 %v3754_v63, %v3755_v29  ;;  %v1516_v63 = vrot.slane %v7162_v9, 2 }
 0x38e   :  { %v2879_v14 = vpop.f32.mrf.mxu0  ;;  %v4815_v19 = vunpack.i.h.bf16 %v4813_v41  ;;  %v4814_v35 = vunpack.i.l.bf16 %v4813_v41  ;;  %v3448_v41 = vpop.f32.mrf.mxu3 }
 0x38f   :  { %v3049_v60 = vadd.f32 %v3048_v12, %v2879_v14  ;;  %v3757_v24 = vrot.slane %v3756_v55, 1  ;;  %v1164_v12 = vsel %vm1026_vm7, %v1162_v11, %v1163_v7 }
 0x390   :  { %v2360_v21 = vsel %vm2310_vm8, %v6945_v42, %v4815_v19  ;;  %v2359_v52 = vsel %vm2310_vm8, %v6940_v13, %v4814_v35  ;;  %v1517_v19 = vsel %vm1379_vm14, %v1515_v43, %v1516_v63 }
 0x391   :  { %v3758_v34 = vmax.f32 %v3756_v55, %v3757_v24  ;;  %613 = vperm.xlu0 %4881, %v7138_v48   ;;  %v2424_v42 = vsel %vm2375_vm13, %v2359_v52, %v4819_v47  ;;  %v2425_v13 = vsel %vm2375_vm13, %v2360_v21, %v4820_v56  ;;  %v1868_v56 = vrot.slane %v7159_v30, 3 }
 0x392   :  { %4880 = vset.pattern.permute.xlu2 %v5046_v1 }
 0x393   :  { %v7154_v45 = vsel %vm4009_vm5, %v3758_v34, %v6959_v58  ;;  %v1870_v52 = vsel %vm1732_vm15, %v1868_v56, %v1869_v62 }
 0x394   :  { %v3277_v59 = vpop.f32.mrf.mxu2 }
 0x395   :  { %v3278_v20 = vadd.f32 %v3277_v59, %v3049_v60  ;;  %v4823_v26 = vpop.permute.xlu1 %4822  ;;  %v7182_v60 = vld [vmem:[%s7603_s4 + $0x10] sm:$0xff] }
 0x396   :  { %v4825_v51 = vunpack.i.h.bf16 %v4823_v26  ;;  %v4824_v25 = vunpack.i.l.bf16 %v4823_v26  ;;  %v2881_v16 = vpop.f32.mrf.mxu0 }
 0x397   :  { %v3447_v33 = vadd.f32 %v3446_v61, %v3278_v20  ;;  %v3051_v4 = vadd.f32 %v3050_v50, %v2881_v16  ;;  %v7188_v61 = vld [vmem:[%s7603_s4 + $0x18] sm:$0xff] }
 0x398   :  { %v2489_v37 = vsel %vm2440_vm0, %v2424_v42, %v4824_v25  ;;  %v2490_v28 = vsel %vm2440_vm0, %v2425_v13, %v4825_v51  ;;  %v2221_v51 = vrot.slane %v7159_v30, 4  ;;  %v2222_v42 = vrot.slane %v7162_v9, 4 }
 0x399   :  { %v2553_v36 = vpack.c.bf16 %v2490_v28, %v2489_v37  ;;  %v3547_v22 = vadd.f32 %v7047_v10, %v3447_v33  ;;  %4898 = vset.pattern.permute.xlu0 %v5046_v1 }
 0x39a   :  { %v2223_v37 = vsel %vm2085_vm6, %v2221_v51, %v2222_v42 }
 0x39b   :  { %2893 = vmatmul.bf16.gmra.mxu0 %v2553_v36  ;;  %3291 = vmatmul.bf16.gmra.mxu2 %v2553_v36  ;;  %v3611_v18 = vmax.f32 %v3547_v22, 0.0 }
 0x39c   :  { %v3279_v58 = vpop.f32.mrf.mxu2 }
 0x39d   :  { %v3280_v8 = vadd.f32 %v3279_v58, %v3051_v4  ;;  %v563_v29 = vpop.permute.xlu1 %562  ;;  %v3683_v17 = vmul.f32 %v7182_v60, %v3611_v18 }
 0x39e   :  { %vm861_vm11 = vcmp.eq.s32.totalorder %v563_v29, %v5113_v32  ;;  %v7213_v29 = vperm.slane %v7004_v53, 7 }
 0x39f   :  { %v3449_v6 = vadd.f32 %v3448_v41, %v3280_v8  ;;  %v4221_v44 = vsel %vm861_vm11, 1.0, %v7627_v27  ;;  %v3822_v20 = vsel %vm2310_vm8, %v3683_v17, -inf }
 0x3a0   :  { %v1165_v14 = vrot.slane %v4221_v44, 1  ;;  %v1518_v55 = vrot.slane %v4221_v44, 2  ;;  %v1871_v47 = vrot.slane %v4221_v44, 3  ;;  %v2224_v25 = vrot.slane %v4221_v44, 4  ;;  %v570_v18 = vpop.permute.xlu0 %569 }
 0x3a1   :  { %v3548_v35 = vadd.f32 %v7047_v10, %v3449_v6  ;;  %626 = vperm.xlu0 %4898, %v7213_v29   ;;  %v3053_v6 = vpop.f32.mrf.mxu1  ;;  %vm698_vm12 = vcmp.eq.s32.totalorder %v570_v18, %v5113_v32 }
 0x3a2   :  { %v1166_v31 = vsel %vm1026_vm7, %v1163_v7, %v1165_v14  ;;  %v1519_v1 = vsel %vm1379_vm14, %v1516_v63, %v1518_v55  ;;  %v1872_v59 = vsel %vm1732_vm15, %v1869_v62, %v1871_v47  ;;  %v2225_v28 = vsel %vm2085_vm6, %v2222_v42, %v2224_v25 }
 0x3a3   :  { %v3612_v38 = vmax.f32 %v3548_v35, 0.0  ;;  %v4865_v3 = vpack.i.bf16 %v1166_v31, %v1164_v12  ;;  %v4870_v24 = vpack.i.bf16 %v1519_v1, %v1517_v19  ;;  %v4875_v13 = vpack.i.bf16 %v1872_v59, %v1870_v52  ;;  %v3451_v31 = vpop.f32.mrf.mxu3 }
 0x3a4   :  { %v2560_v36 = vpack.c.bf16 %v2225_v28, %v2223_v37  ;;  %v7227_v62 = vsel %vm698_vm12, 1.0, %v7627_v27  ;;  %vm4011_vm12 = vcmask 1046534  }
 0x3a5   :  { %v3684_v21 = vmul.f32 %v7188_v61, %v3612_v38  ;;  %4866 = vrot.lane.b32.xlu1 %v4865_v3, %s5001_s13  ;;  %4871 = vrot.lane.b32.xlu2 %v4870_v24, %s5002_s14  ;;  %v1520_v24 = vrot.slane %v7227_v62, 2  ;;  %v1167_v51 = vrot.slane %v7227_v62, 1 }
 0x3a6   :  { %4293 = vmatmul.msk.bf16.gmra.mxu1 %vm2310_vm8, %v2560_v36  ;;  %4365 = vmatmul.msk.bf16.gmra.mxu3 %vm2310_vm8, %v2560_v36 }
 0x3a7   :  { %v3823_v26 = vsel %vm2310_vm8, %v3684_v21, -inf }
 0x3a8   :  { %v3824_v34 = vmax.f32 %v3822_v20, %v3823_v26  ;;  %v2226_v20 = vrot.slane %v7227_v62, 4 }
 0x3a9   :  { %4946 = vset.pattern.permute.xlu0 %v7653_v57  ;;  %v3055_v42 = vpop.f32.mrf.mxu1 }
 0x3aa   :  { %v3825_v33 = vrot.slane %v3824_v34, 4 }
 0x3ac   :  { %v3826_v16 = vmax.f32 %v3824_v34, %v3825_v33 }
 0x3ad   :  { %4876 = vrot.lane.b32.xlu1 %v4875_v13, %s5003_s15  ;;  %607 = vperm.xlu2 %4880, %v7138_v48  }
 0x3ae   :  { %v3827_v50 = vrot.slane %v3826_v16, 2 }
 0x3b0   :  { %v3828_v22 = vmax.f32 %v3826_v16, %v3827_v50 }
 0x3b2   :  { %v3829_v4 = vrot.slane %v3828_v22, 1 }
 0x3b4   :  { %v3830_v58 = vmax.f32 %v3828_v22, %v3829_v4 }
 0x3b5   :  { %619 = vperm.xlu1 %4882, %v7138_v48   ;;  %4900 = vset.pattern.permute.xlu2 %v7653_v57 }
 0x3b6   :  { %v7209_v11 = vsel %vm4009_vm5, %v3830_v58, %v6988_v15 }
 0x3bd   :  { %4899 = vset.pattern.permute.xlu1 %v5051_v2 }
 0x3c3   :  { %v4831_v43 = vpop.permute.xlu2 %4830 }
 0x3c4   :  { %v4833_v63 = vunpack.i.h.bf16 %v4831_v43  ;;  %v4832_v41 = vunpack.i.l.bf16 %v4831_v43 }
 0x3c6   :  { %v2362_v44 = vsel %vm2310_vm8, %v7033_v0, %v4833_v63  ;;  %v2361_v2 = vsel %vm2310_vm8, %v7021_v54, %v4832_v41 }
 0x3cb   :  { %v4841_v7 = vpop.permute.xlu2 %4840 }
 0x3cc   :  { %v4843_v12 = vunpack.i.h.bf16 %v4841_v7  ;;  %v4842_v19 = vunpack.i.l.bf16 %v4841_v7 }
 0x3d3   :  { %v582_v8 = vpop.permute.xlu2 %581 }
 0x3d4   :  { %vm862_vm1 = vcmp.eq.s32.totalorder %v582_v8, %v5113_v32 }
 0x3d5   :  { %v4222_v1 = vsel %vm862_vm1, 1.0, %v7627_v27 }
 0x3d6   :  { %v1523_v52 = vrot.slane %v4222_v1, 2  ;;  %v2229_v59 = vrot.slane %v4222_v1, 4  ;;  %v1170_v16 = vrot.slane %v4222_v1, 1 }
 0x3da   :  { %v4836_v48 = vpop.permute.xlu1 %4835 }
 0x3db   :  { %v4838_v15 = vunpack.i.h.bf16 %v4836_v48  ;;  %v4837_v14 = vunpack.i.l.bf16 %v4836_v48  ;;  %v2884_v55 = vpop.f32.mrf.mxu0  ;;  %v3453_v48 = vpop.f32.mrf.mxu3 }
 0x3dc   :  { %v3054_v54 = vadd.f32 %v3053_v6, %v2884_v55  ;;  %v7230_v38 = vpop.permute.xlu2 %4853 }
 0x3dd   :  { %v2426_v53 = vsel %vm2375_vm13, %v2361_v2, %v4837_v14  ;;  %v2427_v35 = vsel %vm2375_vm13, %v2362_v44, %v4838_v15  ;;  %v1876_v44 = vrot.slane %v4222_v1, 3  ;;  %v1873_v15 = vrot.slane %v7227_v62, 3 }
 0x3de   :  { %v2491_v56 = vsel %vm2440_vm0, %v2426_v53, %v4842_v19  ;;  %v2492_v0 = vsel %vm2440_vm0, %v2427_v35, %v4843_v12  ;;  %v4856_v2 = vunpack.i.h.bf16 %v7230_v38  ;;  %v4855_v12 = vunpack.i.l.bf16 %v7230_v38 }
 0x3df   :  { %v2555_v47 = vpack.c.bf16 %v2492_v0, %v2491_v56 }
 0x3e1   :  { %2898 = vmatmul.bf16.gmra.mxu0 %v2555_v47  ;;  %3296 = vmatmul.bf16.gmra.mxu2 %v2555_v47  ;;  %v3282_v17 = vpop.f32.mrf.mxu2 }
 0x3e2   :  { %v576_v3 = vpop.permute.xlu1 %575  ;;  %v3283_v21 = vadd.f32 %v3282_v17, %v3054_v54 }
 0x3e3   :  { %vm699_vm2 = vcmp.eq.s32.totalorder %v576_v3, %v5113_v32  ;;  %v2886_v26 = vpop.f32.mrf.mxu0 }
 0x3e4   :  { %v7237_v34 = vsel %vm699_vm2, 1.0, %v7627_v27  ;;  %v3452_v25 = vadd.f32 %v3451_v31, %v3283_v21  ;;  %v3056_v37 = vadd.f32 %v3055_v42, %v2886_v26  ;;  %v595_v14 = vpop.permute.xlu2 %594  ;;  %v4088_v21 = vld [vmem:[%s7604_s5 + $0x78] sm:$0xff]  ;;  %v3058_v26 = vpop.f32.mrf.mxu1  ;;  %v7282_v42 = vld [vmem:[%s7603_s4 + $0x28] sm:$0xff] }
 0x3e5   :  { %v1168_v13 = vrot.slane %v7237_v34, 1  ;;  %v1521_v33 = vrot.slane %v7237_v34, 2  ;;  %v2227_v57 = vrot.slane %v7237_v34, 4  ;;  %v1874_v6 = vrot.slane %v7237_v34, 3  ;;  %4093 = vmatpush.msrb.mxu1 %v4088_v21 }
 0x3e6   :  { %v3549_v4 = vadd.f32 %v7047_v10, %v3452_v25  ;;  %vm701_vm3 = vcmp.eq.s32.totalorder %v595_v14, %v5113_v32 }
 0x3e7   :  { %v2228_v28 = vsel %vm2085_vm6, %v2226_v20, %v2227_v57  ;;  %v2230_v36 = vsel %vm2085_vm6, %v2227_v57, %v2229_v59  ;;  %v1522_v50 = vsel %vm1379_vm14, %v1520_v24, %v1521_v33  ;;  %v1524_v22 = vsel %vm1379_vm14, %v1521_v33, %v1523_v52  ;;  %v7272_v52 = vld [vmem:[%s7603_s4 + $0x20] sm:$0xff] }
 0x3e8   :  { %v2562_v58 = vpack.c.bf16 %v2230_v36, %v2228_v28  ;;  %v4888_v43 = vpack.i.bf16 %v1524_v22, %v1522_v50  ;;  %v1169_v7 = vsel %vm1026_vm7, %v1167_v51, %v1168_v13  ;;  %v1171_v63 = vsel %vm1026_vm7, %v1168_v13, %v1170_v16 }
 0x3e9   :  { %v3284_v8 = vpop.f32.mrf.mxu2  ;;  %v4883_v41 = vpack.i.bf16 %v1171_v63, %v1169_v7  ;;  %v3613_v55 = vmax.f32 %v3549_v4, 0.0  ;;  %v1875_v3 = vsel %vm1732_vm15, %v1873_v15, %v1874_v6  ;;  %v1877_v24 = vsel %vm1732_vm15, %v1874_v6, %v1876_v44  ;;  %v3456_v4 = vpop.f32.mrf.mxu3 }
 0x3ea   :  { %4294 = vmatmul.msk.bf16.gmra.mxu1 %vm2310_vm8, %v2562_v58  ;;  %4366 = vmatmul.msk.bf16.gmra.mxu3 %vm2310_vm8, %v2562_v58  ;;  %v3285_v18 = vadd.f32 %v3284_v8, %v3056_v37  ;;  %v7288_v33 = vsel %vm701_vm3, 1.0, %v7627_v27  ;;  %v4893_v57 = vpack.i.bf16 %v1877_v24, %v1875_v3  ;;  %v4087_v3 = vld [vmem:[%s7604_s5 + $0x70] sm:$0xff] }
 0x3eb   :  { %4889 = vrot.lane.b32.xlu1 %v4888_v43, %s5002_s14  ;;  %4884 = vrot.lane.b32.xlu2 %v4883_v41, %s5001_s13  ;;  %v4859_v53 = vpop.permute.xlu0 %4858  ;;  %v3685_v59 = vmul.f32 %v7272_v52, %v3613_v55  ;;  %v1173_v43 = vrot.slane %v7288_v33, 1  ;;  %v1879_v63 = vrot.slane %v7288_v33, 3  ;;  %v1526_v15 = vrot.slane %v7288_v33, 2 }
 0x3ec   :  { %v4849_v19 = vpop.permute.xlu1 %4848  ;;  %v3454_v35 = vadd.f32 %v3453_v48, %v3285_v18  ;;  %v4861_v47 = vunpack.i.h.bf16 %v4859_v53  ;;  %v4860_v31 = vunpack.i.l.bf16 %v4859_v53  ;;  %4094 = vmatpush.msrb.mxu1 %v4087_v3 }
 0x3ed   :  { %v4851_v56 = vunpack.i.h.bf16 %v4849_v19  ;;  %v4850_v0 = vunpack.i.l.bf16 %v4849_v19  ;;  %v2889_v38 = vpop.f32.mrf.mxu0  ;;  %v3894_v37 = vsel %vm2310_vm8, %v3685_v59, -inf }
 0x3ee   :  { %v3550_v54 = vadd.f32 %v7047_v10, %v3454_v35  ;;  %v3059_v36 = vadd.f32 %v3058_v26, %v2889_v38 }
 0x3ef   :  { %v2364_v1 = vsel %vm2310_vm8, %v7073_v49, %v4851_v56  ;;  %v2363_v17 = vsel %vm2310_vm8, %v7083_v5, %v4850_v0 }
 0x3f0   :  { %v3614_v49 = vmax.f32 %v3550_v54, 0.0  ;;  %v2428_v20 = vsel %vm2375_vm13, %v2363_v17, %v4855_v12  ;;  %v2429_v5 = vsel %vm2375_vm13, %v2364_v1, %v4856_v2  ;;  %v3060_v54 = vpop.f32.mrf.mxu1 }
 0x3f1   :  { %v2493_v51 = vsel %vm2440_vm0, %v2428_v20, %v4860_v31  ;;  %v2494_v25 = vsel %vm2440_vm0, %v2429_v5, %v4861_v47 }
 0x3f2   :  { %v3686_v13 = vmul.f32 %v7282_v42, %v3614_v49  ;;  %v2557_v16 = vpack.c.bf16 %v2494_v25, %v2493_v51  ;;  %v3458_v51 = vpop.f32.mrf.mxu3 }
 0x3f3   :  { %632 = vperm.xlu1 %4899, %v7213_v29   ;;  %4894 = vrot.lane.b32.xlu2 %v4893_v57, %s5003_s15  ;;  %v601_v22 = vpop.permute.xlu0 %600 }
 0x3f4   :  { %v3895_v28 = vsel %vm2310_vm8, %v3686_v13, -inf  ;;  %v589_v50 = vpop.permute.xlu1 %588  ;;  %2903 = vmatmul.bf16.gmra.mxu0 %v2557_v16  ;;  %vm863_vm9 = vcmp.eq.s32.totalorder %v601_v22, %v5113_v32  ;;  %3301 = vmatmul.bf16.gmra.mxu2 %v2557_v16  ;;  %v3287_v7 = vpop.f32.mrf.mxu2 }
 0x3f5   :  { %v3896_v58 = vmax.f32 %v3894_v37, %v3895_v28  ;;  %vm700_vm4 = vcmp.eq.s32.totalorder %v589_v50, %v5113_v32  ;;  %v7302_v41 = vsel %vm863_vm9, 1.0, %v7627_v27  ;;  %v3288_v18 = vadd.f32 %v3287_v7, %v3059_v36  ;;  %v2891_v35 = vpop.f32.mrf.mxu0  ;;  %v7332_v36 = vld [vmem:[%s7603_s4 + $0x30] sm:$0xff] }
 0x3f6   :  { %v7299_v8 = vsel %vm700_vm4, 1.0, %v7627_v27  ;;  %v1175_v55 = vrot.slane %v7302_v41, 1  ;;  %v1881_v2 = vrot.slane %v7302_v41, 3  ;;  %v1528_v19 = vrot.slane %v7302_v41, 2 }
 0x3f7   :  { %v3897_v48 = vrot.slane %v3896_v58, 4  ;;  %v1172_v6 = vrot.slane %v7299_v8, 1  ;;  %v1878_v44 = vrot.slane %v7299_v8, 3  ;;  %v1525_v14 = vrot.slane %v7299_v8, 2 }
 0x3f8   :  { %v3457_v53 = vadd.f32 %v3456_v4, %v3288_v18  ;;  %v1176_v0 = vsel %vm1026_vm7, %v1173_v43, %v1175_v55  ;;  %v1882_v31 = vsel %vm1732_vm15, %v1879_v63, %v1881_v2  ;;  %v3061_v21 = vadd.f32 %v3060_v54, %v2891_v35  ;;  %v7339_v4 = vld [vmem:[%s7603_s4 + $0x38] sm:$0xff] }
 0x3f9   :  { %v3898_v12 = vmax.f32 %v3896_v58, %v3897_v48  ;;  %v1174_v56 = vsel %vm1026_vm7, %v1172_v6, %v1173_v43  ;;  %v1880_v47 = vsel %vm1732_vm15, %v1878_v44, %v1879_v63  ;;  %v1527_v20 = vsel %vm1379_vm14, %v1525_v14, %v1526_v15 }
 0x3fa   :  { %v4901_v17 = vpack.i.bf16 %v1176_v0, %v1174_v56  ;;  %v4911_v38 = vpack.i.bf16 %v1882_v31, %v1880_v47  ;;  %v3551_v24 = vadd.f32 %v7047_v10, %v3457_v53  ;;  %v1529_v5 = vsel %vm1379_vm14, %v1526_v15, %v1528_v19  ;;  %v4086_v0 = vld [vmem:[%s7604_s5 + $0x68] sm:$0xff] }
 0x3fb   :  { %v3899_v1 = vrot.slane %v3898_v12, 2  ;;  %638 = vperm.xlu2 %4900, %v7213_v29   ;;  %v4906_v16 = vpack.i.bf16 %v1529_v5, %v1527_v20  ;;  %v2232_v14 = vrot.slane %v7288_v33, 4  ;;  %v2231_v55 = vrot.slane %v7299_v8, 4  ;;  %4095 = vmatpush.msrb.mxu1 %v4086_v0 }
 0x3fc   :  { %4902 = vrot.lane.b32.xlu1 %v4901_v17, %s5001_s13  ;;  %v3289_v49 = vpop.f32.mrf.mxu2  ;;  %4912 = vrot.lane.b32.xlu0 %v4911_v38, %s5003_s15  ;;  %v3615_v13 = vmax.f32 %v3551_v24, 0.0  ;;  %v2234_v19 = vrot.slane %v7302_v41, 4 }
 0x3fd   :  { %v3900_v59 = vmax.f32 %v3898_v12, %v3899_v1  ;;  %v3290_v26 = vadd.f32 %v3289_v49, %v3061_v21  ;;  %v3063_v12 = vpop.f32.mrf.mxu1  ;;  %v2233_v47 = vsel %vm2085_vm6, %v2231_v55, %v2232_v14 }
 0x3fe   :  { %v3687_v50 = vmul.f32 %v7332_v36, %v3615_v13  ;;  %v2235_v1 = vsel %vm2085_vm6, %v2232_v14, %v2234_v19 }
 0x3ff   :  { %v3901_v25 = vrot.slane %v3900_v59, 1  ;;  %v3459_v57 = vadd.f32 %v3458_v51, %v3290_v26  ;;  %v4872_v15 = vpop.permute.xlu2 %4871  ;;  %v2564_v17 = vpack.c.bf16 %v2235_v1, %v2233_v47 }
 0x400   :  { %v4874_v3 = vunpack.i.h.bf16 %v4872_v15  ;;  %v4873_v24 = vunpack.i.l.bf16 %v4872_v15 }
 0x401   :  { %v3902_v37 = vmax.f32 %v3900_v59, %v3901_v25  ;;  %v3552_v29 = vadd.f32 %v7047_v10, %v3459_v57  ;;  %4295 = vmatmul.msk.bf16.gmra.mxu1 %vm2310_vm8, %v2564_v17  ;;  %4367 = vmatmul.msk.bf16.gmra.mxu3 %vm2310_vm8, %v2564_v17 }
 0x403   :  { %v7327_v28 = vsel %vm4009_vm5, %v3902_v37, %v6999_v40  ;;  %v3616_v22 = vmax.f32 %v3552_v29, 0.0  ;;  %4907 = vrot.lane.b32.xlu2 %v4906_v16, %s5002_s14  ;;  %v3966_v40 = vsel %vm2310_vm8, %v3687_v50, -inf  ;;  %v614_v41 = vpop.permute.xlu0 %613 }
 0x404   :  { %vm703_vm10 = vcmp.eq.s32.totalorder %v614_v41, %v5113_v32 }
 0x405   :  { %v3688_v58 = vmul.f32 %v7339_v4, %v3616_v22  ;;  %v3065_v51 = vpop.f32.mrf.mxu1 }
 0x407   :  { %v3967_v43 = vsel %vm2310_vm8, %v3688_v58, -inf  ;;  %v608_v38 = vpop.permute.xlu2 %607  ;;  %v7372_v58 = vsel %vm703_vm10, 1.0, %v7627_v27 }
 0x408   :  { %v3968_v7 = vmax.f32 %v3966_v40, %v3967_v43  ;;  %v1531_v15 = vrot.slane %v7372_v58, 2 }
 0x40a   :  { %v3969_v63 = vrot.slane %v3968_v7, 4 }
 0x40c   :  { %v3970_v18 = vmax.f32 %v3968_v7, %v3969_v63 }
 0x40e   :  { %v3971_v48 = vrot.slane %v3970_v18, 2 }
 0x410   :  { %v3972_v6 = vmax.f32 %v3970_v18, %v3971_v48  ;;  %v1178_v18 = vrot.slane %v7372_v58, 1  ;;  %v1884_v48 = vrot.slane %v7372_v58, 3 }
 0x412   :  { %v3973_v44 = vrot.slane %v3972_v6, 1 }
 0x414   :  { %v3974_v2 = vmax.f32 %v3972_v6, %v3973_v44 }
 0x416   :  { %v7349_v35 = vsel %vm4009_vm5, %v3974_v2, %v7113_v46  ;;  %v3461_v46 = vpop.f32.mrf.mxu3  ;;  %vm702_vm5 = vcmp.eq.s32.totalorder %v608_v38, %v5113_v32 }
 0x417   :  { %v4867_v53 = vpop.permute.xlu1 %4866  ;;  %v7369_v22 = vsel %vm702_vm5, 1.0, %v7627_v27 }
 0x418   :  { %v2894_v56 = vpop.f32.mrf.mxu0  ;;  %v4869_v31 = vunpack.i.h.bf16 %v4867_v53  ;;  %v4868_v54 = vunpack.i.l.bf16 %v4867_v53  ;;  %v1177_v7 = vrot.slane %v7369_v22, 1  ;;  %v1883_v63 = vrot.slane %v7369_v22, 3 }
 0x419   :  { %v3064_v21 = vadd.f32 %v3063_v12, %v2894_v56  ;;  %v1530_v44 = vrot.slane %v7369_v22, 2  ;;  %v2236_v38 = vrot.slane %v7369_v22, 4 }
 0x41a   :  { %v2366_v59 = vsel %vm2310_vm8, %v7162_v9, %v4869_v31  ;;  %v2365_v49 = vsel %vm2310_vm8, %v7159_v30, %v4868_v54  ;;  %v1179_v56 = vsel %vm1026_vm7, %v1177_v7, %v1178_v18  ;;  %v1885_v0 = vsel %vm1732_vm15, %v1883_v63, %v1884_v48 }
 0x41b   :  { %v2430_v16 = vsel %vm2375_vm13, %v2365_v49, %v4873_v24  ;;  %v2431_v37 = vsel %vm2375_vm13, %v2366_v59, %v4874_v3  ;;  %v1532_v1 = vsel %vm1379_vm14, %v1530_v44, %v1531_v15  ;;  %v2237_v3 = vrot.slane %v7372_v58, 4 }
 0x41e   :  { %v3292_v20 = vpop.f32.mrf.mxu2  ;;  %v3463_v2 = vpop.f32.mrf.mxu3 }
 0x41f   :  { %v3293_v5 = vadd.f32 %v3292_v20, %v3064_v21  ;;  %v4877_v26 = vpop.permute.xlu1 %4876 }
 0x420   :  { %v4879_v25 = vunpack.i.h.bf16 %v4877_v26  ;;  %v4878_v13 = vunpack.i.l.bf16 %v4877_v26  ;;  %v2896_v57 = vpop.f32.mrf.mxu0 }
 0x421   :  { %v3462_v29 = vadd.f32 %v3461_v46, %v3293_v5  ;;  %v3066_v9 = vadd.f32 %v3065_v51, %v2896_v57 }
 0x422   :  { %v2495_v50 = vsel %vm2440_vm0, %v2430_v16, %v4878_v13  ;;  %v2496_v30 = vsel %vm2440_vm0, %v2431_v37, %v4879_v25 }
 0x423   :  { %v2559_v40 = vpack.c.bf16 %v2496_v30, %v2495_v50  ;;  %v3553_v43 = vadd.f32 %v7047_v10, %v3462_v29 }
 0x425   :  { %2908 = vmatmul.bf16.gmra.mxu0 %v2559_v40  ;;  %3306 = vmatmul.bf16.gmra.mxu2 %v2559_v40  ;;  %v3617_v12 = vmax.f32 %v3553_v43, 0.0  ;;  %v4085_v40 = vld [vmem:[%s7604_s5 + $0x60] sm:$0xff] }
 0x426   :  { %v3294_v6 = vpop.f32.mrf.mxu2  ;;  %4096 = vmatpush.msrb.mxu1 %v4085_v40 }
 0x427   :  { %v3295_v14 = vadd.f32 %v3294_v6, %v3066_v9  ;;  %v620_v55 = vpop.permute.xlu1 %619  ;;  %v3689_v24 = vmul.f32 %v7118_v39, %v3617_v12  ;;  %v627_v6 = vpop.permute.xlu0 %626 }
 0x428   :  { %vm864_vm11 = vcmp.eq.s32.totalorder %v620_v55, %v5113_v32  ;;  %vm704_vm1 = vcmp.eq.s32.totalorder %v627_v6, %v5113_v32 }
 0x429   :  { %v3464_v19 = vadd.f32 %v3463_v2, %v3295_v14  ;;  %v4224_v53 = vsel %vm864_vm11, 1.0, %v7627_v27  ;;  %v3759_v13 = vsel %vm2310_vm8, %v3689_v24, -inf  ;;  %v3068_v14 = vpop.f32.mrf.mxu1 }
 0x42a   :  { %v1180_v47 = vrot.slane %v4224_v53, 1  ;;  %v1533_v31 = vrot.slane %v4224_v53, 2  ;;  %v1886_v54 = vrot.slane %v4224_v53, 3  ;;  %v2239_v41 = vrot.slane %v4224_v53, 4 }
 0x42b   :  { %v3554_v17 = vadd.f32 %v7047_v10, %v3464_v19  ;;  %v2238_v10 = vsel %vm2085_vm6, %v2236_v38, %v2237_v3  ;;  %v3466_v38 = vpop.f32.mrf.mxu3 }
 0x42c   :  { %v1181_v21 = vsel %vm1026_vm7, %v1178_v18, %v1180_v47  ;;  %v1887_v46 = vsel %vm1732_vm15, %v1884_v48, %v1886_v54  ;;  %v1534_v59 = vsel %vm1379_vm14, %v1531_v15, %v1533_v31  ;;  %v2240_v39 = vsel %vm2085_vm6, %v2237_v3, %v2239_v41 }
 0x42d   :  { %v3618_v49 = vmax.f32 %v3554_v17, 0.0  ;;  %v4916_v20 = vpack.i.bf16 %v1181_v21, %v1179_v56  ;;  %v4926_v5 = vpack.i.bf16 %v1887_v46, %v1885_v0  ;;  %v4921_v26 = vpack.i.bf16 %v1534_v59, %v1532_v1 }
 0x42e   :  { %v2566_v25 = vpack.c.bf16 %v2240_v39, %v2238_v10 }
 0x42f   :  { %v3690_v51 = vmul.f32 %v7125_v23, %v3618_v49  ;;  %4917 = vrot.lane.b32.xlu1 %v4916_v20, %s5001_s13  ;;  %4927 = vrot.lane.b32.xlu0 %v4926_v5, %s5003_s15 }
 0x430   :  { %4922 = vrot.lane.b32.xlu2 %v4921_v26, %s5002_s14  ;;  %4296 = vmatmul.msk.bf16.gmra.mxu1 %vm2310_vm8, %v2566_v25 }
 0x431   :  { %v3760_v57 = vsel %vm2310_vm8, %v3690_v51, -inf  ;;  %4368 = vmatmul.msk.bf16.gmra.mxu3 %vm2310_vm8, %v2566_v25 }
 0x432   :  { %v3761_v16 = vmax.f32 %v3759_v13, %v3760_v57 }
 0x434   :  { %v3762_v23 = vrot.slane %v3761_v16, 4 }
 0x436   :  { %v3763_v37 = vmax.f32 %v3761_v16, %v3762_v23 }
 0x438   :  { %v3764_v29 = vrot.slane %v3763_v37, 2 }
 0x43a   :  { %v3765_v9 = vmax.f32 %v3763_v37, %v3764_v29 }
 0x43c   :  { %v3766_v50 = vrot.slane %v3765_v9, 1 }
 0x43e   :  { %v3767_v30 = vmax.f32 %v3765_v9, %v3766_v50  ;;  %v3070_v9 = vpop.f32.mrf.mxu1  ;;  %v7443_v50 = vld [vmem:[%s7602_s3] ss:$0 sm:$0xff] }
 0x440   :  { %v7408_v43 = vsel %vm4011_vm12, %v3767_v30, %v7154_v45 }
 0x445   :  { %v4885_v7 = vpop.permute.xlu2 %4884 }
 0x446   :  { %v4887_v18 = vunpack.i.h.bf16 %v4885_v7  ;;  %v4886_v48 = vunpack.i.l.bf16 %v4885_v7 }
 0x448   :  { %v2368_v55 = vsel %vm2310_vm8, %v7237_v34, %v4887_v18  ;;  %v2367_v2 = vsel %vm2310_vm8, %v7227_v62, %v4886_v48  ;;  %v7421_v62 = vsel %vm704_vm1, 1.0, %v7627_v27 }
 0x449   :  { %v1182_v24 = vrot.slane %v7421_v62, 1  ;;  %v1535_v21 = vrot.slane %v7421_v62, 2  ;;  %v1888_v46 = vrot.slane %v7421_v62, 3  ;;  %v2241_v5 = vrot.slane %v7421_v62, 4 }
 0x44d   :  { %v4895_v63 = vpop.permute.xlu2 %4894 }
 0x44e   :  { %v4897_v45 = vunpack.i.h.bf16 %v4895_v63  ;;  %v4896_v56 = vunpack.i.l.bf16 %v4895_v63 }
 0x455   :  { %v639_v15 = vpop.permute.xlu2 %638 }
 0x456   :  { %vm865_vm2 = vcmp.eq.s32.totalorder %v639_v15, %v5113_v32 }
 0x457   :  { %v4225_v17 = vsel %vm865_vm2, 1.0, %v7627_v27 }
 0x458   :  { %v1891_v49 = vrot.slane %v4225_v17, 3  ;;  %v2244_v20 = vrot.slane %v4225_v17, 4  ;;  %v1185_v51 = vrot.slane %v4225_v17, 1  ;;  %v1538_v10 = vrot.slane %v4225_v17, 2 }
 0x45d   :  { %v4890_v44 = vpop.permute.xlu1 %4889 }
 0x45e   :  { %v4892_v12 = vunpack.i.h.bf16 %v4890_v44  ;;  %v4891_v19 = vunpack.i.l.bf16 %v4890_v44  ;;  %v2899_v53 = vpop.f32.mrf.mxu0 }
 0x45f   :  { %v3069_v0 = vadd.f32 %v3068_v14, %v2899_v53  ;;  %v4908_v14 = vpop.permute.xlu2 %4907 }
 0x460   :  { %v2432_v47 = vsel %vm2375_vm13, %v2367_v2, %v4891_v19  ;;  %v2433_v31 = vsel %vm2375_vm13, %v2368_v55, %v4892_v12  ;;  %v3468_v12 = vpop.f32.mrf.mxu3 }
 0x461   :  { %v2497_v54 = vsel %vm2440_vm0, %v2432_v47, %v4896_v56  ;;  %v2498_v34 = vsel %vm2440_vm0, %v2433_v31, %v4897_v45  ;;  %v4910_v56 = vunpack.i.h.bf16 %v4908_v14 }
 0x462   :  { %v2561_v1 = vpack.c.bf16 %v2498_v34, %v2497_v54 }
 0x464   :  { %2913 = vmatmul.bf16.gmra.mxu0 %v2561_v1  ;;  %3311 = vmatmul.bf16.gmra.mxu2 %v2561_v1  ;;  %v3297_v41 = vpop.f32.mrf.mxu2 }
 0x465   :  { %v633_v3 = vpop.permute.xlu1 %632  ;;  %v3298_v59 = vadd.f32 %v3297_v41, %v3069_v0  ;;  %v4909_v0 = vunpack.i.l.bf16 %v4908_v14 }
 0x466   :  { %vm705_vm3 = vcmp.eq.s32.totalorder %v633_v3, %v5113_v32  ;;  %v2901_v23 = vpop.f32.mrf.mxu0 }
 0x467   :  { %v7430_v26 = vsel %vm705_vm3, 1.0, %v7627_v27  ;;  %v3467_v39 = vadd.f32 %v3466_v38, %v3298_v59  ;;  %v3071_v18 = vadd.f32 %v3070_v9, %v2901_v23 }
 0x468   :  { %v1183_v25 = vrot.slane %v7430_v26, 1  ;;  %v1536_v13 = vrot.slane %v7430_v26, 2  ;;  %v1889_v57 = vrot.slane %v7430_v26, 3  ;;  %v2242_v16 = vrot.slane %v7430_v26, 4 }
 0x469   :  { %v3555_v30 = vadd.f32 %v7443_v50, %v3467_v39 }
 0x46a   :  { %v2243_v32 = vsel %vm2085_vm6, %v2241_v5, %v2242_v16  ;;  %v2245_v37 = vsel %vm2085_vm6, %v2242_v16, %v2244_v20  ;;  %v1890_v29 = vsel %vm1732_vm15, %v1888_v46, %v1889_v57  ;;  %v1892_v27 = vsel %vm1732_vm15, %v1889_v57, %v1891_v49  ;;  %v4083_v46 = vld [vmem:[%s7604_s5 + $0x50] sm:$0xff] }
 0x46b   :  { %v2568_v40 = vpack.c.bf16 %v2245_v37, %v2243_v32  ;;  %v4941_v7 = vpack.i.bf16 %v1892_v27, %v1890_v29  ;;  %v1537_v63 = vsel %vm1379_vm14, %v1535_v21, %v1536_v13  ;;  %v1539_v48 = vsel %vm1379_vm14, %v1536_v13, %v1538_v10  ;;  %v4084_v21 = vld [vmem:[%s7604_s5 + $0x58] sm:$0xff]  ;;  %v3471_v13 = vpop.f32.mrf.mxu3 }
 0x46c   :  { %v1184_v6 = vsel %vm1026_vm7, %v1182_v24, %v1183_v25  ;;  %v1186_v44 = vsel %vm1026_vm7, %v1183_v25, %v1185_v51  ;;  %v3299_v15 = vpop.f32.mrf.mxu2  ;;  %v4936_v55 = vpack.i.bf16 %v1539_v48, %v1537_v63  ;;  %v3619_v53 = vmax.f32 %v3555_v30, 0.0  ;;  %4097 = vmatpush.msrb.mxu1 %v4084_v21 }
 0x46d   :  { %4297 = vmatmul.msk.bf16.gmra.mxu1 %vm2310_vm8, %v2568_v40  ;;  %4369 = vmatmul.msk.bf16.gmra.mxu3 %vm2310_vm8, %v2568_v40  ;;  %v4931_v2 = vpack.i.bf16 %v1186_v44, %v1184_v6  ;;  %v3300_v19 = vadd.f32 %v3299_v15, %v3071_v18  ;;  %vm4013_vm6 = vcmask 1047559  }
 0x46e   :  { %4942 = vrot.lane.b32.xlu0 %v4941_v7, %s5003_s15  ;;  %v4903_v45 = vpop.permute.xlu1 %4902  ;;  %4937 = vrot.lane.b32.xlu2 %v4936_v55, %s5002_s14  ;;  %v4913_v47 = vpop.permute.xlu0 %4912  ;;  %v3691_v20 = vmul.f32 %v7182_v60, %v3619_v53 }
 0x46f   :  { %4932 = vrot.lane.b32.xlu1 %v4931_v2, %s5001_s13  ;;  %v4905_v31 = vunpack.i.h.bf16 %v4903_v45  ;;  %v4904_v54 = vunpack.i.l.bf16 %v4903_v45  ;;  %v3469_v34 = vadd.f32 %v3468_v12, %v3300_v19  ;;  %v4915_v1 = vunpack.i.h.bf16 %v4913_v47  ;;  %4098 = vmatpush.msrb.mxu1 %v4083_v46 }
 0x470   :  { %v4914_v17 = vunpack.i.l.bf16 %v4913_v47  ;;  %v3831_v57 = vsel %vm2310_vm8, %v3691_v20, -inf }
 0x471   :  { %v2370_v38 = vsel %vm2310_vm8, %v7288_v33, %v4905_v31  ;;  %v2369_v41 = vsel %vm2310_vm8, %v7299_v8, %v4904_v54  ;;  %v3556_v3 = vadd.f32 %v7443_v50, %v3469_v34  ;;  %v2904_v24 = vpop.f32.mrf.mxu0  ;;  %v3073_v33 = vpop.f32.mrf.mxu1 }
 0x472   :  { %v2434_v59 = vsel %vm2375_vm13, %v2369_v41, %v4909_v0  ;;  %v2435_v49 = vsel %vm2375_vm13, %v2370_v38, %v4910_v56  ;;  %v3074_v25 = vadd.f32 %v3073_v33, %v2904_v24 }
 0x473   :  { %v3620_v8 = vmax.f32 %v3556_v3, 0.0  ;;  %v2499_v5 = vsel %vm2440_vm0, %v2434_v59, %v4914_v17  ;;  %v2500_v51 = vsel %vm2440_vm0, %v2435_v49, %v4915_v1  ;;  %v3473_v6 = vpop.f32.mrf.mxu3 }
 0x474   :  { %v2563_v10 = vpack.c.bf16 %v2500_v51, %v2499_v5 }
 0x475   :  { %v3692_v39 = vmul.f32 %v7188_v61, %v3620_v8 }
 0x476   :  { %2918 = vmatmul.bf16.gmra.mxu0 %v2563_v10  ;;  %3316 = vmatmul.bf16.gmra.mxu2 %v2563_v10 }
 0x477   :  { %v3832_v16 = vsel %vm2310_vm8, %v3692_v39, -inf  ;;  %v3302_v23 = vpop.f32.mrf.mxu2 }
 0x478   :  { %v3833_v32 = vmax.f32 %v3831_v57, %v3832_v16  ;;  %v3303_v60 = vadd.f32 %v3302_v23, %v3074_v25 }
 0x479   :  { %v2906_v27 = vpop.f32.mrf.mxu0  ;;  %v3075_v30 = vpop.f32.mrf.mxu1 }
 0x47a   :  { %v3834_v37 = vrot.slane %v3833_v32, 4  ;;  %v3472_v29 = vadd.f32 %v3471_v13, %v3303_v60  ;;  %v3076_v61 = vadd.f32 %v3075_v30, %v2906_v27 }
 0x47c   :  { %v3835_v9 = vmax.f32 %v3833_v32, %v3834_v37  ;;  %v3557_v7 = vadd.f32 %v7443_v50, %v3472_v29  ;;  %v3476_v32 = vpop.f32.mrf.mxu3 }
 0x47e   :  { %v3836_v40 = vrot.slane %v3835_v9, 2  ;;  %v3621_v44 = vmax.f32 %v3557_v7, 0.0 }
 0x47f   :  { %v3304_v63 = vpop.f32.mrf.mxu2 }
 0x480   :  { %v3305_v18 = vadd.f32 %v3304_v63, %v3076_v61  ;;  %v3837_v48 = vmax.f32 %v3835_v9, %v3836_v40  ;;  %v3693_v12 = vmul.f32 %v7272_v52, %v3621_v44 }
 0x481   :  { %v3078_v51 = vpop.f32.mrf.mxu1 }
 0x482   :  { %v3474_v15 = vadd.f32 %v3473_v6, %v3305_v18  ;;  %v3838_v14 = vrot.slane %v3837_v48, 1  ;;  %v3903_v56 = vsel %vm2310_vm8, %v3693_v12, -inf }
 0x484   :  { %v3558_v55 = vadd.f32 %v7443_v50, %v3474_v15  ;;  %v3839_v2 = vmax.f32 %v3837_v48, %v3838_v14  ;;  %v3478_v7 = vpop.f32.mrf.mxu3 }
 0x486   :  { %v3622_v19 = vmax.f32 %v3558_v55, 0.0  ;;  %v7479_v53 = vsel %vm4011_vm12, %v3839_v2, %v7209_v11  ;;  %v4082_v11 = vld [vmem:[%s7604_s5 + $0x48] sm:$0xff] }
 0x487   :  { %4099 = vmatpush.msrb.mxu1 %v4082_v11 }
 0x488   :  { %v3694_v45 = vmul.f32 %v7282_v42, %v3622_v19 }
 0x489   :  { %v3080_v27 = vpop.f32.mrf.mxu1 }
 0x48a   :  { %v3904_v0 = vsel %vm2310_vm8, %v3694_v45, -inf  ;;  %v4923_v3 = vpop.permute.xlu2 %4922  ;;  %v4081_v45 = vld [vmem:[%s7604_s5 + $0x40] sm:$0xff] }
 0x48b   :  { %v3905_v47 = vmax.f32 %v3903_v56, %v3904_v0  ;;  %v4925_v21 = vunpack.i.h.bf16 %v4923_v3  ;;  %v4924_v46 = vunpack.i.l.bf16 %v4923_v3  ;;  %4100 = vmatpush.msrb.mxu1 %v4081_v45 }
 0x48d   :  { %v3906_v31 = vrot.slane %v3905_v47, 4 }
 0x48f   :  { %v3907_v54 = vmax.f32 %v3905_v47, %v3906_v31 }
 0x491   :  { %v3908_v34 = vrot.slane %v3907_v54, 2  ;;  %v3083_v11 = vpop.f32.mrf.mxu1 }
 0x493   :  { %v3909_v1 = vmax.f32 %v3907_v54, %v3908_v34 }
 0x495   :  { %v3910_v17 = vrot.slane %v3909_v1, 1 }
 0x497   :  { %v3911_v38 = vmax.f32 %v3909_v1, %v3910_v17 }
 0x499   :  { %v7486_v41 = vsel %vm4011_vm12, %v3911_v38, %v7327_v28 }
 0x4a1   :  { %v4918_v24 = vpop.permute.xlu1 %4917  ;;  %v4928_v59 = vpop.permute.xlu0 %4927 }
 0x4a2   :  { %v4920_v49 = vunpack.i.h.bf16 %v4918_v24  ;;  %v4919_v33 = vunpack.i.l.bf16 %v4918_v24  ;;  %v2909_v20 = vpop.f32.mrf.mxu0  ;;  %v4930_v8 = vunpack.i.h.bf16 %v4928_v59  ;;  %v4929_v5 = vunpack.i.l.bf16 %v4928_v59 }
 0x4a3   :  { %v3079_v16 = vadd.f32 %v3078_v51, %v2909_v20 }
 0x4a4   :  { %v2372_v28 = vsel %vm2310_vm8, %v7372_v58, %v4920_v49  ;;  %v2371_v10 = vsel %vm2310_vm8, %v7369_v22, %v4919_v33 }
 0x4a5   :  { %v2436_v39 = vsel %vm2375_vm13, %v2371_v10, %v4924_v46  ;;  %v2437_v25 = vsel %vm2375_vm13, %v2372_v28, %v4925_v21  ;;  %v3481_v28 = vpop.f32.mrf.mxu3 }
 0x4a6   :  { %v2501_v13 = vsel %vm2440_vm0, %v2436_v39, %v4929_v5  ;;  %v2502_v57 = vsel %vm2440_vm0, %v2437_v25, %v4930_v8 }
 0x4a7   :  { %v2565_v23 = vpack.c.bf16 %v2502_v57, %v2501_v13 }
 0x4a8   :  { %v3307_v60 = vpop.f32.mrf.mxu2 }
 0x4a9   :  { %v3308_v37 = vadd.f32 %v3307_v60, %v3079_v16  ;;  %2923 = vmatmul.bf16.gmra.mxu0 %v2565_v23  ;;  %3321 = vmatmul.bf16.gmra.mxu2 %v2565_v23  ;;  %v4080_v60 = vld [vmem:[%s7604_s5 + $0x38] sm:$0xff] }
 0x4aa   :  { %v2911_v58 = vpop.f32.mrf.mxu0  ;;  %4101 = vmatpush.msrb.mxu1 %v4080_v60 }
 0x4ab   :  { %v3477_v29 = vadd.f32 %v3476_v32, %v3308_v37  ;;  %v3081_v9 = vadd.f32 %v3080_v27, %v2911_v58 }
 0x4ad   :  { %v3559_v22 = vadd.f32 %v7443_v50, %v3477_v29  ;;  %v3483_v37 = vpop.f32.mrf.mxu3 }
 0x4af   :  { %v3623_v61 = vmax.f32 %v3559_v22, 0.0 }
 0x4b0   :  { %v3309_v30 = vpop.f32.mrf.mxu2 }
 0x4b1   :  { %v3310_v40 = vadd.f32 %v3309_v30, %v3081_v9  ;;  %v3695_v48 = vmul.f32 %v7332_v36, %v3623_v61  ;;  %v4970_v30 = vld [vmem:[%s7603_s4] sm:$0xff]  ;;  %v4971_v61 = vld [vmem:[%s7603_s4 + $0x8] sm:$0xff] }
 0x4b3   :  { %v3479_v63 = vadd.f32 %v3478_v7, %v3310_v40  ;;  %v3975_v15 = vsel %vm2310_vm8, %v3695_v48, -inf }
 0x4b5   :  { %v3560_v18 = vadd.f32 %v7443_v50, %v3479_v63  ;;  %v3486_v48 = vpop.f32.mrf.mxu3 }
 0x4b7   :  { %v3624_v6 = vmax.f32 %v3560_v18, 0.0 }
 0x4b9   :  { %v3696_v44 = vmul.f32 %v7339_v4, %v3624_v6 }
 0x4bb   :  { %v3976_v14 = vsel %vm2310_vm8, %v3696_v44, -inf }
 0x4bc   :  { %v3977_v55 = vmax.f32 %v3975_v15, %v3976_v14 }
 0x4be   :  { %v3978_v2 = vrot.slane %v3977_v55, 4 }
 0x4c0   :  { %v3979_v12 = vmax.f32 %v3977_v55, %v3978_v2 }
 0x4c2   :  { %v3980_v19 = vrot.slane %v3979_v12, 2 }
 0x4c4   :  { %v3981_v56 = vmax.f32 %v3979_v12, %v3980_v19  ;;  %v4079_v19 = vld [vmem:[%s7604_s5 + $0x30] sm:$0xff] }
 0x4c5   :  { %4102 = vmatpush.msrb.mxu1 %v4079_v19 }
 0x4c6   :  { %v3982_v0 = vrot.slane %v3981_v56, 1 }
 0x4c8   :  { %v3983_v47 = vmax.f32 %v3981_v56, %v3982_v0  ;;  %v4938_v54 = vpop.permute.xlu2 %4937 }
 0x4c9   :  { %v4940_v24 = vunpack.i.h.bf16 %v4938_v54  ;;  %v4939_v21 = vunpack.i.l.bf16 %v4938_v54 }
 0x4ca   :  { %v7510_v31 = vsel %vm4011_vm12, %v3983_v47, %v7349_v35 }
 0x4e0   :  { %v4943_v34 = vpop.permute.xlu0 %4942 }
 0x4e1   :  { %v4933_v1 = vpop.permute.xlu1 %4932  ;;  %v2914_v17 = vpop.f32.mrf.mxu0  ;;  %v4945_v49 = vunpack.i.h.bf16 %v4943_v34  ;;  %v4944_v33 = vunpack.i.l.bf16 %v4943_v34 }
 0x4e2   :  { %v4935_v38 = vunpack.i.h.bf16 %v4933_v1  ;;  %v4934_v3 = vunpack.i.l.bf16 %v4933_v1  ;;  %v3084_v8 = vadd.f32 %v3083_v11, %v2914_v17 }
 0x4e4   :  { %v2374_v46 = vsel %vm2310_vm8, %v7430_v26, %v4935_v38  ;;  %v2373_v59 = vsel %vm2310_vm8, %v7421_v62, %v4934_v3  ;;  %v3085_v62 = vpop.f32.mrf.mxu1  ;;  %v3488_v3 = vpop.f32.mrf.mxu3 }
 0x4e5   :  { %v2438_v35 = vsel %vm2375_vm13, %v2373_v59, %v4939_v21  ;;  %v2439_v20 = vsel %vm2375_vm13, %v2374_v46, %v4940_v24 }
 0x4e6   :  { %v2503_v5 = vsel %vm2440_vm0, %v2438_v35, %v4944_v33  ;;  %v2504_v51 = vsel %vm2440_vm0, %v2439_v20, %v4945_v49  ;;  %v4972_v49 = vld [vmem:[%s7603_s4 + $0x10] sm:$0xff] }
 0x4e7   :  { %v2567_v10 = vpack.c.bf16 %v2504_v51, %v2503_v5  ;;  %v3312_v39 = vpop.f32.mrf.mxu2 }
 0x4e8   :  { %v3313_v25 = vadd.f32 %v3312_v39, %v3084_v8  ;;  %v4973_v8 = vld [vmem:[%s7603_s4 + $0x18] sm:$0xff] }
 0x4e9   :  { %2928 = vmatmul.bf16.gmra.mxu0 %v2567_v10  ;;  %3326 = vmatmul.bf16.gmra.mxu2 %v2567_v10  ;;  %v2916_v13 = vpop.f32.mrf.mxu0 }
 0x4ea   :  { %v3482_v26 = vadd.f32 %v3481_v28, %v3313_v25  ;;  %v3086_v16 = vadd.f32 %v3085_v62, %v2916_v13 }
 0x4ec   :  { %v3561_v57 = vadd.f32 %v7443_v50, %v3482_v26  ;;  %v3088_v9 = vpop.f32.mrf.mxu1 }
 0x4ee   :  { %v3625_v29 = vmax.f32 %v3561_v57, 0.0 }
 0x4ef   :  { %v3314_v23 = vpop.f32.mrf.mxu2 }
 0x4f0   :  { %v3315_v32 = vadd.f32 %v3314_v23, %v3086_v16  ;;  %v3697_v40 = vmul.f32 %v4970_v30, %v3625_v29  ;;  %v4078_v16 = vld [vmem:[%s7604_s5 + $0x28] sm:$0xff] }
 0x4f1   :  { %4103 = vmatpush.msrb.mxu1 %v4078_v16 }
 0x4f2   :  { %v3484_v58 = vadd.f32 %v3483_v37, %v3315_v32  ;;  %v3768_v6 = vsel %vm2310_vm8, %v3697_v40, -inf  ;;  %v3491_v37 = vpop.f32.mrf.mxu3 }
 0x4f3   :  { %v2919_v22 = vpop.f32.mrf.mxu0 }
 0x4f4   :  { %v3562_v27 = vadd.f32 %v7443_v50, %v3484_v58  ;;  %v3089_v18 = vadd.f32 %v3088_v9, %v2919_v22  ;;  %v3090_v0 = vpop.f32.mrf.mxu1  ;;  %v4077_v22 = vld [vmem:[%s7604_s5 + $0x20] sm:$0xff] }
 0x4f5   :  { %4104 = vmatpush.msrb.mxu1 %v4077_v22 }
 0x4f6   :  { %v3626_v7 = vmax.f32 %v3562_v27, 0.0 }
 0x4f8   :  { %v3698_v63 = vmul.f32 %v4971_v61, %v3626_v7 }
 0x4f9   :  { %v3317_v15 = vpop.f32.mrf.mxu2 }
 0x4fa   :  { %v3769_v44 = vsel %vm2310_vm8, %v3698_v63, -inf  ;;  %v3318_v55 = vadd.f32 %v3317_v15, %v3089_v18  ;;  %v3493_v63 = vpop.f32.mrf.mxu3 }
 0x4fb   :  { %v3770_v14 = vmax.f32 %v3768_v6, %v3769_v44  ;;  %v2921_v45 = vpop.f32.mrf.mxu0 }
 0x4fc   :  { %v3487_v12 = vadd.f32 %v3486_v48, %v3318_v55  ;;  %v3091_v54 = vadd.f32 %v3090_v0, %v2921_v45  ;;  %v3093_v32 = vpop.f32.mrf.mxu1 }
 0x4fd   :  { %v3771_v2 = vrot.slane %v3770_v14, 4 }
 0x4fe   :  { %v3563_v47 = vadd.f32 %v7443_v50, %v3487_v12 }
 0x4ff   :  { %v3772_v56 = vmax.f32 %v3770_v14, %v3771_v2 }
 0x500   :  { %v3627_v11 = vmax.f32 %v3563_v47, 0.0 }
 0x501   :  { %v3773_v34 = vrot.slane %v3772_v56, 2  ;;  %v3319_v1 = vpop.f32.mrf.mxu2 }
 0x502   :  { %v3320_v17 = vadd.f32 %v3319_v1, %v3091_v54  ;;  %v3699_v33 = vmul.f32 %v4972_v49, %v3627_v11 }
 0x503   :  { %v3774_v38 = vmax.f32 %v3772_v56, %v3773_v34 }
 0x504   :  { %v3489_v24 = vadd.f32 %v3488_v3, %v3320_v17  ;;  %v3840_v51 = vsel %vm2310_vm8, %v3699_v33, -inf }
 0x505   :  { %v3775_v21 = vrot.slane %v3774_v38, 1 }
 0x506   :  { %v3564_v46 = vadd.f32 %v7443_v50, %v3489_v24 }
 0x507   :  { %v3776_v59 = vmax.f32 %v3774_v38, %v3775_v21  ;;  %v3496_v38 = vpop.f32.mrf.mxu3 }
 0x508   :  { %v3628_v35 = vmax.f32 %v3564_v46, 0.0  ;;  %v4075_v46 = vld [vmem:[%s7604_s5 + $0x10] sm:$0xff] }
 0x509   :  { %v7543_v20 = vsel %vm4013_vm6, %v3776_v59, %v7408_v43 }
 0x50a   :  { %v3700_v5 = vmul.f32 %v4973_v8, %v3628_v35 }
 0x50c   :  { %v3841_v28 = vsel %vm2310_vm8, %v3700_v5, -inf }
 0x50d   :  { %v3842_v10 = vmax.f32 %v3840_v51, %v3841_v28 }
 0x50f   :  { %v3843_v39 = vrot.slane %v3842_v10, 4  ;;  %v3498_v8 = vpop.f32.mrf.mxu3 }
 0x511   :  { %v3844_v25 = vmax.f32 %v3842_v10, %v3843_v39 }
 0x513   :  { %v3845_v26 = vrot.slane %v3844_v25, 2 }
 0x515   :  { %v3846_v13 = vmax.f32 %v3844_v25, %v3845_v26 }
 0x517   :  { %v3847_v62 = vrot.slane %v3846_v13, 1 }
 0x519   :  { %v3848_v57 = vmax.f32 %v3846_v13, %v3847_v62 }
 0x51b   :  { %v4030_v43 = vsel %vm4013_vm6, %v3848_v57, %v7479_v53  ;;  %v3095_v53 = vpop.f32.mrf.mxu1 }
 0x51c   :  { %4031 = vrot.lane.b32.xlu1 %v4030_v43, %s5001_s13 }
 0x523   :  { %v3098_v1 = vpop.f32.mrf.mxu1 }
 0x526   :  { %v2924_v23 = vpop.f32.mrf.mxu0 }
 0x527   :  { %v3094_v60 = vadd.f32 %v3093_v32, %v2924_v23 }
 0x52c   :  { %v3322_v29 = vpop.f32.mrf.mxu2 }
 0x52d   :  { %v3323_v58 = vadd.f32 %v3322_v29, %v3094_v60  ;;  %v4074_v60 = vld [vmem:[%s7604_s5 + $0x8] sm:$0xff] }
 0x52e   :  { %v2926_v9 = vpop.f32.mrf.mxu0 }
 0x52f   :  { %v3492_v27 = vadd.f32 %v3491_v37, %v3323_v58  ;;  %v3096_v40 = vadd.f32 %v3095_v53, %v2926_v9  ;;  %v4948_v53 = vld [vmem:[%s7605_s6] ss:$0 sm:$0xff] }
 0x531   :  { %v3565_v30 = vadd.f32 %v7443_v50, %v3492_v27 }
 0x533   :  { %v3629_v18 = vmax.f32 %v3565_v30, 0.0 }
 0x534   :  { %v3324_v7 = vpop.f32.mrf.mxu2 }
 0x535   :  { %v3325_v61 = vadd.f32 %v3324_v7, %v3096_v40  ;;  %v3701_v44 = vmul.f32 %v7272_v52, %v3629_v18  ;;  %v4076_v52 = vld [vmem:[%s7604_s5 + $0x18] sm:$0xff] }
 0x536   :  { %4105 = vmatpush.msrb.mxu1 %v4076_v52 }
 0x537   :  { %v3494_v48 = vadd.f32 %v3493_v63, %v3325_v61  ;;  %v3912_v55 = vsel %vm2310_vm8, %v3701_v44, -inf }
 0x538   :  { %4106 = vmatpush.msrb.mxu1 %v4075_v46 }
 0x539   :  { %v3566_v6 = vadd.f32 %v7443_v50, %v3494_v48 }
 0x53a   :  { %4107 = vmatpush.msrb.mxu1 %v4074_v60 }
 0x53b   :  { %v3630_v15 = vmax.f32 %v3566_v6, 0.0 }
 0x53d   :  { %v3702_v14 = vmul.f32 %v7282_v42, %v3630_v15 }
 0x53f   :  { %v3913_v2 = vsel %vm2310_vm8, %v3702_v14, -inf }
 0x540   :  { %v3914_v12 = vmax.f32 %v3912_v55, %v3913_v2 }
 0x542   :  { %v3915_v19 = vrot.slane %v3914_v12, 4 }
 0x544   :  { %v3916_v45 = vmax.f32 %v3914_v12, %v3915_v19 }
 0x546   :  { %v3917_v56 = vrot.slane %v3916_v45, 2 }
 0x548   :  { %v3918_v0 = vmax.f32 %v3916_v45, %v3917_v56 }
 0x54a   :  { %v3919_v47 = vrot.slane %v3918_v0, 1 }
 0x54c   :  { %v3920_v54 = vmax.f32 %v3918_v0, %v3919_v47 }
 0x54e   :  { %v4048_v34 = vsel %vm4013_vm6, %v3920_v54, %v7486_v41  ;;  %v3100_v41 = vpop.f32.mrf.mxu1 }
 0x54f   :  { %4049 = vrot.lane.b32.xlu2 %v4048_v34, %s5002_s14 }
 0x566   :  { %v2929_v42 = vpop.f32.mrf.mxu0 }
 0x567   :  { %v3099_v17 = vadd.f32 %v3098_v1, %v2929_v42 }
 0x56c   :  { %v3327_v3 = vpop.f32.mrf.mxu2 }
 0x56d   :  { %v3328_v11 = vadd.f32 %v3327_v3, %v3099_v17 }
 0x56e   :  { %v2931_v21 = vpop.f32.mrf.mxu0 }
 0x56f   :  { %v3497_v24 = vadd.f32 %v3496_v38, %v3328_v11  ;;  %v3101_v49 = vadd.f32 %v3100_v41, %v2931_v21 }
 0x571   :  { %v3567_v59 = vadd.f32 %v7443_v50, %v3497_v24 }
 0x573   :  { %v3631_v5 = vmax.f32 %v3567_v59, 0.0 }
 0x574   :  { %v3329_v33 = vpop.f32.mrf.mxu2 }
 0x575   :  { %v3330_v35 = vadd.f32 %v3329_v33, %v3101_v49  ;;  %v3703_v10 = vmul.f32 %v7332_v36, %v3631_v5  ;;  %v4073_v36 = vld [vmem:[%s7604_s5] sm:$0xff] }
 0x576   :  { %4108 = vmatpush.msrb.mxu1 %v4073_v36 }
 0x577   :  { %v3499_v51 = vadd.f32 %v3498_v8, %v3330_v35  ;;  %v3984_v26 = vsel %vm2310_vm8, %v3703_v10, -inf }
 0x579   :  { %v3568_v28 = vadd.f32 %v7443_v50, %v3499_v51 }
 0x57b   :  { %v3632_v39 = vmax.f32 %v3568_v28, 0.0 }
 0x57d   :  { %v3704_v25 = vmul.f32 %v7339_v4, %v3632_v39 }
 0x57f   :  { %v3985_v13 = vsel %vm2310_vm8, %v3704_v25, -inf }
 0x580   :  { %v3986_v62 = vmax.f32 %v3984_v26, %v3985_v13 }
 0x582   :  { %v3987_v57 = vrot.slane %v3986_v62, 4 }
 0x584   :  { %v3988_v43 = vmax.f32 %v3986_v62, %v3987_v57 }
 0x586   :  { %v3989_v16 = vrot.slane %v3988_v43, 2 }
 0x588   :  { %v3990_v23 = vmax.f32 %v3988_v43, %v3989_v16 }
 0x58a   :  { %v3991_v32 = vrot.slane %v3990_v23, 1 }
 0x58c   :  { %v3992_v4 = vmax.f32 %v3990_v23, %v3991_v32 }
 0x58e   :  { %v4066_v50 = vsel %vm4013_vm6, %v3992_v4, %v7510_v31  ;;  %v4032_v37 = vpop.permute.xlu1 %4031 }
 0x58f   :  { %4067 = vrot.lane.b32.xlu0 %v4066_v50, %s5003_s15  ;;  %v4070_v58 = vsel %vm2310_vm8, %v7543_v20, %v4032_v37  ;;  %s4121_s15 = sshll.u32 %s7606_s7, 4  ;;  %s4122_s15 = int_to_ptr.hbm [resolvable:$true] %s4121_s15 }
 0x5a9   :  { %v4050_v29 = vpop.permute.xlu2 %4049 }
 0x5aa   :  { %v4071_v27 = vsel %vm2375_vm13, %v4070_v58, %v4050_v29 }
 0x601   :  { %v4068_v22 = vpop.permute.xlu0 %4067 }
 0x602   :  { %v4072_v9 = vsel %vm2440_vm0, %v4071_v27, %v4068_v22 }
 0x603   :  { %4109 = vmatmul.f32.vlgmr.msrb.gmra.mxu1 %v4072_v9 }
 0x680   :  { %v4110_v31 = vpop.f32.mrf.mxu1 }
 0x681   :  { %v4111_v30 = vadd.f32 %v4948_v53, %v4110_v31 }
 0x683   :  { %4113 = vst [vmem:[#allocation2] sm:$0xff] %v4111_v30 }
 0x684   :  { %4124 = dma.vmem_to_hbm [thread:$0]  %s4120_s16, 128, %s4122_s15, [#allocation3]  }
 0x685   :  { %4998 = dma.done.wait [#allocation3], 128  }
 0x686   :  { %4999 = vsyncadd [#allocation3], 4294967168 }
 0x687   :  { %4129 = vsyncpa [#allocation3], 1 }

</bundles_post_ra>
